<compile_context>
chip_gen: v7x
topology: tpu7x:2x2x1
jax: 0.10.0
libtpu: 0.0.40
codegen_flags: <defaults>
</compile_context>

<pallas_src>
import functools

import jax
import jax.numpy as jnp
from jax import lax
from jax.experimental import pallas as pl
from jax.experimental.pallas import tpu as pltpu


def make_divisible(v, divisor=8, min_value=None):
    min_value = min_value or divisor
    new_v = max(min_value, int(v + divisor / 2) // divisor * divisor)
    if new_v < 0.9 * v:
        new_v += divisor
    return new_v


# ----------------------------- Pallas kernel -----------------------------
def _inverted_residual_kernel(
    x_ref,        # (NB, H, W*Cin)     bf16  lane-dense input slab
    w_pw_ref,     # (W*Cin, W*mid)     bf16  block-diag expand weight (BN1 folded)
    b1_ref,       # (1, W*mid)         f32
    s_sh_ref,     # (2, NH, NH)        bf16  h-shift matrices (dh=-1, dh=+1)
    b_dw_ref,     # (3, W*mid, W*mid)  bf16  banded depthwise matrices (BN2 folded)
    b2_ref,       # (1, W*mid)         f32
    w_se_r_ref,   # (W*mid, rd)        f32   SE reduce (1/(H*W) pooling folded)
    b_se_r_ref,   # (1, rd)            f32
    w_se_e_ref,   # (rd, W*mid)        f32   SE expand (W-tiled)
    b_se_e_ref,   # (1, W*mid)         f32
    w_pwl_ref,    # (W*mid, W*Cout)    bf16  block-diag project weight (BN3 folded)
    b3_ref,       # (1, W*Cout)        f32
    o_ref,        # (NB, H, W*Cout)    f32   lane-dense output slab
    *,
    H: int,
    has_residual: bool,
):
    NB = x_ref.shape[0]
    WCin = x_ref.shape[2]
    Wmid = w_pw_ref.shape[1]
    WCout = o_ref.shape[2]
    NH = NB * H

    xf = x_ref[...].reshape(NH, WCin)                      # bf16, row-grouping view

    # --- 1x1 expansion conv (block-diag MXU matmul, K = W*Cin) + BN1 + ReLU ---
    h1 = jnp.dot(xf, w_pw_ref[...], preferred_element_type=jnp.float32)
    h1 = jnp.maximum(h1 + b1_ref[...], 0.0)                # (NH, Wmid) f32
    h1b = h1.astype(jnp.bfloat16)

    # --- 3x3 depthwise conv, stride 1, SAME — all on the MXU ---
    #   acc[r, w*mid+m] = sum_{dh,dw} h1[r+dh, (w+dw)*mid+m] * k[dh, dw, m]
    #   h-shift: S_dh @ h1b   (0/1 per-image shift matrix; exact, no rounding)
    #   w-taps : (...) @ B_dh (banded block matrix; zero blocks give zero padding)
    acc = jnp.dot(h1b, b_dw_ref[1], preferred_element_type=jnp.float32)   # dh = 0
    for slot, t in ((0, 0), (1, 2)):                        # dh = -1, dh = +1
        th = jnp.dot(s_sh_ref[slot], h1b,
                     preferred_element_type=jnp.float32).astype(jnp.bfloat16)
        acc = acc + jnp.dot(th, b_dw_ref[t], preferred_element_type=jnp.float32)
    h2 = jnp.maximum(acc + b2_ref[...], 0.0)                # (NH, Wmid) f32

    # --- SqueezeExcite: global avg pool -> reduce -> ReLU -> expand -> sigmoid ---
    h2i = h2.reshape(NB, H, Wmid)
    pooled = jnp.sum(h2i, axis=1)                           # (NB, Wmid); /(H*W) folded in w_se_r
    se = jnp.dot(pooled, w_se_r_ref[...], preferred_element_type=jnp.float32)
    se = jnp.maximum(se + b_se_r_ref[...], 0.0)             # (NB, rd)
    gate = jax.nn.sigmoid(
        jnp.dot(se, w_se_e_ref[...], preferred_element_type=jnp.float32)
        + b_se_e_ref[...])                                  # (NB, Wmid), W-tiled
    h2g = (h2i * gate[:, None, :]).reshape(NH, Wmid)

    # --- 1x1 projection conv (block-diag MXU matmul, K = W*mid) + BN3 + residual ---
    h3 = jnp.dot(h2g.astype(jnp.bfloat16), w_pwl_ref[...],
                 preferred_element_type=jnp.float32)
    h3 = h3 + b3_ref[...]
    if has_residual:
        # in_chs == out_chs, stride == 1 (guarded in the wrapper).
        # TODO(synk): drop_path is a no-op here (inference / drop_path_rate=0.0).
        h3 = h3 + xf.astype(jnp.float32)
    o_ref[...] = h3.reshape(NB, H, WCout).astype(o_ref.dtype)


# ----------------------------- wrapper -----------------------------
def inverted_residual_pallas(x_nchw, params, *, batch_block=None):
    N, Cin, H, W = x_nchw.shape
    mid = params['w_pw'].shape[1]
    Cout = params['w_pwl'].shape[1]
    has_residual = (Cin == Cout)          # stride fixed at 1 in this kernel

    if batch_block is None:
        # grid >= 2 keeps both v7x TensorCores busy (dimension_semantics parallel);
        # single-TC chips (v5e/v6e) only pay ~0.35us/step extra.
        batch_block = N // 2 if (N >= 2 and N % 2 == 0) else N
    NB = batch_block
    assert N % NB == 0, (N, NB)

    # NCHW -> NHWC -> lane-dense (N, H, W*Cin) bf16 slab: fills all 128 lanes of
    # the x block and halves the input HBM->VMEM DMA bytes.
    x = jnp.transpose(x_nchw, (0, 2, 3, 1)).reshape(N, H, W * Cin).astype(jnp.bfloat16)

    f32 = jnp.float32
    eye_w = jnp.eye(W, dtype=f32)

    # One-time BN-scale fold + block-diagonal / W-tiled weight prep (wrapper-side).
    w_pw = (params['w_pw'] * params['s1']).astype(f32)            # (Cin, mid)
    w_pw_bd = jnp.kron(eye_w, w_pw).astype(jnp.bfloat16)          # (W*Cin, W*mid)
    w_pwl = (params['w_pwl'] * params['s3']).astype(f32)          # (mid, Cout)
    w_pwl_bd = jnp.kron(eye_w, w_pwl).astype(jnp.bfloat16)        # (W*mid, W*Cout)

    # Depthwise: one banded (W*mid, W*mid) matrix per dh; missing off-band blocks
    # realize the SAME zero padding along w.
    w_dw = (params['w_dw'] * params['s2'][0]).astype(f32)         # (3, 3, mid)
    b_dw = jnp.stack([
        sum(jnp.kron(jnp.eye(W, k=-dw, dtype=f32),
                     jnp.diag(w_dw[dh + 1, dw + 1, :]))
            for dw in (-1, 0, 1))
        for dh in (-1, 0, 1)
    ]).astype(jnp.bfloat16)                                       # (3, W*mid, W*mid)

    # h-direction shift matrices: block-diagonal per image, so image/batch borders
    # are zero-padded exactly (no in-kernel masks).
    s_sh = jnp.stack([
        jnp.kron(jnp.eye(NB, dtype=f32), jnp.eye(H, k=dh, dtype=f32))
        for dh in (-1, 1)
    ]).astype(jnp.bfloat16)                                       # (2, NB*H, NB*H)

    # Biases / SE weights, tiled along W so they broadcast on the packed layout.
    b1_t = jnp.tile(params['b1'].astype(f32), (1, W))             # (1, W*mid)
    b2_t = jnp.tile(params['b2'].astype(f32), (1, W))             # (1, W*mid)
    b3_t = jnp.tile(params['b3'].astype(f32), (1, W))             # (1, W*Cout)
    w_se_r_t = jnp.tile(params['w_se_r'].astype(f32), (W, 1)) / float(H * W)  # (W*mid, rd)
    b_se_r = params['b_se_r'].astype(f32)                         # (1, rd)
    w_se_e_t = jnp.tile(params['w_se_e'].astype(f32), (1, W))     # (rd, W*mid)
    b_se_e_t = jnp.tile(params['b_se_e'].astype(f32), (1, W))     # (1, W*mid)

    grid = (N // NB,)

    def full(arr):
        nd = arr.ndim
        return pl.BlockSpec(arr.shape, lambda *_: (0,) * nd)

    kernel = functools.partial(_inverted_residual_kernel, H=H,
                               has_residual=has_residual)

    out = pl.pallas_call(
        kernel,
        out_shape=jax.ShapeDtypeStruct((N, H, W * Cout), jnp.float32),
        grid_spec=pltpu.PrefetchScalarGridSpec(
            num_scalar_prefetch=0,
            grid=grid,
            in_specs=[
                pl.BlockSpec((NB, H, W * Cin), lambda n: (n, 0, 0)),
                full(w_pw_bd), full(b1_t),
                full(s_sh), full(b_dw), full(b2_t),
                full(w_se_r_t), full(b_se_r), full(w_se_e_t), full(b_se_e_t),
                full(w_pwl_bd), full(b3_t),
            ],
            out_specs=pl.BlockSpec((NB, H, W * Cout), lambda n: (n, 0, 0)),
        ),
        compiler_params=pltpu.CompilerParams(
            dimension_semantics=("parallel",),
            # 32 MiB: above v5e's 16 MiB default scoped limit, safely inside
            # v7x's 64 MiB physical VMEM at these block sizes.
            vmem_limit_bytes=32 * 1024 * 1024,
        ),
    )(x, w_pw_bd, b1_t, s_sh, b_dw, b2_t,
      w_se_r_t, b_se_r, w_se_e_t, b_se_e_t, w_pwl_bd, b3_t)

    out = out.reshape(N, H, W, Cout)                    # lane-dense slab -> NHWC
    return jnp.transpose(out, (0, 3, 1, 2))             # NHWC -> NCHW


# --------------------- deterministic parameter init ---------------------
def init_params(key, in_chs, out_chs, exp_ratio=4.0, se_ratio=0.25, eps=1e-5):
    mid = make_divisible(in_chs * exp_ratio)
    rd = make_divisible(in_chs * se_ratio)
    ks = list(jax.random.split(key, 20))

    def bn_fold(kg, kb, km, kv, c):
        gamma = 1.0 + 0.1 * jax.random.normal(kg, (c,), jnp.float32)
        beta = 0.1 * jax.random.normal(kb, (c,), jnp.float32)
        mean = 0.1 * jax.random.normal(km, (c,), jnp.float32)
        var = jax.random.uniform(kv, (c,), jnp.float32, minval=0.5, maxval=1.5)
        scale = gamma / jnp.sqrt(var + eps)
        bias = beta - mean * scale
        return scale.reshape(1, c), bias.reshape(1, c)

    s1, b1 = bn_fold(ks[0], ks[1], ks[2], ks[3], mid)
    s2, b2 = bn_fold(ks[4], ks[5], ks[6], ks[7], mid)
    s3, b3 = bn_fold(ks[8], ks[9], ks[10], ks[11], out_chs)

    return {
        # conv_pw: torch (mid, in, 1, 1) -> (in, mid) matmul weight
        'w_pw': 0.2 * jax.random.normal(ks[12], (in_chs, mid), jnp.float32),
        's1': s1, 'b1': b1,
        # conv_dw: torch (mid, 1, 3, 3) -> (3, 3, mid)
        'w_dw': 0.2 * jax.random.normal(ks[13], (3, 3, mid), jnp.float32),
        's2': s2, 'b2': b2,
        # SE conv_reduce: (rd, mid, 1, 1) -> (mid, rd); conv_expand: (mid, rd, 1, 1) -> (rd, mid)
        'w_se_r': 0.2 * jax.random.normal(ks[14], (mid, rd), jnp.float32),
        'b_se_r': 0.05 * jax.random.normal(ks[15], (1, rd), jnp.float32),
        'w_se_e': 0.2 * jax.random.normal(ks[16], (rd, mid), jnp.float32),
        'b_se_e': 0.05 * jax.random.normal(ks[17], (1, mid), jnp.float32),
        # conv_pwl: torch (out, mid, 1, 1) -> (mid, out)
        'w_pwl': 0.2 * jax.random.normal(ks[18], (mid, out_chs), jnp.float32),
        's3': s3, 'b3': b3,
    }


# --------------------- pure-JAX reference for sanity ---------------------
def ref_forward(x_nchw, params, *, has_residual):
    x = jnp.transpose(x_nchw, (0, 2, 3, 1))
    h = jnp.einsum('nhwc,cm->nhwm', x, params['w_pw'])
    h = jnp.maximum(h * params['s1'][0] + params['b1'][0], 0.0)
    mid = h.shape[-1]
    rhs = params['w_dw'].reshape(3, 3, 1, mid)
    h = lax.conv_general_dilated(h, rhs, (1, 1), 'SAME',
                                 dimension_numbers=('NHWC', 'HWIO', 'NHWC'),
                                 feature_group_count=mid)
    h = jnp.maximum(h * params['s2'][0] + params['b2'][0], 0.0)
    se = h.mean(axis=(1, 2), keepdims=True)
    se = jnp.maximum(jnp.einsum('nijm,mr->nijr', se, params['w_se_r'])
                     + params['b_se_r'][0], 0.0)
    gate = jax.nn.sigmoid(jnp.einsum('nijr,rm->nijm', se, params['w_se_e'])
                          + params['b_se_e'][0])
    h = h * gate
    h = jnp.einsum('nhwm,mo->nhwo', h, params['w_pwl'])
    h = h * params['s3'][0] + params['b3'][0]
    if has_residual:
        h = h + x
    return jnp.transpose(h, (0, 3, 1, 2))


if __name__ == "__main__":
    key = jax.random.PRNGKey(0)

    # --- Test 1: residual config (in == out), square spatial, N = 2 ---
    in_chs, out_chs, N, H, W = 8, 8, 2, 16, 16
    params = init_params(key, in_chs, out_chs, exp_ratio=4.0, se_ratio=0.25)
    x = jax.random.normal(jax.random.fold_in(key, 123), (N, in_chs, H, W), jnp.float32)

    out = jax.block_until_ready(inverted_residual_pallas(x, params))
    ref = ref_forward(x, params, has_residual=True)
    assert out.shape == (N, out_chs, H, W), out.shape
    err = float(jnp.max(jnp.abs(out - ref)))
    # bf16 MXU inputs with f32 accumulation (intentional inference precision).
    assert err < 1e-1, f"test1 max abs err {err}"

    # --- Test 2: non-residual (in != out), non-square H != W, N > 2 ---
    in2, out2, N2, H2, W2 = 8, 16, 4, 8, 16
    params2 = init_params(jax.random.fold_in(key, 7), in2, out2,
                          exp_ratio=4.0, se_ratio=0.25)
    x2 = jax.random.normal(jax.random.fold_in(key, 321), (N2, in2, H2, W2), jnp.float32)

    out2_arr = jax.block_until_ready(inverted_residual_pallas(x2, params2))
    ref2 = ref_forward(x2, params2, has_residual=False)
    assert out2_arr.shape == (N2, out2, H2, W2), out2_arr.shape
    err2 = float(jnp.max(jnp.abs(out2_arr - ref2)))
    assert err2 < 1e-1, f"test2 max abs err {err2}"

    print("KERNEL_OK")
</pallas_src>

<mosaic_0001>
module attributes {stable_mosaic.version = 11 : i64} {
  func.func @_inverted_residual_kernel(%arg0: i32, %arg1: memref<1x16x128xbf16, #tpu.memory_space<vmem>>, %arg2: memref<128x512xbf16, #tpu.memory_space<vmem>>, %arg3: memref<1x512xf32, #tpu.memory_space<vmem>>, %arg4: memref<2x16x16xbf16, #tpu.memory_space<vmem>>, %arg5: memref<3x512x512xbf16, #tpu.memory_space<vmem>>, %arg6: memref<1x512xf32, #tpu.memory_space<vmem>>, %arg7: memref<512x8xf32, #tpu.memory_space<vmem>>, %arg8: memref<1x8xf32, #tpu.memory_space<vmem>>, %arg9: memref<8x512xf32, #tpu.memory_space<vmem>>, %arg10: memref<1x512xf32, #tpu.memory_space<vmem>>, %arg11: memref<512x128xbf16, #tpu.memory_space<vmem>>, %arg12: memref<1x128xf32, #tpu.memory_space<vmem>>, %arg13: memref<1x16x128xf32, #tpu.memory_space<vmem>>) attributes {dimension_semantics = [#tpu.dimension_semantics<parallel>], iteration_bounds = array<i64: 2>, scalar_prefetch = 0 : i64, scratch_operands = 0 : i64, tpu.core_type = #tpu.core_type<tc>, window_params = [{transform_indices = @transform_0, window_bounds = array<i64: 1, 16, 128>}, {pipeline_mode = #tpu.pipeline_mode<synchronous>, transform_indices = @transform_1, window_bounds = array<i64: 128, 512>}, {pipeline_mode = #tpu.pipeline_mode<synchronous>, transform_indices = @transform_2, window_bounds = array<i64: 1, 512>}, {pipeline_mode = #tpu.pipeline_mode<synchronous>, transform_indices = @transform_3, window_bounds = array<i64: 2, 16, 16>}, {pipeline_mode = #tpu.pipeline_mode<synchronous>, transform_indices = @transform_4, window_bounds = array<i64: 3, 512, 512>}, {pipeline_mode = #tpu.pipeline_mode<synchronous>, transform_indices = @transform_5, window_bounds = array<i64: 1, 512>}, {pipeline_mode = #tpu.pipeline_mode<synchronous>, transform_indices = @transform_6, window_bounds = array<i64: 512, 8>}, {pipeline_mode = #tpu.pipeline_mode<synchronous>, transform_indices = @transform_7, window_bounds = array<i64: 1, 8>}, {pipeline_mode = #tpu.pipeline_mode<synchronous>, transform_indices = @transform_8, window_bounds = array<i64: 8, 512>}, {pipeline_mode = #tpu.pipeline_mode<synchronous>, transform_indices = @transform_9, window_bounds = array<i64: 1, 512>}, {pipeline_mode = #tpu.pipeline_mode<synchronous>, transform_indices = @transform_10, window_bounds = array<i64: 512, 128>}, {pipeline_mode = #tpu.pipeline_mode<synchronous>, transform_indices = @transform_11, window_bounds = array<i64: 1, 128>}, {transform_indices = @transform_12, window_bounds = array<i64: 1, 16, 128>}]} {
    %c0 = arith.constant 0 : index
    %c0_0 = arith.constant 0 : index
    %c0_1 = arith.constant 0 : index
    %0 = vector.load %arg1[%c0, %c0_0, %c0_1] : memref<1x16x128xbf16, #tpu.memory_space<vmem>>, vector<1x16x128xbf16>
    %1 = vector.shape_cast %0 : vector<1x16x128xbf16> to vector<16x128xbf16>
    %c0_2 = arith.constant 0 : index
    %c0_3 = arith.constant 0 : index
    %2 = vector.load %arg2[%c0_2, %c0_3] : memref<128x512xbf16, #tpu.memory_space<vmem>>, vector<128x512xbf16>
    %cst = arith.constant dense<0.000000e+00> : vector<16x512xf32>
    %3 = tpu.matmul %1, %2, %cst {dimension_numbers = #tpu.dot_dimension_numbers<[1], [0], [0], [1], [0, 0, 1, 1], [], []>} : vector<16x128xbf16>, vector<128x512xbf16>, vector<16x512xf32> -> vector<16x512xf32>
    %c0_4 = arith.constant 0 : index
    %c0_5 = arith.constant 0 : index
    %4 = vector.load %arg3[%c0_4, %c0_5] : memref<1x512xf32, #tpu.memory_space<vmem>>, vector<1x512xf32>
    %5 = vector.broadcast %4 : vector<1x512xf32> to vector<16x512xf32>
    %6 = arith.addf %3, %5 : vector<16x512xf32>
    %cst_6 = arith.constant 0.000000e+00 : f32
    %7 = vector.broadcast %cst_6 : f32 to vector<16x512xf32>
    %8 = arith.maximumf %6, %7 : vector<16x512xf32>
    %9 = arith.truncf %8 : vector<16x512xf32> to vector<16x512xbf16>
    %c1 = arith.constant 1 : index
    %c0_7 = arith.constant 0 : index
    %c0_8 = arith.constant 0 : index
    %10 = vector.load %arg5[%c1, %c0_7, %c0_8] : memref<3x512x512xbf16, #tpu.memory_space<vmem>>, vector<1x512x512xbf16>
    %11 = vector.shape_cast %10 : vector<1x512x512xbf16> to vector<512x512xbf16>
    %cst_9 = arith.constant dense<0.000000e+00> : vector<16x512xf32>
    %12 = tpu.matmul %9, %11, %cst_9 {dimension_numbers = #tpu.dot_dimension_numbers<[1], [0], [0], [1], [0, 0, 1, 1], [], []>} : vector<16x512xbf16>, vector<512x512xbf16>, vector<16x512xf32> -> vector<16x512xf32>
    %c0_10 = arith.constant 0 : index
    %c0_11 = arith.constant 0 : index
    %c0_12 = arith.constant 0 : index
    %13 = vector.load %arg4[%c0_10, %c0_11, %c0_12] : memref<2x16x16xbf16, #tpu.memory_space<vmem>>, vector<1x16x16xbf16>
    %14 = vector.shape_cast %13 : vector<1x16x16xbf16> to vector<16x16xbf16>
    %cst_13 = arith.constant dense<0.000000e+00> : vector<16x512xf32>
    %15 = tpu.matmul %14, %9, %cst_13 {dimension_numbers = #tpu.dot_dimension_numbers<[1], [0], [0], [1], [0, 0, 1, 1], [], []>} : vector<16x16xbf16>, vector<16x512xbf16>, vector<16x512xf32> -> vector<16x512xf32>
    %16 = arith.truncf %15 : vector<16x512xf32> to vector<16x512xbf16>
    %c0_14 = arith.constant 0 : index
    %c0_15 = arith.constant 0 : index
    %c0_16 = arith.constant 0 : index
    %17 = vector.load %arg5[%c0_14, %c0_15, %c0_16] : memref<3x512x512xbf16, #tpu.memory_space<vmem>>, vector<1x512x512xbf16>
    %18 = vector.shape_cast %17 : vector<1x512x512xbf16> to vector<512x512xbf16>
    %cst_17 = arith.constant dense<0.000000e+00> : vector<16x512xf32>
    %19 = tpu.matmul %16, %18, %cst_17 {dimension_numbers = #tpu.dot_dimension_numbers<[1], [0], [0], [1], [0, 0, 1, 1], [], []>} : vector<16x512xbf16>, vector<512x512xbf16>, vector<16x512xf32> -> vector<16x512xf32>
    %20 = arith.addf %12, %19 : vector<16x512xf32>
    %c1_18 = arith.constant 1 : index
    %c0_19 = arith.constant 0 : index
    %c0_20 = arith.constant 0 : index
    %21 = vector.load %arg4[%c1_18, %c0_19, %c0_20] : memref<2x16x16xbf16, #tpu.memory_space<vmem>>, vector<1x16x16xbf16>
    %22 = vector.shape_cast %21 : vector<1x16x16xbf16> to vector<16x16xbf16>
    %cst_21 = arith.constant dense<0.000000e+00> : vector<16x512xf32>
    %23 = tpu.matmul %22, %9, %cst_21 {dimension_numbers = #tpu.dot_dimension_numbers<[1], [0], [0], [1], [0, 0, 1, 1], [], []>} : vector<16x16xbf16>, vector<16x512xbf16>, vector<16x512xf32> -> vector<16x512xf32>
    %24 = arith.truncf %23 : vector<16x512xf32> to vector<16x512xbf16>
    %c2 = arith.constant 2 : index
    %c0_22 = arith.constant 0 : index
    %c0_23 = arith.constant 0 : index
    %25 = vector.load %arg5[%c2, %c0_22, %c0_23] : memref<3x512x512xbf16, #tpu.memory_space<vmem>>, vector<1x512x512xbf16>
    %26 = vector.shape_cast %25 : vector<1x512x512xbf16> to vector<512x512xbf16>
    %cst_24 = arith.constant dense<0.000000e+00> : vector<16x512xf32>
    %27 = tpu.matmul %24, %26, %cst_24 {dimension_numbers = #tpu.dot_dimension_numbers<[1], [0], [0], [1], [0, 0, 1, 1], [], []>} : vector<16x512xbf16>, vector<512x512xbf16>, vector<16x512xf32> -> vector<16x512xf32>
    %28 = arith.addf %20, %27 : vector<16x512xf32>
    %c0_25 = arith.constant 0 : index
    %c0_26 = arith.constant 0 : index
    %29 = vector.load %arg6[%c0_25, %c0_26] : memref<1x512xf32, #tpu.memory_space<vmem>>, vector<1x512xf32>
    %30 = vector.broadcast %29 : vector<1x512xf32> to vector<16x512xf32>
    %31 = arith.addf %28, %30 : vector<16x512xf32>
    %cst_27 = arith.constant 0.000000e+00 : f32
    %32 = vector.broadcast %cst_27 : f32 to vector<16x512xf32>
    %33 = arith.maximumf %31, %32 : vector<16x512xf32>
    %34 = vector.shape_cast %33 : vector<16x512xf32> to vector<1x16x512xf32>
    %cst_28 = arith.constant dense<0.000000e+00> : vector<1x512xf32>
    %35 = vector.multi_reduction <add>, %34, %cst_28 [1] : vector<1x16x512xf32> to vector<1x512xf32>
    %c0_29 = arith.constant 0 : index
    %c0_30 = arith.constant 0 : index
    %36 = vector.load %arg7[%c0_29, %c0_30] : memref<512x8xf32, #tpu.memory_space<vmem>>, vector<512x8xf32>
    %cst_31 = arith.constant dense<0.000000e+00> : vector<1x8xf32>
    %37 = tpu.matmul %35, %36, %cst_31 {dimension_numbers = #tpu.dot_dimension_numbers<[1], [0], [0], [1], [0, 0, 1, 1], [], []>} : vector<1x512xf32>, vector<512x8xf32>, vector<1x8xf32> -> vector<1x8xf32>
    %c0_32 = arith.constant 0 : index
    %c0_33 = arith.constant 0 : index
    %38 = vector.load %arg8[%c0_32, %c0_33] : memref<1x8xf32, #tpu.memory_space<vmem>>, vector<1x8xf32>
    %39 = arith.addf %37, %38 : vector<1x8xf32>
    %cst_34 = arith.constant 0.000000e+00 : f32
    %40 = vector.broadcast %cst_34 : f32 to vector<1x8xf32>
    %41 = arith.maximumf %39, %40 : vector<1x8xf32>
    %c0_35 = arith.constant 0 : index
    %c0_36 = arith.constant 0 : index
    %42 = vector.load %arg9[%c0_35, %c0_36] : memref<8x512xf32, #tpu.memory_space<vmem>>, vector<8x512xf32>
    %cst_37 = arith.constant dense<0.000000e+00> : vector<1x512xf32>
    %43 = tpu.matmul %41, %42, %cst_37 {dimension_numbers = #tpu.dot_dimension_numbers<[1], [0], [0], [1], [0, 0, 1, 1], [], []>} : vector<1x8xf32>, vector<8x512xf32>, vector<1x512xf32> -> vector<1x512xf32>
    %c0_38 = arith.constant 0 : index
    %c0_39 = arith.constant 0 : index
    %44 = vector.load %arg10[%c0_38, %c0_39] : memref<1x512xf32, #tpu.memory_space<vmem>>, vector<1x512xf32>
    %45 = arith.addf %43, %44 : vector<1x512xf32>
    %46 = arith.negf %45 : vector<1x512xf32>
    %47 = math.exp %46 : vector<1x512xf32>
    %cst_40 = arith.constant 1.000000e+00 : f32
    %48 = vector.broadcast %cst_40 : f32 to vector<1x512xf32>
    %49 = arith.addf %48, %47 : vector<1x512xf32>
    %50 = arith.divf %48, %49 : vector<1x512xf32>
    %51 = vector.shape_cast %50 : vector<1x512xf32> to vector<1x1x512xf32>
    %52 = vector.broadcast %51 : vector<1x1x512xf32> to vector<1x16x512xf32>
    %53 = arith.mulf %34, %52 : vector<1x16x512xf32>
    %54 = vector.shape_cast %53 : vector<1x16x512xf32> to vector<16x512xf32>
    %55 = arith.truncf %54 : vector<16x512xf32> to vector<16x512xbf16>
    %c0_41 = arith.constant 0 : index
    %c0_42 = arith.constant 0 : index
    %56 = vector.load %arg11[%c0_41, %c0_42] : memref<512x128xbf16, #tpu.memory_space<vmem>>, vector<512x128xbf16>
    %cst_43 = arith.constant dense<0.000000e+00> : vector<16x128xf32>
    %57 = tpu.matmul %55, %56, %cst_43 {dimension_numbers = #tpu.dot_dimension_numbers<[1], [0], [0], [1], [0, 0, 1, 1], [], []>} : vector<16x512xbf16>, vector<512x128xbf16>, vector<16x128xf32> -> vector<16x128xf32>
    %c0_44 = arith.constant 0 : index
    %c0_45 = arith.constant 0 : index
    %58 = vector.load %arg12[%c0_44, %c0_45] : memref<1x128xf32, #tpu.memory_space<vmem>>, vector<1x128xf32>
    %59 = vector.broadcast %58 : vector<1x128xf32> to vector<16x128xf32>
    %60 = arith.addf %57, %59 : vector<16x128xf32>
    %61 = arith.extf %1 : vector<16x128xbf16> to vector<16x128xf32>
    %62 = arith.addf %60, %61 : vector<16x128xf32>
    %63 = vector.shape_cast %62 : vector<16x128xf32> to vector<1x16x128xf32>
    %c0_46 = arith.constant 0 : index
    %c0_47 = arith.constant 0 : index
    %c0_48 = arith.constant 0 : index
    %64 = vector.load %arg13[%c0_46, %c0_47, %c0_48] : memref<1x16x128xf32, #tpu.memory_space<vmem>>, vector<1x16x128xf32>
    tpu.vector_store %arg13[%c0_46, %c0_47, %c0_48], %63 {strides = array<i32>} : memref<1x16x128xf32, #tpu.memory_space<vmem>>, vector<1x16x128xf32>,
    return
  }
  func.func @transform_0(%arg0: i32) -> (i32, i32, i32) {
    %c0_i32 = arith.constant 0 : i32
    %c0_i32_0 = arith.constant 0 : i32
    %c0_i32_1 = arith.constant 0 : i32
    return %arg0, %c0_i32, %c0_i32_0 : i32, i32, i32
  }
  func.func @transform_1(%arg0: i32) -> (i32, i32) {
    %c0_i32 = arith.constant 0 : i32
    %c0_i32_0 = arith.constant 0 : i32
    %c0_i32_1 = arith.constant 0 : i32
    return %c0_i32, %c0_i32_0 : i32, i32
  }
  func.func @transform_2(%arg0: i32) -> (i32, i32) {
    %c0_i32 = arith.constant 0 : i32
    %c0_i32_0 = arith.constant 0 : i32
    %c0_i32_1 = arith.constant 0 : i32
    return %c0_i32, %c0_i32_0 : i32, i32
  }
  func.func @transform_3(%arg0: i32) -> (i32, i32, i32) {
    %c0_i32 = arith.constant 0 : i32
    %c0_i32_0 = arith.constant 0 : i32
    %c0_i32_1 = arith.constant 0 : i32
    %c0_i32_2 = arith.constant 0 : i32
    return %c0_i32, %c0_i32_0, %c0_i32_1 : i32, i32, i32
  }
  func.func @transform_4(%arg0: i32) -> (i32, i32, i32) {
    %c0_i32 = arith.constant 0 : i32
    %c0_i32_0 = arith.constant 0 : i32
    %c0_i32_1 = arith.constant 0 : i32
    %c0_i32_2 = arith.constant 0 : i32
    return %c0_i32, %c0_i32_0, %c0_i32_1 : i32, i32, i32
  }
  func.func @transform_5(%arg0: i32) -> (i32, i32) {
    %c0_i32 = arith.constant 0 : i32
    %c0_i32_0 = arith.constant 0 : i32
    %c0_i32_1 = arith.constant 0 : i32
    return %c0_i32, %c0_i32_0 : i32, i32
  }
  func.func @transform_6(%arg0: i32) -> (i32, i32) {
    %c0_i32 = arith.constant 0 : i32
    %c0_i32_0 = arith.constant 0 : i32
    %c0_i32_1 = arith.constant 0 : i32
    return %c0_i32, %c0_i32_0 : i32, i32
  }
  func.func @transform_7(%arg0: i32) -> (i32, i32) {
    %c0_i32 = arith.constant 0 : i32
    %c0_i32_0 = arith.constant 0 : i32
    %c0_i32_1 = arith.constant 0 : i32
    return %c0_i32, %c0_i32_0 : i32, i32
  }
  func.func @transform_8(%arg0: i32) -> (i32, i32) {
    %c0_i32 = arith.constant 0 : i32
    %c0_i32_0 = arith.constant 0 : i32
    %c0_i32_1 = arith.constant 0 : i32
    return %c0_i32, %c0_i32_0 : i32, i32
  }
  func.func @transform_9(%arg0: i32) -> (i32, i32) {
    %c0_i32 = arith.constant 0 : i32
    %c0_i32_0 = arith.constant 0 : i32
    %c0_i32_1 = arith.constant 0 : i32
    return %c0_i32, %c0_i32_0 : i32, i32
  }
  func.func @transform_10(%arg0: i32) -> (i32, i32) {
    %c0_i32 = arith.constant 0 : i32
    %c0_i32_0 = arith.constant 0 : i32
    %c0_i32_1 = arith.constant 0 : i32
    return %c0_i32, %c0_i32_0 : i32, i32
  }
  func.func @transform_11(%arg0: i32) -> (i32, i32) {
    %c0_i32 = arith.constant 0 : i32
    %c0_i32_0 = arith.constant 0 : i32
    %c0_i32_1 = arith.constant 0 : i32
    return %c0_i32, %c0_i32_0 : i32, i32
  }
  func.func @transform_12(%arg0: i32) -> (i32, i32, i32) {
    %c0_i32 = arith.constant 0 : i32
    %c0_i32_0 = arith.constant 0 : i32
    %c0_i32_1 = arith.constant 0 : i32
    return %arg0, %c0_i32, %c0_i32_0 : i32, i32, i32
  }
}

</mosaic_0001>

<bundles_post_ra>
// kernel: tpu_custom_call.1
= control target key start
LH: loop header
LB: loop body
LE: loop exit
PB: predicated region body
PF: predicated region fallthrough
CT: control target
= control target key end

     0   :  { %s7713_s0 = inlined_call_operand.hbm [shape: bf16[2,16,128], index: 0, kind: input, shape index: {}]   ;;  %s7714_s1 = inlined_call_operand.hbm [shape: bf16[128,512], index: 1, kind: input, shape index: {}]   ;;  %s7715_s2 = inlined_call_operand.hbm [shape: f32[1,512], index: 2, kind: input, shape index: {}]   ;;  %s7716_s3 = inlined_call_operand.hbm [shape: bf16[2,16,16], index: 3, kind: input, shape index: {}]   ;;  %s7717_s4 = inlined_call_operand.hbm [shape: bf16[3,512,512], index: 4, kind: input, shape index: {}]   ;;  %s7718_s5 = inlined_call_operand.hbm [shape: f32[1,512], index: 5, kind: input, shape index: {}]   ;;  %s7719_s6 = inlined_call_operand.vmem [shape: f32[512,8], index: 6, kind: input, shape index: {}]   ;;  %s7720_s7 = inlined_call_operand.hbm [shape: f32[1,8], index: 7, kind: input, shape index: {}]   ;;  %s7721_s8 = inlined_call_operand.hbm [shape: f32[8,512], index: 8, kind: input, shape index: {}]   ;;  %s7722_s9 = inlined_call_operand.hbm [shape: f32[1,512], index: 9, kind: input, shape index: {}]   ;;  %s7723_s10 = inlined_call_operand.hbm [shape: bf16[512,128], index: 10, kind: input, shape index: {}]   ;;  %s7724_s11 = inlined_call_operand.hbm [shape: f32[1,128], index: 11, kind: input, shape index: {}]   ;;  %s7725_s12 = inlined_call_operand.hbm [shape: f32[2,16,128], index: 12, kind: output, shape index: {}]  }
   0x1   :  { %7738 = sst [smem:[#allocation29_spill]] %s7713_s0 }
   0x2   :  { %7739 = sst [smem:[#allocation30_spill]] %s7714_s1 }
   0x3   :  { %7740 = sst [smem:[#allocation31_spill]] %s7715_s2 }
   0x4   :  { %7741 = sst [smem:[#allocation32_spill]] %s7716_s3 }
   0x5   :  { %7742 = sst [smem:[#allocation33_spill]] %s7717_s4 }
   0x6   :  { %7743 = sst [smem:[#allocation34_spill]] %s7719_s6 }
   0x7   :  { %7744 = sst [smem:[#allocation35_spill]] %s7725_s12 }
   0x8   :  { %17 = vsyncpa [#allocation3], 0 }
   0x9   :  { %19 = vsyncpa [#allocation3 + $0x1], 0 }
   0xa   :  { %20 = vsyncpa [#allocation6], 0 }
   0xb   :  { %21 = vsyncpa [#allocation9], 0 }
   0xc   :  { %22 = vsyncpa [#allocation12], 0 }
   0xd   :  { %23 = vsyncpa [#allocation15], 0 }
   0xe   :  { %24 = vsyncpa [#allocation18], 0 }
   0xf   :  { %25 = vsyncpa [#allocation4], 0 }
  0x10   :  { %27 = vsyncpa [#allocation4 + $0x1], 0  ;;  %s6978_s21 = smov 0   ;;  %s6980_s22 = smov 0  }
  0x11   :  { %s6982_s23 = smov 0   ;;  %s6984_s24 = smov 0  }
  0x12 LB: > { %s6893_s25 = smov [#allocation5]   ;;  %s6999_s27 = sadd.s32 4294967295, %s6891_s24   ;;  %s6891_s24 = sphi %s6984_s24, %s7784_s24   ;;  %s6887_s23 = sphi %s6982_s23, %s7783_s23   ;;  %s6883_s22 = sphi %s6980_s22, %s7782_s22   ;;  %s6879_s21 = sphi %s6978_s21, %s7781_s21  }
  0x13   : > { %s333_s26 = sshll.u32 %s6893_s25, 4  ;;  %p4948_p0 = scmp.ge.s32.totalorder %s6891_s24, 1  ;;  %s7004_s26 = int_to_ptr.vmem [resolvable:$true] %s333_s26 }
  0x14   : > { %p7731_p1 = scmp.eq.s32.totalorder %s6999_s27, 0  ;;  %p321_p2 = scmp.lt.s32.totalorder %s6891_s24, 3 }
  0x15   : > { %s6894_s29 = smov [#allocation8]   ;;  %s6895_s14 = smov [#allocation11]  }
  0x16   : > { %p7006_p3 = pnand %p4948_p0, %p321_p2  ;;  %s357_s30 = sshll.u32 %s6894_s29, 4  ;;  %s7019_s30 = int_to_ptr.vmem [resolvable:$true] %s357_s30 }
  0x17   : > { %s7021_s15 = sshll.u32 %s6895_s14, 4  ;;  %s7748_s1 = sld [smem:[#allocation30_spill]]  ;;  %s385_s15 = int_to_ptr.vmem [resolvable:$true] %s7021_s15 }
  0x18   : > { %s7745_s28 = scalar_select %p7006_p3, 1, 0 }
  0x19   : > { %p5707_p5 = pneg %p7006_p3 }
  0x1a   : > { %7746 = sst [smem:[#allocation28_spill]] %s7745_s28 }
  0x1b   : > { %p7015_p6 = pnand %p5707_p5, %p7731_p1 }
  0x1d   : > { %s6495_s18 = scalar_lea.hbm %s7748_s1, 4096  ;;  %p7031_p8 = pneg %p7015_p6 }
  0x1e   : > { %p6496_p7 = scmp.ne.s32.totalorder %s7748_s1, %s6495_s18  ;;  %p6502_p11 = scmp.lt.u32.totalorder %s6495_s18, %s7748_s1 }
  0x20   : > { %p6498_p9 = pnand %p7031_p8, %p6496_p7 }
  0x22   : > { %p6499_p10 = pneg %p6498_p9 }
  0x24   : > { %p6504_p12 = pnand %p6502_p11, %p6499_p10 }
  0x26   : > { %6507 = shalt.err (!%p6504_p12)
}
  0x27   : > { %s6508_s16 = scalar_lea.vmem %s7004_s26, 4096  ;;  %p6516_p5 = scmp.lt.s32.totalorder %s7004_s26, %s7004_s26 }
  0x28   : > { %p6509_p13 = scmp.ne.s32.totalorder %s7004_s26, %s6508_s16  ;;  %p6517_p4 = scmp.lt.s32.totalorder %s6508_s16, %s6508_s16 }
  0x2a   : > { %p6511_p0 = pnand %p6509_p13, %p7031_p8  ;;  %p6518_p7 = por %p6517_p4, %p6516_p5 }
  0x2c   : > { %p6512_p2 = pneg %p6511_p0 }
  0x2e   : > { %p6519_p9 = pnand %p6518_p7, %p6512_p2 }
  0x30   : > { %6522 = shalt.err (!%p6519_p9)
}
  0x31   : > { %s7730_s17 = smov 256   ;;  %s7733_s18 = smov 16  }
  0x32   : > { %5710 = dma.hbm_to_vmem [thread:$0]  (!%p7015_p6), %s7748_s1, 4096, %s7004_s26, [#allocation6], %s7730_s17, %s7730_s17, %s7733_s18  }
  0x33   : > { %s7750_s3 = sld [smem:[#allocation32_spill]] }
  0x39   : > { %s6523_s16 = scalar_lea.hbm %s7750_s3, 256 }
  0x3a   : > { %p6524_p4 = scmp.ne.s32.totalorder %s7750_s3, %s6523_s16  ;;  %p6530_p12 = scmp.lt.u32.totalorder %s6523_s16, %s7750_s3 }
  0x3c   : > { %p6526_p10 = pnand %p6524_p4, %p7031_p8 }
  0x3e   : > { %p6527_p11 = pneg %p6526_p10 }
  0x40   : > { %p6532_p13 = pnand %p6530_p12, %p6527_p11 }
  0x42   : > { %6535 = shalt.err (!%p6532_p13)
}
  0x43   : > { %s6536_s26 = scalar_lea.vmem %s7019_s30, 256  ;;  %p6544_p7 = scmp.lt.s32.totalorder %s7019_s30, %s7019_s30 }
  0x44   : > { %p6537_p0 = scmp.ne.s32.totalorder %s7019_s30, %s6536_s26  ;;  %p6545_p9 = scmp.lt.s32.totalorder %s6536_s26, %s6536_s26 }
  0x46   : > { %p6539_p2 = pnand %p6537_p0, %p7031_p8  ;;  %p6546_p4 = por %p6545_p9, %p6544_p7 }
  0x48   : > { %p6540_p5 = pneg %p6539_p2 }
  0x4a   : > { %p6547_p10 = pnand %p6546_p4, %p6540_p5 }
  0x4c   : > { %6550 = shalt.err (!%p6547_p10)
}
  0x4d   : > { %s7734_s6 = smov 64   ;;  %s7736_s0 = smov 4  }
  0x4e   : > { %5716 = dma.hbm_to_vmem [thread:$0]  (!%p7015_p6), %s7750_s3, 256, %s7019_s30, [#allocation9], %s7734_s6, %s7734_s6, %s7736_s0  }
  0x4f   : > { %s6551_s29 = scalar_lea.hbm %s7718_s5, 64 }
  0x50   : > { %p6552_p11 = scmp.ne.s32.totalorder %s7718_s5, %s6551_s29  ;;  %p6558_p0 = scmp.lt.u32.totalorder %s6551_s29, %s7718_s5 }
  0x52   : > { %p6554_p12 = pnand %p6552_p11, %p7031_p8 }
  0x54   : > { %p6555_p13 = pneg %p6554_p12 }
  0x56   : > { %p6560_p2 = pnand %p6558_p0, %p6555_p13 }
  0x58   : > { %6563 = shalt.err (!%p6560_p2)
}
  0x59   : > { %s6564_s12 = scalar_lea.vmem %s385_s15, 64  ;;  %p6572_p4 = scmp.lt.s32.totalorder %s385_s15, %s385_s15 }
  0x5a   : > { %p6565_p5 = scmp.ne.s32.totalorder %s385_s15, %s6564_s12  ;;  %p6573_p10 = scmp.lt.s32.totalorder %s6564_s12, %s6564_s12 }
  0x5c   : > { %p6567_p7 = pnand %p6565_p5, %p7031_p8  ;;  %p6574_p1 = por %p6573_p10, %p6572_p4 }
  0x5e   : > { %p6568_p9 = pneg %p6567_p7 }
  0x60   : > { %p6575_p3 = pnand %p6574_p1, %p6568_p9 }
  0x62   : > { %6578 = shalt.err (!%p6575_p3)
}
  0x63   : > { %5722 = dma.hbm_to_vmem [thread:$0]  (!%p7015_p6), %s7718_s5, 64, %s385_s15, [#allocation12]  }
  0x64   : > { %s6900_s17 = smov [#allocation14]   ;;  %s6901_s20 = smov [#allocation17]  }
  0x65   : > { %s409_s19 = sshll.u32 %s6900_s17, 4  ;;  %s430_s29 = sshll.u32 %s6901_s20, 4  ;;  %s410_s19 = int_to_ptr.vmem [resolvable:$true] %s409_s19  ;;  %s431_s29 = int_to_ptr.vmem [resolvable:$true] %s430_s29 }
  0x66   : > { %s6579_s26 = scalar_lea.hbm %s7721_s8, 512 }
  0x67   : > { %p6580_p1 = scmp.ne.s32.totalorder %s7721_s8, %s6579_s26  ;;  %p6586_p12 = scmp.lt.u32.totalorder %s6579_s26, %s7721_s8 }
  0x69   : > { %p6582_p3 = pnand %p6580_p1, %p7031_p8 }
  0x6b   : > { %p6583_p11 = pneg %p6582_p3 }
  0x6d   : > { %p6588_p13 = pnand %p6586_p12, %p6583_p11 }
  0x6f   : > { %6591 = shalt.err (!%p6588_p13)
}
  0x70   : > { %s6592_s15 = scalar_lea.vmem %s410_s19, 512  ;;  %p6600_p7 = scmp.lt.s32.totalorder %s410_s19, %s410_s19 }
  0x71   : > { %p6593_p0 = scmp.ne.s32.totalorder %s410_s19, %s6592_s15  ;;  %p6601_p9 = scmp.lt.s32.totalorder %s6592_s15, %s6592_s15 }
  0x73   : > { %p6595_p2 = pnand %p6593_p0, %p7031_p8  ;;  %p6602_p4 = por %p6601_p9, %p6600_p7 }
  0x75   : > { %p6596_p5 = pneg %p6595_p2 }
  0x77   : > { %p6603_p10 = pnand %p6602_p4, %p6596_p5 }
  0x79   : > { %6606 = shalt.err (!%p6603_p10)
}
  0x7a   : > { %5728 = dma.hbm_to_vmem [thread:$0]  (!%p7015_p6), %s7721_s8, 512, %s410_s19, [#allocation15]  }
  0x7b   : > { %s6607_s20 = scalar_lea.hbm %s7723_s10, 4096 }
  0x7c   : > { %p6608_p1 = scmp.ne.s32.totalorder %s7723_s10, %s6607_s20  ;;  %p6614_p12 = scmp.lt.u32.totalorder %s6607_s20, %s7723_s10 }
  0x7e   : > { %p6610_p3 = pnand %p6608_p1, %p7031_p8 }
  0x80   : > { %p6611_p11 = pneg %p6610_p3 }
  0x82   : > { %p6616_p13 = pnand %p6614_p12, %p6611_p11 }
  0x84   : > { %6619 = shalt.err (!%p6616_p13)
}
  0x85   : > { %s6620_s30 = scalar_lea.vmem %s431_s29, 4096  ;;  %p6628_p7 = scmp.lt.s32.totalorder %s431_s29, %s431_s29 }
  0x86   : > { %p6621_p0 = scmp.ne.s32.totalorder %s431_s29, %s6620_s30  ;;  %p6629_p9 = scmp.lt.s32.totalorder %s6620_s30, %s6620_s30 }
  0x88   : > { %p6623_p2 = pnand %p6621_p0, %p7031_p8  ;;  %p6630_p4 = por %p6629_p9, %p6628_p7 }
  0x8a   : > { %p6624_p5 = pneg %p6623_p2 }
  0x8c   : > { %p6631_p10 = pnand %p6630_p4, %p6624_p5 }
  0x8e   : > { %6634 = shalt.err (!%p6631_p10)
}
  0x8f   : > { %s7751_s19 = smov 64   ;;  %s6902_s28 = smov [#allocation7]  }
  0x90   : > { %5734 = dma.hbm_to_vmem [thread:$0]  (!%p7015_p6), %s7723_s10, 4096, %s431_s29, [#allocation18], %s7751_s19, %s7751_s19, %s7736_s0  }
  0x91   : > { %s347_s6 = sshll.u32 %s6902_s28, 4  ;;  %s6903_s17 = smov [#allocation10]   ;;  %s348_s6 = int_to_ptr.vmem [resolvable:$true] %s347_s6 }
  0x92   : > { %s370_s20 = sshll.u32 %s6903_s17, 4  ;;  %s7752_s2 = sld [smem:[#allocation31_spill]]  ;;  %s371_s20 = int_to_ptr.vmem [resolvable:$true] %s370_s20 }
  0x98   : > { %s6635_s26 = scalar_lea.hbm %s7752_s2, 64 }
  0x99   : > { %p6636_p1 = scmp.ne.s32.totalorder %s7752_s2, %s6635_s26  ;;  %p6642_p12 = scmp.lt.u32.totalorder %s6635_s26, %s7752_s2 }
  0x9b   : > { %p6638_p3 = pnand %p6636_p1, %p7031_p8 }
  0x9d   : > { %p6639_p11 = pneg %p6638_p3 }
  0x9f   : > { %p6644_p13 = pnand %p6642_p12, %p6639_p11 }
  0xa1   : > { %6647 = shalt.err (!%p6644_p13)
}
  0xa2   : > { %s6648_s29 = scalar_lea.vmem %s348_s6, 64  ;;  %p6656_p7 = scmp.lt.s32.totalorder %s348_s6, %s348_s6 }
  0xa3   : > { %p6649_p0 = scmp.ne.s32.totalorder %s348_s6, %s6648_s29  ;;  %p6657_p9 = scmp.lt.s32.totalorder %s6648_s29, %s6648_s29 }
  0xa5   : > { %p6651_p2 = pnand %p6649_p0, %p7031_p8  ;;  %p6658_p4 = por %p6657_p9, %p6656_p7 }
  0xa7   : > { %p6652_p5 = pneg %p6651_p2 }
  0xa9   : > { %p6659_p10 = pnand %p6658_p4, %p6652_p5 }
  0xab   : > { %6662 = shalt.err (!%p6659_p10)
}
  0xac   : > { %5713 = dma.hbm_to_vmem [thread:$0]  (!%p7015_p6), %s7752_s2, 64, %s348_s6, [#allocation6]  }
  0xad   : > { %s7753_s4 = sld [smem:[#allocation33_spill]] }
  0xb3   : > { %s6663_s14 = scalar_lea.hbm %s7753_s4, 49152 }
  0xb4   : > { %p6664_p1 = scmp.ne.s32.totalorder %s7753_s4, %s6663_s14  ;;  %p6670_p12 = scmp.lt.u32.totalorder %s6663_s14, %s7753_s4 }
  0xb6   : > { %p6666_p3 = pnand %p6664_p1, %p7031_p8 }
  0xb8   : > { %p6667_p11 = pneg %p6666_p3 }
  0xba   : > { %p6672_p13 = pnand %p6670_p12, %p6667_p11 }
  0xbc   : > { %6675 = shalt.err (!%p6672_p13)
}
  0xbd   : > { %s6676_s15 = scalar_lea.vmem %s371_s20, 49152  ;;  %p6684_p7 = scmp.lt.s32.totalorder %s371_s20, %s371_s20 }
  0xbe   : > { %p6677_p0 = scmp.ne.s32.totalorder %s371_s20, %s6676_s15  ;;  %p6685_p9 = scmp.lt.s32.totalorder %s6676_s15, %s6676_s15 }
  0xc0   : > { %p6679_p2 = pnand %p6677_p0, %p7031_p8  ;;  %p6686_p4 = por %p6685_p9, %p6684_p7 }
  0xc2   : > { %p6680_p5 = pneg %p6679_p2 }
  0xc4   : > { %p6687_p10 = pnand %p6686_p4, %p6680_p5 }
  0xc6   : > { %6690 = shalt.err (!%p6687_p10)
}
  0xc7   : > { %s7754_s6 = smov 16   ;;  %s7755_s29 = smov 256  }
  0xc8   : > { %5719 = dma.hbm_to_vmem [thread:$0]  (!%p7015_p6), %s7753_s4, 49152, %s371_s20, [#allocation9], %s7755_s29, %s7755_s29, %s7754_s6  }
  0xc9   : > { %s6904_s1 = smov [#allocation13]   ;;  %s6905_s14 = smov [#allocation16]  }
  0xca   : > { %s398_s17 = sshll.u32 %s6904_s1, 4  ;;  %s420_s16 = sshll.u32 %s6905_s14, 4  ;;  %s399_s17 = int_to_ptr.vmem [resolvable:$true] %s398_s17  ;;  %s421_s16 = int_to_ptr.vmem [resolvable:$true] %s420_s16 }
  0xcb   : > { %s6691_s30 = scalar_lea.hbm %s7720_s7, 16 }
  0xcc   : > { %p6692_p1 = scmp.ne.s32.totalorder %s7720_s7, %s6691_s30  ;;  %p6698_p12 = scmp.lt.u32.totalorder %s6691_s30, %s7720_s7 }
  0xce   : > { %p6694_p3 = pnand %p6692_p1, %p7031_p8 }
  0xd0   : > { %p6695_p11 = pneg %p6694_p3 }
  0xd2   : > { %p6700_p13 = pnand %p6698_p12, %p6695_p11 }
  0xd4   : > { %6703 = shalt.err (!%p6700_p13)
}
  0xd5   : > { %s6704_s20 = scalar_lea.vmem %s399_s17, 16  ;;  %s6711_s6 = scalar_lea.vmem %s399_s17, 32 }
  0xd6   : > { %p6705_p0 = scmp.ne.s32.totalorder %s399_s17, %s6704_s20  ;;  %p6712_p7 = scmp.lt.s32.totalorder %s399_s17, %s399_s17 }
  0xd7   : > { %p6713_p9 = scmp.lt.s32.totalorder %s6711_s6, %s6704_s20 }
  0xd8   : > { %p6707_p2 = pnand %p6705_p0, %p7031_p8 }
  0xd9   : > { %p6714_p4 = por %p6713_p9, %p6712_p7 }
  0xda   : > { %p6708_p5 = pneg %p6707_p2 }
  0xdc   : > { %p6715_p10 = pnand %p6714_p4, %p6708_p5 }
  0xde   : > { %6718 = shalt.err (!%p6715_p10)
}
  0xdf   : > { %5725 = dma.hbm_to_vmem [thread:$0]  (!%p7015_p6), %s7720_s7, 16, %s399_s17, [#allocation12]  }
  0xe0   : > { %s6719_s1 = scalar_lea.hbm %s7722_s9, 64 }
  0xe1   : > { %p6720_p1 = scmp.ne.s32.totalorder %s7722_s9, %s6719_s1  ;;  %p6726_p12 = scmp.lt.u32.totalorder %s6719_s1, %s7722_s9 }
  0xe3   : > { %p6722_p3 = pnand %p6720_p1, %p7031_p8 }
  0xe5   : > { %p6723_p11 = pneg %p6722_p3 }
  0xe7   : > { %p6728_p13 = pnand %p6726_p12, %p6723_p11 }
  0xe9   : > { %6731 = shalt.err (!%p6728_p13)
}
  0xea   : > { %s6732_s15 = scalar_lea.vmem %s421_s16, 64  ;;  %p6740_p7 = scmp.lt.s32.totalorder %s421_s16, %s421_s16 }
  0xeb   : > { %p6733_p0 = scmp.ne.s32.totalorder %s421_s16, %s6732_s15  ;;  %p6741_p9 = scmp.lt.s32.totalorder %s6732_s15, %s6732_s15 }
  0xed   : > { %p6735_p2 = pnand %p6733_p0, %p7031_p8  ;;  %p6742_p4 = por %p6741_p9, %p6740_p7 }
  0xef   : > { %p6736_p5 = pneg %p6735_p2 }
  0xf1   : > { %p6743_p10 = pnand %p6742_p4, %p6736_p5 }
  0xf3   : > { %6746 = shalt.err (!%p6743_p10)
}
  0xf4   : > { %5731 = dma.hbm_to_vmem [thread:$0]  (!%p7015_p6), %s7722_s9, 64, %s421_s16, [#allocation15]  }
  0xf5   : > { %s6906_s20 = smov [#allocation19]   ;;  %s6747_s2 = scalar_lea.hbm %s7724_s11, 16 }
  0xf6   : > { %s444_s6 = sshll.u32 %s6906_s20, 4  ;;  %p6748_p1 = scmp.ne.s32.totalorder %s7724_s11, %s6747_s2  ;;  %s445_s6 = int_to_ptr.vmem [resolvable:$true] %s444_s6 }
  0xf7   : > { %p6754_p12 = scmp.lt.u32.totalorder %s6747_s2, %s7724_s11 }
  0xf8   : > { %p6750_p3 = pnand %p6748_p1, %p7031_p8 }
  0xfa   : > { %p6751_p11 = pneg %p6750_p3 }
  0xfc   : > { %p6756_p13 = pnand %p6754_p12, %p6751_p11 }
  0xfe   : > { %6759 = shalt.err (!%p6756_p13)
}
  0xff   : > { %s6760_s16 = scalar_lea.vmem %s445_s6, 16  ;;  %s6767_s12 = scalar_lea.vmem %s445_s6, 32 }
 0x100   : > { %p6761_p0 = scmp.ne.s32.totalorder %s445_s6, %s6760_s16  ;;  %p6768_p7 = scmp.lt.s32.totalorder %s445_s6, %s445_s6 }
 0x101   : > { %p6769_p9 = scmp.lt.s32.totalorder %s6767_s12, %s6760_s16 }
 0x102   : > { %p6763_p2 = pnand %p6761_p0, %p7031_p8 }
 0x103   : > { %p6770_p4 = por %p6769_p9, %p6768_p7 }
 0x104   : > { %p6764_p5 = pneg %p6763_p2 }
 0x106   : > { %p6771_p10 = pnand %p6770_p4, %p6764_p5 }
 0x108   : > { %6774 = shalt.err (!%p6771_p10)
}
 0x109   : > { %5737 = dma.hbm_to_vmem [thread:$0]  (!%p7015_p6), %s7724_s11, 16, %s445_s6, [#allocation18]  }
 0x10a   : > { %s4947_s25 = sadd.s32 4294967294, %s6891_s24   ;;  %s7234_s13 = sadd.s32 1, %s6891_s24  }
 0x10b   : > { %s37_s17 = ssub.s32 %s6891_s24, %s7234_s13  ;;  %s40_s18 = sadd.s32 1, %s6887_s23 }
 0x10c   : > { %p38_p8 = scmp.eq.s32.totalorder %s37_s17, 0  ;;  %p47_p1 = scmp.ne.s32.totalorder %s6887_s23, %s6883_s22 }
 0x10d   : > { %p48_p3 = scmp.eq.s32.totalorder %s6891_s24, 0  ;;  %p53_p11 = scmp.ne.s32.totalorder %s6883_s22, %s6879_s21 }
 0x10e   : > { %s7245_s20 = scalar_select %p38_p8, %s6887_s23, %s40_s18  }
 0x10f   : > { %p7247_p12 = por %p48_p3, %p47_p1  ;;  %p7757_p13 = scmp.eq.s32.totalorder %s6999_s27, 0 }
 0x110   : > { %p308_p0 = scmp.eq.s32.totalorder %s6999_s27, 1  ;;  %p314_p2 = scmp.eq.s32.totalorder %s4947_s25, 1 }
 0x111   : > { %p7253_p6 = por %p7757_p13, %p53_p11  ;;  %p5756_p5 = scmp.lt.s32.totalorder %s6891_s24, 2 }
 0x112   : > { %s455_s29 = sand.u32 1, %s6887_s23   ;;  %p7260_p7 = por %p308_p0, %p47_p1 }
 0x113   : > { %p7264_p9 = por %p314_p2, %p53_p11  ;;  %s4960_s1 = sshll.u32 %s455_s29, 3 }
 0x114   : > { %s7759_s2 = scalar_select %p7260_p7, 1, 0 }
 0x115   : > { %s7760_s28 = scalar_select %p7264_p9, 1, 0 }
 0x116   : > { %s5443_s14 = sshll.u32 %s6891_s24, 7  ;;  %s7761_s12 = sld [smem:[#allocation29_spill]] }
 0x117   : > { %s459_s15 = scalar_lea.vmem [#allocation2], %s4960_s1  ;;  %p7278_p4 = pnand %p5756_p5, %p7247_p12 }
 0x118   : > { %s466_s25 = sshll.u32 %s459_s15, 4  ;;  %s7282_s18 = scalar_lea.sflag [#allocation3], %s455_s29  ;;  %s7274_s25 = int_to_ptr.vmem [resolvable:$true] %s466_s25 }
 0x119   : > { %p6777_p8 = pneg %p7278_p4 }
 0x11c   : > { %s7272_s30 = scalar_lea.hbm %s7761_s12, %s5443_s14  ;;  %s6780_s0 = scalar_lea.hbm %s7761_s12, 256 }
 0x11d   : > { %s6775_s26 = scalar_lea.hbm %s7272_s30, 128  ;;  %p6781_p11 = scmp.lt.u32.totalorder %s7272_s30, %s7761_s12 }
 0x11e   : > { %p6776_p10 = scmp.ne.s32.totalorder %s7272_s30, %s6775_s26  ;;  %p6782_p12 = scmp.lt.u32.totalorder %s6780_s0, %s6775_s26 }
 0x11f   : > { %p6784_p0 = scmp.lt.u32.totalorder %s6775_s26, %s7272_s30 }
 0x120   : > { %p6778_p1 = pnand %p6777_p8, %p6776_p10  ;;  %p6783_p13 = por %p6782_p12, %p6781_p11 }
 0x122   : > { %p6779_p3 = pneg %p6778_p1  ;;  %p6785_p2 = por %p6784_p0, %p6783_p13 }
 0x124   : > { %p6786_p5 = pnand %p6785_p2, %p6779_p3 }
 0x126   : > { %6789 = shalt.err (!%p6786_p5)
}
 0x127   : > { %s6790_s29 = scalar_lea.vmem %s7274_s25, 128  ;;  %s6907_s1 = smov [#allocation2]  }
 0x128   : > { %p6791_p10 = scmp.ne.s32.totalorder %s7274_s25, %s6790_s29  ;;  %s6795_s14 = sshll.u32 %s6907_s1, 4  ;;  %s6796_s14 = int_to_ptr.vmem [resolvable:$false] %s6795_s14 }
 0x129   : > { %s6797_s16 = scalar_lea.vmem %s6796_s14, 256  ;;  %p6798_p7 = scmp.lt.s32.totalorder %s7274_s25, %s6796_s14 }
 0x12a   : > { %p6793_p1 = pnand %p6791_p10, %p6777_p8  ;;  %p6799_p11 = scmp.lt.s32.totalorder %s6797_s16, %s6790_s29 }
 0x12c   : > { %p6794_p9 = pneg %p6793_p1  ;;  %p6800_p12 = por %p6799_p11, %p6798_p7 }
 0x12e   : > { %p6801_p13 = pnand %p6800_p12, %p6794_p9 }
 0x130   : > { %6804 = shalt.err (!%p6801_p13)
}
 0x131   : > { %s7763_s26 = smov 4   ;;  %s7764_s0 = sld [smem:[#allocation28_spill]] }
 0x132   : > { %5741 = dma.hbm_to_vmem [thread:$0]  (!%p7278_p4), %s7272_s30, 128, %s7274_s25, %s7282_s18, %s7751_s19, %s7751_s19, %s7763_s26  }
 0x137   : > { %p7765_p8 = scmp.ne.s32.totalorder %s7764_s0, 0 }
 0x138   : > { %s7316_s15 = sand.u32 (!%p7765_p8), 1, %s6883_s22  }
 0x139   : > { %478 = sbr.rel (%p7765_p8) target bundleno = 2238 (0x8be), region = 68  ;;  %s4964_s29 = sshll.u32 (!%p7765_p8), %s7316_s15, 3 }
 0x13a   : > { %s481_s1 = scalar_lea.sflag (!%p7765_p8), [#allocation3], %s7316_s15  ;;  %s7320_s14 = scalar_lea.vmem (!%p7765_p8), [#allocation2], %s4964_s29 }
 0x140   : > { %6850 = dma.done.wait (%p7253_p6), %s481_s1, 128  }
 0x141   : > { %6852 = vsyncadd (%p7253_p6), %s481_s1, 4294967168  ;;  %p7766_p7 = scmp.eq.s32.totalorder %s6999_s27, 0 }
 0x143   : > { %6854 = dma.done.wait (%p7766_p7), [#allocation6], 4160   ;;  %p7767_p9 = pmov %p7766_p7 }
 0x144   : > { %p7768_p4 = pmov %p7766_p7 }
 0x145   : > { %6856 = vsyncadd (%p7767_p9), [#allocation6], 4294963136 }
 0x146   : > { %6858 = dma.done.wait (%p7768_p4), [#allocation9], 49408   ;;  %p7769_p3 = pmov %p7768_p4 }
 0x148   : > { %6860 = vsyncadd (%p7769_p3), [#allocation9], 4294917888  ;;  %p7770_p0 = pmov %p7769_p3 }
 0x14a   : > { %6862 = dma.done.wait (%p7770_p0), [#allocation12], 80   ;;  %p7771_p2 = pmov %p7770_p0 }
 0x14b   : > { %p7772_p6 = pmov %p7770_p0 }
 0x14c   : > { %6864 = vsyncadd (%p7771_p2), [#allocation12], 4294967216 }
 0x14d   : > { %6866 = dma.done.wait (%p7772_p6), [#allocation15], 576   ;;  %p7773_p5 = pmov %p7770_p0 }
 0x14e   : > { %p7774_p10 = pmov %p7770_p0 }
 0x14f   : > { %6868 = vsyncadd (%p7773_p5), [#allocation15], 4294966720 }
 0x150   : > { %6870 = dma.done.wait (%p7774_p10), [#allocation18], 4112   ;;  %p7775_p1 = pmov %p7770_p0 }
 0x151   : > { %v6908_v0 = vmov 0   ;;  %v5818_v1 = vld [vmem:[#allocation5 + $0x4] ss:$16 sps:$4 sm:$0xff]   ;;  %v5820_v2 = vld [vmem:[#allocation5] ss:$16 sps:$4 sm:$0xff]   ;;  %v602_v34 = vlaneseq  ;;  %vm1022_vm0 = vcmask 130048  }
 0x152   : > { %6872 = vsyncadd (%p7775_p1), [#allocation18], 4294963184  ;;  %820 = vmatprep.mubr.bf16.mxu0 %v6908_v0  ;;  %863 = vmatprep.mubr.bf16.mxu1 %v6908_v0  ;;  %v5821_v3 = vld [vmem:[#allocation5 + $0x24] ss:$16 sps:$4 sm:$0xff]   ;;  %v5823_v4 = vld [vmem:[#allocation5 + $0x20] ss:$16 sps:$4 sm:$0xff]  }
 0x153   : > { %788 = vmatprep.subr.bf16.mxu0 %v5818_v1  ;;  %v5824_v5 = vld [vmem:[#allocation5 + $0x44] ss:$16 sps:$4 sm:$0xff]   ;;  %v5826_v6 = vld [vmem:[#allocation5 + $0x40] ss:$16 sps:$4 sm:$0xff]   ;;  %v5843_v10 = vld [vmem:[#allocation5 + $0xc] ss:$16 sps:$4 sm:$0xff]  }
 0x154   : > { %789 = vmatpush1.bf16.msra.mxu0 %v5820_v2  ;;  %v5827_v7 = vld [vmem:[#allocation5 + $0x64] ss:$16 sps:$4 sm:$0xff]   ;;  %v5829_v8 = vld [vmem:[#allocation5 + $0x60] ss:$16 sps:$4 sm:$0xff]   ;;  %v5845_v11 = vld [vmem:[#allocation5 + $0x8] ss:$16 sps:$4 sm:$0xff]   ;;  %831 = vmatprep.subr.bf16.mxu1 %v5843_v10 }
 0x155   : > { %790 = vmatprep.subr.bf16.mxu0 %v5821_v3  ;;  %v5830_v9 = vld [vmem:[#allocation5 + $0x84] ss:$16 sps:$4 sm:$0xff]   ;;  %v5846_v12 = vld [vmem:[#allocation5 + $0x2c] ss:$16 sps:$4 sm:$0xff]   ;;  %v5832_v13 = vld [vmem:[#allocation5 + $0x80] ss:$16 sps:$4 sm:$0xff]   ;;  %832 = vmatpush1.bf16.msra.mxu1 %v5845_v11 }
 0x156   : > { %v5848_v14 = vld [vmem:[#allocation5 + $0x28] ss:$16 sps:$4 sm:$0xff]   ;;  %833 = vmatprep.subr.bf16.mxu1 %v5846_v12  ;;  %v5849_v15 = vld [vmem:[#allocation5 + $0x4c] ss:$16 sps:$4 sm:$0xff]   ;;  %v5833_v16 = vld [vmem:[#allocation5 + $0xa4] ss:$16 sps:$4 sm:$0xff]  }
 0x157   : > { %v5835_v17 = vld [vmem:[#allocation5 + $0xa0] ss:$16 sps:$4 sm:$0xff]   ;;  %v5851_v18 = vld [vmem:[#allocation5 + $0x48] ss:$16 sps:$4 sm:$0xff]   ;;  %v5852_v19 = vld [vmem:[#allocation5 + $0x6c] ss:$16 sps:$4 sm:$0xff]  }
 0x158   : > { %791 = vmatpush1.bf16.msra.mxu0 %v5823_v4  ;;  %v5836_v20 = vld [vmem:[#allocation5 + $0xc4] ss:$16 sps:$4 sm:$0xff]   ;;  %v5838_v21 = vld [vmem:[#allocation5 + $0xc0] ss:$16 sps:$4 sm:$0xff]   ;;  %v5854_v22 = vld [vmem:[#allocation5 + $0x68] ss:$16 sps:$4 sm:$0xff]  }
 0x159   : > { %792 = vmatprep.subr.bf16.mxu0 %v5824_v5  ;;  %834 = vmatpush1.bf16.msra.mxu1 %v5848_v14  ;;  %v5855_v23 = vld [vmem:[#allocation5 + $0x8c] ss:$16 sps:$4 sm:$0xff]   ;;  %v5839_v24 = vld [vmem:[#allocation5 + $0xe4] ss:$16 sps:$4 sm:$0xff]   ;;  %v5857_v25 = vld [vmem:[#allocation5 + $0x88] ss:$16 sps:$4 sm:$0xff]  }
 0x15a   : > { %835 = vmatprep.subr.bf16.mxu1 %v5849_v15  ;;  %v5841_v26 = vld [vmem:[#allocation5 + $0xe0] ss:$16 sps:$4 sm:$0xff]   ;;  %v5858_v28 = vld [vmem:[#allocation5 + $0xac] ss:$16 sps:$4 sm:$0xff]   ;;  %v5860_v29 = vld [vmem:[#allocation5 + $0xa8] ss:$16 sps:$4 sm:$0xff]  }
 0x15b   : > { %v566_v27 = vld [vmem:[%s7320_s14] sm:$0xff]   ;;  %v603_v35 = vshrl.u32 %v602_v34, 7  ;;  %v600_v37 = vld [vmem:[#allocation7] sm:$0xf]  ;;  %v5867_v60 = vld [vmem:[#allocation8] sm:$0xff]   ;;  %s7776_s30 = sld [smem:[#allocation34_spill]] }
 0x15c   : > { %793 = vmatpush1.bf16.msra.mxu0 %v5826_v6  ;;  %v5861_v30 = vld [vmem:[#allocation5 + $0xcc] ss:$16 sps:$4 sm:$0xff]   ;;  %v5863_v31 = vld [vmem:[#allocation5 + $0xc8] ss:$16 sps:$4 sm:$0xff]   ;;  %v5868_v62 = vld [vmem:[#allocation10] ss:$16 sps:$4 sm:$0xff]  }
 0x15d   : > { %794 = vmatprep.subr.bf16.mxu0 %v5827_v7  ;;  %836 = vmatpush1.bf16.msra.mxu1 %v5851_v18  ;;  %v5864_v32 = vld [vmem:[#allocation5 + $0xec] ss:$16 sps:$4 sm:$0xff]   ;;  %v5866_v33 = vld [vmem:[#allocation5 + $0xe8] ss:$16 sps:$4 sm:$0xff]   ;;  %v7351_v36 = vsub.s32 0, %v603_v35  ;;  %v7353_v38 = vsub.s32 1, %v603_v35 }
 0x15e   : > { %837 = vmatprep.subr.bf16.mxu1 %v5852_v19  ;;  %v7357_v49 = vsub.s32 2, %v603_v35  ;;  %v7359_v52 = vsub.s32 3, %v603_v35  ;;  %v5870_v58 = vld [vmem:[#allocation10 + $0x4] ss:$16 sps:$4 sm:$0xff]   ;;  %v5874_v10 = vld [vmem:[#allocation10 + $0x20] ss:$16 sps:$4 sm:$0xff]  }
 0x15f   : > { %v605_v39 = vrot.slane %v600_v37, %v7351_v36  ;;  %v609_v40 = vrot.slane %v600_v37, %v7353_v38  ;;  %v5876_v2 = vld [vmem:[#allocation10 + $0x24] ss:$16 sps:$4 sm:$0xff]   ;;  %v5871_v19 = vld [vmem:[#allocation10 + $0x8] ss:$16 sps:$4 sm:$0xff]   ;;  %vm4216_vm1 = vcmask 64512   ;;  %s4975_s29 = sshll.u32 %s7316_s15, 4 }
 0x160   : > { %795 = vmatpush1.bf16.msra.mxu0 %v5829_v8  ;;  %v613_v57 = vrot.slane %v600_v37, %v7357_v49  ;;  %v617_v59 = vrot.slane %v600_v37, %v7359_v52  ;;  %v5882_v12 = vld [vmem:[#allocation10 + $0x44] ss:$16 sps:$4 sm:$0xff]   ;;  %v5895_v35 = vld [vmem:[#allocation10 + $0x88] ss:$16 sps:$4 sm:$0xff]   ;;  %v5903_v37 = vld [vmem:[#allocation10 + $0xac] ss:$16 sps:$4 sm:$0xff]  }
 0x161   : > { %796 = vmatprep.subr.bf16.mxu0 %v5830_v9  ;;  %838 = vmatpush1.bf16.msra.mxu1 %v5854_v22  ;;  %v5888_v18 = vld [vmem:[#allocation10 + $0x64] ss:$16 sps:$4 sm:$0xff]   ;;  %s564_s1 = scalar_lea.vmem [#allocation20], %s4975_s29  ;;  %s5444_s6 = sshll.u32 %s6999_s27, 8 }
 0x162   : > { %839 = vmatprep.subr.bf16.mxu1 %v5855_v23  ;;  %v5894_v22 = vld [vmem:[#allocation10 + $0x84] ss:$16 sps:$4 sm:$0xff]   ;;  %v5877_v23 = vld [vmem:[#allocation10 + $0x28] ss:$16 sps:$4 sm:$0xff]   ;;  %s4779_s19 = sshll.u32 %s564_s1, 4  ;;  %s7777_s17 = sld [smem:[#allocation35_spill]]  ;;  %s7664_s19 = int_to_ptr.vmem [resolvable:$true] %s4779_s19 }
 0x163   : > { %v5912_v34 = vld [vmem:[#allocation10 + $0xe4] ss:$16 sps:$4 sm:$0xff]   ;;  %s4766_s16 = scalar_lea.sflag [#allocation4], %s7316_s15  ;;  %s6805_s26 = scalar_lea.vmem %s7664_s19, 256 }
 0x164   : > { %797 = vmatpush1.bf16.msra.mxu0 %v5832_v13  ;;  %p6806_p11 = scmp.ne.s32.totalorder %s7664_s19, %s6805_s26  ;;  %p7778_p12 = scmp.ne.s32.totalorder %s7759_s2, 0 }
 0x165   : > { %798 = vmatprep.subr.bf16.mxu0 %v5833_v16  ;;  %840 = vmatpush1.bf16.msra.mxu1 %v5857_v25  ;;  %v5873_v16 = vld [vmem:[#allocation10 + $0xc] ss:$16 sps:$4 sm:$0xff]   ;;  %v5892_v25 = vld [vmem:[#allocation10 + $0x80] ss:$16 sps:$4 sm:$0xff]   ;;  %s6910_s27 = smov [#allocation20]  }
 0x166   : > { %841 = vmatprep.subr.bf16.mxu1 %v5858_v28  ;;  %v5891_v28 = vld [vmem:[#allocation10 + $0x6c] ss:$16 sps:$4 sm:$0xff]   ;;  %p6807_p13 = pnand %p6806_p11, %p7778_p12  ;;  %s6809_s0 = sshll.u32 %s6910_s27, 4  ;;  %s6810_s0 = int_to_ptr.vmem [resolvable:$false] %s6809_s0 }
 0x167   : > { %s6811_s3 = scalar_lea.vmem %s6810_s0, 512  ;;  %p6812_p7 = scmp.lt.s32.totalorder %s7664_s19, %s6810_s0 }
 0x168   : > { %799 = vmatpush1.bf16.msra.mxu0 %v5835_v17  ;;  %v5880_v17 = vld [vmem:[#allocation10 + $0x40] ss:$16 sps:$4 sm:$0xff]   ;;  %s7669_s18 = scalar_lea.hbm %s7777_s17, %s5444_s6  ;;  %p6808_p8 = pneg %p6807_p13 }
 0x169   : > { %800 = vmatprep.subr.bf16.mxu0 %v5836_v20  ;;  %842 = vmatpush1.bf16.msra.mxu1 %v5860_v29  ;;  %v5879_v20 = vld [vmem:[#allocation10 + $0x2c] ss:$16 sps:$4 sm:$0xff]   ;;  %v5898_v29 = vld [vmem:[#allocation10 + $0xa0] ss:$16 sps:$4 sm:$0xff]   ;;  %p6813_p9 = scmp.lt.s32.totalorder %s6811_s3, %s6805_s26 }
 0x16a   : > { %843 = vmatprep.subr.bf16.mxu1 %v5861_v30  ;;  %v5906_v30 = vld [vmem:[#allocation10 + $0xc4] ss:$16 sps:$4 sm:$0xff]  }
 0x16b   : > { %p6814_p4 = por %p6813_p9, %p6812_p7 }
 0x16c   : > { %801 = vmatpush1.bf16.msra.mxu0 %v5838_v21  ;;  %v5886_v21 = vld [vmem:[#allocation10 + $0x60] ss:$16 sps:$4 sm:$0xff]  }
 0x16d   : > { %802 = vmatprep.subr.bf16.mxu0 %v5839_v24  ;;  %844 = vmatpush1.bf16.msra.mxu1 %v5863_v31  ;;  %v5885_v24 = vld [vmem:[#allocation10 + $0x4c] ss:$16 sps:$4 sm:$0xff]   ;;  %v5889_v31 = vld [vmem:[#allocation10 + $0x68] ss:$16 sps:$4 sm:$0xff]   ;;  %p6815_p3 = pnand %p6814_p4, %p6808_p8 }
 0x16e   : > { %845 = vmatprep.subr.bf16.mxu1 %v5864_v32  ;;  %v5897_v32 = vld [vmem:[#allocation10 + $0x8c] ss:$16 sps:$4 sm:$0xff]  }
 0x170   : > { %803 = vmatpush1.bf16.msra.mxu0 %v5841_v26  ;;  %v5900_v26 = vld [vmem:[#allocation10 + $0xa4] ss:$16 sps:$4 sm:$0xff]  }
 0x171   : > { %846 = vmatpush1.bf16.msra.mxu1 %v5866_v33  ;;  %v5904_v33 = vld [vmem:[#allocation10 + $0xc0] ss:$16 sps:$4 sm:$0xff]  }
 0x173   : > { %821 = vmatmul.mubr.bf16.vlgmr.msra.gmra.mrb[0].mxu0 %v566_v27 }
 0x174   : > { %1058 = vmatprep.mubr.bf16.mxu0 %v6908_v0  ;;  %864 = vmatmul.mubr.bf16.vlgmr.msra.gmra.mrb[0].mxu1 %v566_v27  ;;  %v5883_v27 = vld [vmem:[#allocation10 + $0x48] ss:$16 sps:$4 sm:$0xff]  }
 0x175   : > { %1101 = vmatprep.mubr.bf16.mxu1 %v6908_v0 }
 0x246   : > { %v822_v41 = vpop.f32.mrb[0].mxu0 }
 0x247   : > { %v823_v42 = vadd.f32 %v822_v41, %v605_v39  ;;  %v824_v43 = vpop.f32.mrb[1].mxu0  ;;  %v865_v61 = vpop.f32.mrb[0].mxu1  ;;  %v5901_v41 = vld [vmem:[#allocation10 + $0xa8] ss:$16 sps:$4 sm:$0xff]  }
 0x248   : > { %v825_v44 = vadd.f32 %v824_v43, %v609_v40  ;;  %v826_v45 = vpop.f32.mrb[2].mxu0  ;;  %v866_v63 = vadd.f32 %v865_v61, %v613_v57  ;;  %v867_v1 = vpop.f32.mrb[1].mxu1  ;;  %v5916_v43 = vld [vmem:[#allocation10 + $0x100] ss:$16 sps:$4 sm:$0xff]   ;;  %v5925_v61 = vld [vmem:[#allocation10 + $0x128] ss:$16 sps:$4 sm:$0xff]  }
 0x249   : > { %v827_v46 = vadd.f32 %v826_v45, %v605_v39  ;;  %v828_v47 = vpop.f32.mrb[3].mxu0  ;;  %v874_v50 = vmax.f32 %v823_v42, 0.0  ;;  %v868_v3 = vadd.f32 %v867_v1, %v617_v59  ;;  %v869_v4 = vpop.f32.mrb[2].mxu1  ;;  %v5910_v39 = vld [vmem:[#allocation10 + $0xe0] ss:$16 sps:$4 sm:$0xff]  }
 0x24a   : > { %v829_v48 = vadd.f32 %v828_v47, %v609_v40  ;;  %v875_v53 = vmax.f32 %v825_v44, 0.0  ;;  %v876_v5 = vmax.f32 %v866_v63, 0.0  ;;  %v870_v6 = vadd.f32 %v869_v4, %v613_v57  ;;  %v871_v7 = vpop.f32.mrb[3].mxu1  ;;  %v5918_v40 = vld [vmem:[#allocation10 + $0x104] ss:$16 sps:$4 sm:$0xff]  }
 0x24b   : > { %v878_v51 = vmax.f32 %v827_v46, 0.0  ;;  %v877_v8 = vmax.f32 %v868_v3, 0.0  ;;  %v872_v9 = vadd.f32 %v871_v7, %v617_v59  ;;  %v5909_v42 = vld [vmem:[#allocation10 + $0xcc] ss:$16 sps:$4 sm:$0xff]   ;;  %v5924_v44 = vld [vmem:[#allocation10 + $0x124] ss:$16 sps:$4 sm:$0xff]  }
 0x24c   : > { %v879_v54 = vmax.f32 %v829_v48, 0.0  ;;  %v880_v11 = vmax.f32 %v870_v6, 0.0  ;;  %v5907_v45 = vld [vmem:[#allocation10 + $0xc8] ss:$16 sps:$4 sm:$0xff]   ;;  %v5915_v46 = vld [vmem:[#allocation10 + $0xec] ss:$16 sps:$4 sm:$0xff]  }
 0x24d   : > { %v7361_v55 = vpack.c.bf16 %v878_v51, %v874_v50  ;;  %v881_v13 = vmax.f32 %v872_v9, 0.0  ;;  %v5922_v47 = vld [vmem:[#allocation10 + $0x120] ss:$16 sps:$4 sm:$0xff]   ;;  %v5930_v48 = vld [vmem:[#allocation10 + $0x144] ss:$16 sps:$4 sm:$0xff]  }
 0x24e   : > { %v7363_v56 = vpack.c.bf16 %v879_v54, %v875_v53  ;;  %v7370_v14 = vpack.c.bf16 %v880_v11, %v876_v5  ;;  %v5913_v50 = vld [vmem:[#allocation10 + $0xe8] ss:$16 sps:$4 sm:$0xff]   ;;  %v5921_v51 = vld [vmem:[#allocation10 + $0x10c] ss:$16 sps:$4 sm:$0xff]   ;;  %v5928_v53 = vld [vmem:[#allocation10 + $0x140] ss:$16 sps:$4 sm:$0xff]  }
 0x24f   : > { %v7372_v15 = vpack.c.bf16 %v881_v13, %v877_v8  ;;  %v5936_v54 = vld [vmem:[#allocation10 + $0x164] ss:$16 sps:$4 sm:$0xff]   ;;  %v5919_v57 = vld [vmem:[#allocation10 + $0x108] ss:$16 sps:$4 sm:$0xff]   ;;  %v5934_v59 = vld [vmem:[#allocation10 + $0x160] ss:$16 sps:$4 sm:$0xff]  }
 0x250   : > { %1026 = vmatprep.subr.bf16.mxu0 %v7363_v56  ;;  %v5940_v63 = vld [vmem:[#allocation10 + $0x180] ss:$16 sps:$4 sm:$0xff]   ;;  %v5948_v1 = vld [vmem:[#allocation10 + $0x1a4] ss:$16 sps:$4 sm:$0xff]   ;;  %v5939_v3 = vld [vmem:[#allocation10 + $0x16c] ss:$16 sps:$4 sm:$0xff]  }
 0x251   : > { %1027 = vmatpush1.bf16.msra.mxu0 %v7361_v55  ;;  %1069 = vmatprep.subr.bf16.mxu1 %v7372_v15  ;;  %v5946_v4 = vld [vmem:[#allocation10 + $0x1a0] ss:$16 sps:$4 sm:$0xff]   ;;  %v5954_v5 = vld [vmem:[#allocation10 + $0x1c4] ss:$16 sps:$4 sm:$0xff]   ;;  %v5937_v6 = vld [vmem:[#allocation10 + $0x168] ss:$16 sps:$4 sm:$0xff]  }
 0x252   : > { %1884 = vmatprep.subr.bf16.mxu0 %v5870_v58  ;;  %1070 = vmatpush1.bf16.msra.mxu1 %v7370_v14  ;;  %v5927_v58 = vld [vmem:[#allocation10 + $0x12c] ss:$16 sps:$4 sm:$0xff]   ;;  %v5952_v8 = vld [vmem:[#allocation10 + $0x1c0] ss:$16 sps:$4 sm:$0xff]   ;;  %v5943_v9 = vld [vmem:[#allocation10 + $0x188] ss:$16 sps:$4 sm:$0xff]  }
 0x253   : > { %1970 = vmatprep.subr.bf16.mxu1 %v5873_v16  ;;  %v5945_v7 = vld [vmem:[#allocation10 + $0x18c] ss:$16 sps:$4 sm:$0xff]   ;;  %v5949_v11 = vld [vmem:[#allocation10 + $0x1a8] ss:$16 sps:$4 sm:$0xff]   ;;  %v5960_v16 = vld [vmem:[#allocation10 + $0x1e4] ss:$16 sps:$4 sm:$0xff]  }
 0x254   : > { %5010 = vmatmul.mubr.msk.bf16.vlgmr.msra.gmra.mrb[4].mxu0 %vm1022_vm0, %v5867_v60  ;;  %v5955_v13 = vld [vmem:[#allocation10 + $0x1c8] ss:$16 sps:$4 sm:$0xff]  }
 0x255   : > { %1885 = vmatpush1.bf16.msra.mxu0 %v5868_v62  ;;  %5011 = vmatmul.mubr.msk.bf16.vlgmr.msra.gmra.mrb[4].mxu1 %vm1022_vm0, %v5867_v60  ;;  %v5942_v60 = vld [vmem:[#allocation10 + $0x184] ss:$16 sps:$4 sm:$0xff]   ;;  %v5933_v62 = vld [vmem:[#allocation10 + $0x14c] ss:$16 sps:$4 sm:$0xff]  }
 0x256   : > { %1886 = vmatprep.subr.bf16.mxu0 %v5876_v2  ;;  %1971 = vmatpush1.bf16.msra.mxu1 %v5871_v19  ;;  %v5931_v2 = vld [vmem:[#allocation10 + $0x148] ss:$16 sps:$4 sm:$0xff]  }
 0x257   : > { %1972 = vmatprep.subr.bf16.mxu1 %v5879_v20  ;;  %v5961_v19 = vld [vmem:[#allocation10 + $0x1e8] ss:$16 sps:$4 sm:$0xff]   ;;  %v5966_v20 = vld [vmem:[#allocation10 + $0x204] ss:$16 sps:$4 sm:$0xff]  }
 0x259   : > { %1887 = vmatpush1.bf16.msra.mxu0 %v5874_v10  ;;  %v5951_v10 = vld [vmem:[#allocation10 + $0x1ac] ss:$16 sps:$4 sm:$0xff]  }
 0x25a   : > { %1888 = vmatprep.subr.bf16.mxu0 %v5882_v12  ;;  %1973 = vmatpush1.bf16.msra.mxu1 %v5877_v23  ;;  %v5957_v12 = vld [vmem:[#allocation10 + $0x1cc] ss:$16 sps:$4 sm:$0xff]  }
 0x25b   : > { %1974 = vmatprep.subr.bf16.mxu1 %v5885_v24 }
 0x25d   : > { %1889 = vmatpush1.bf16.msra.mxu0 %v5880_v17  ;;  %v5963_v17 = vld [vmem:[#allocation10 + $0x1ec] ss:$16 sps:$4 sm:$0xff]  }
 0x25e   : > { %1890 = vmatprep.subr.bf16.mxu0 %v5888_v18  ;;  %1975 = vmatpush1.bf16.msra.mxu1 %v5883_v27  ;;  %v5958_v18 = vld [vmem:[#allocation10 + $0x1e0] ss:$16 sps:$4 sm:$0xff]  }
 0x25f   : > { %1976 = vmatprep.subr.bf16.mxu1 %v5891_v28  ;;  %v5964_v28 = vld [vmem:[#allocation10 + $0x200] ss:$16 sps:$4 sm:$0xff]  }
 0x261   : > { %1891 = vmatpush1.bf16.msra.mxu0 %v5886_v21  ;;  %v5969_v21 = vld [vmem:[#allocation10 + $0x20c] ss:$16 sps:$4 sm:$0xff]  }
 0x262   : > { %1892 = vmatprep.subr.bf16.mxu0 %v5894_v22  ;;  %1977 = vmatpush1.bf16.msra.mxu1 %v5889_v31  ;;  %v5975_v31 = vld [vmem:[#allocation10 + $0x22c] ss:$16 sps:$4 sm:$0xff]  }
 0x263   : > { %1978 = vmatprep.subr.bf16.mxu1 %v5897_v32  ;;  %v5970_v32 = vld [vmem:[#allocation10 + $0x220] ss:$16 sps:$4 sm:$0xff]  }
 0x265   : > { %1893 = vmatpush1.bf16.msra.mxu0 %v5892_v25 }
 0x266   : > { %1894 = vmatprep.subr.bf16.mxu0 %v5900_v26  ;;  %1979 = vmatpush1.bf16.msra.mxu1 %v5895_v35  ;;  %v5981_v35 = vld [vmem:[#allocation10 + $0x24c] ss:$16 sps:$4 sm:$0xff]  }
 0x267   : > { %1980 = vmatprep.subr.bf16.mxu1 %v5903_v37 }
 0x269   : > { %1895 = vmatpush1.bf16.msra.mxu0 %v5898_v29  ;;  %v5967_v29 = vld [vmem:[#allocation10 + $0x208] ss:$16 sps:$4 sm:$0xff]  }
 0x26a   : > { %1896 = vmatprep.subr.bf16.mxu0 %v5906_v30  ;;  %1981 = vmatpush1.bf16.msra.mxu1 %v5901_v41  ;;  %v5972_v30 = vld [vmem:[#allocation10 + $0x224] ss:$16 sps:$4 sm:$0xff]  }
 0x26b   : > { %1982 = vmatprep.subr.bf16.mxu1 %v5909_v42  ;;  %v5984_v42 = vld [vmem:[#allocation10 + $0x264] ss:$16 sps:$4 sm:$0xff]  }
 0x26d   : > { %1897 = vmatpush1.bf16.msra.mxu0 %v5904_v33  ;;  %v5973_v33 = vld [vmem:[#allocation10 + $0x228] ss:$16 sps:$4 sm:$0xff]  }
 0x26e   : > { %1898 = vmatprep.subr.bf16.mxu0 %v5912_v34  ;;  %1983 = vmatpush1.bf16.msra.mxu1 %v5907_v45  ;;  %v5978_v34 = vld [vmem:[#allocation10 + $0x244] ss:$16 sps:$4 sm:$0xff]  }
 0x26f   : > { %1984 = vmatprep.subr.bf16.mxu1 %v5915_v46 }
 0x271   : > { %1899 = vmatpush1.bf16.msra.mxu0 %v5910_v39  ;;  %v5976_v39 = vld [vmem:[#allocation10 + $0x240] ss:$16 sps:$4 sm:$0xff]  }
 0x272   : > { %1900 = vmatprep.subr.bf16.mxu0 %v5918_v40  ;;  %1985 = vmatpush1.bf16.msra.mxu1 %v5913_v50  ;;  %v5979_v40 = vld [vmem:[#allocation10 + $0x248] ss:$16 sps:$4 sm:$0xff]  }
 0x273   : > { %1986 = vmatprep.subr.bf16.mxu1 %v5921_v51  ;;  %v5985_v50 = vld [vmem:[#allocation10 + $0x268] ss:$16 sps:$4 sm:$0xff]   ;;  %v5990_v51 = vld [vmem:[#allocation10 + $0x284] ss:$16 sps:$4 sm:$0xff]  }
 0x275   : > { %1901 = vmatpush1.bf16.msra.mxu0 %v5916_v43  ;;  %v5987_v43 = vld [vmem:[#allocation10 + $0x26c] ss:$16 sps:$4 sm:$0xff]  }
 0x276   : > { %1902 = vmatprep.subr.bf16.mxu0 %v5924_v44  ;;  %1987 = vmatpush1.bf16.msra.mxu1 %v5919_v57  ;;  %v5991_v57 = vld [vmem:[#allocation10 + $0x288] ss:$16 sps:$4 sm:$0xff]  }
 0x277   : > { %1988 = vmatprep.subr.bf16.mxu1 %v5927_v58  ;;  %v5996_v58 = vld [vmem:[#allocation10 + $0x2a4] ss:$16 sps:$4 sm:$0xff]  }
 0x279   : > { %1903 = vmatpush1.bf16.msra.mxu0 %v5922_v47 }
 0x27a   : > { %1904 = vmatprep.subr.bf16.mxu0 %v5930_v48  ;;  %1989 = vmatpush1.bf16.msra.mxu1 %v5925_v61  ;;  %v5982_v48 = vld [vmem:[#allocation10 + $0x260] ss:$16 sps:$4 sm:$0xff]   ;;  %v5997_v61 = vld [vmem:[#allocation10 + $0x2a8] ss:$16 sps:$4 sm:$0xff]  }
 0x27b   : > { %1990 = vmatprep.subr.bf16.mxu1 %v5933_v62  ;;  %v6002_v62 = vld [vmem:[#allocation10 + $0x2c4] ss:$16 sps:$4 sm:$0xff]  }
 0x27d   : > { %1905 = vmatpush1.bf16.msra.mxu0 %v5928_v53  ;;  %v5993_v53 = vld [vmem:[#allocation10 + $0x28c] ss:$16 sps:$4 sm:$0xff]  }
 0x27e   : > { %1906 = vmatprep.subr.bf16.mxu0 %v5936_v54  ;;  %1991 = vmatpush1.bf16.msra.mxu1 %v5931_v2  ;;  %v5988_v54 = vld [vmem:[#allocation10 + $0x280] ss:$16 sps:$4 sm:$0xff]   ;;  %v6003_v2 = vld [vmem:[#allocation10 + $0x2c8] ss:$16 sps:$4 sm:$0xff]  }
 0x27f   : > { %1992 = vmatprep.subr.bf16.mxu1 %v5939_v3  ;;  %v6008_v3 = vld [vmem:[#allocation10 + $0x2e4] ss:$16 sps:$4 sm:$0xff]  }
 0x281   : > { %1907 = vmatpush1.bf16.msra.mxu0 %v5934_v59  ;;  %v5999_v59 = vld [vmem:[#allocation10 + $0x2ac] ss:$16 sps:$4 sm:$0xff]  }
 0x282   : > { %1908 = vmatprep.subr.bf16.mxu0 %v5942_v60  ;;  %1993 = vmatpush1.bf16.msra.mxu1 %v5937_v6  ;;  %v5994_v60 = vld [vmem:[#allocation10 + $0x2a0] ss:$16 sps:$4 sm:$0xff]   ;;  %v6009_v6 = vld [vmem:[#allocation10 + $0x2e8] ss:$16 sps:$4 sm:$0xff]  }
 0x283   : > { %1994 = vmatprep.subr.bf16.mxu1 %v5945_v7  ;;  %v6014_v7 = vld [vmem:[#allocation10 + $0x304] ss:$16 sps:$4 sm:$0xff]  }
 0x285   : > { %1909 = vmatpush1.bf16.msra.mxu0 %v5940_v63  ;;  %v6005_v63 = vld [vmem:[#allocation10 + $0x2cc] ss:$16 sps:$4 sm:$0xff]  }
 0x286   : > { %1910 = vmatprep.subr.bf16.mxu0 %v5948_v1  ;;  %1995 = vmatpush1.bf16.msra.mxu1 %v5943_v9  ;;  %v6000_v1 = vld [vmem:[#allocation10 + $0x2c0] ss:$16 sps:$4 sm:$0xff]  }
 0x287   : > { %1996 = vmatprep.subr.bf16.mxu1 %v5951_v10  ;;  %v6012_v9 = vld [vmem:[#allocation10 + $0x300] ss:$16 sps:$4 sm:$0xff]   ;;  %v6015_v10 = vld [vmem:[#allocation10 + $0x308] ss:$16 sps:$4 sm:$0xff]  }
 0x289   : > { %1911 = vmatpush1.bf16.msra.mxu0 %v5946_v4  ;;  %v6011_v4 = vld [vmem:[#allocation10 + $0x2ec] ss:$16 sps:$4 sm:$0xff]  }
 0x28a   : > { %1912 = vmatprep.subr.bf16.mxu0 %v5954_v5  ;;  %1997 = vmatpush1.bf16.msra.mxu1 %v5949_v11  ;;  %v6006_v5 = vld [vmem:[#allocation10 + $0x2e0] ss:$16 sps:$4 sm:$0xff]   ;;  %v6020_v11 = vld [vmem:[#allocation10 + $0x324] ss:$16 sps:$4 sm:$0xff]  }
 0x28b   : > { %1998 = vmatprep.subr.bf16.mxu1 %v5957_v12  ;;  %v6023_v12 = vld [vmem:[#allocation10 + $0x32c] ss:$16 sps:$4 sm:$0xff]  }
 0x28d   : > { %1913 = vmatpush1.bf16.msra.mxu0 %v5952_v8  ;;  %v6017_v8 = vld [vmem:[#allocation10 + $0x30c] ss:$16 sps:$4 sm:$0xff]  }
 0x28e   : > { %1999 = vmatpush1.bf16.msra.mxu1 %v5955_v13  ;;  %1914 = vmatprep.subr.bf16.mxu0 %v5960_v16  ;;  %v6018_v13 = vld [vmem:[#allocation10 + $0x320] ss:$16 sps:$4 sm:$0xff]   ;;  %v6021_v16 = vld [vmem:[#allocation10 + $0x328] ss:$16 sps:$4 sm:$0xff]  }
 0x28f   : > { %2000 = vmatprep.subr.bf16.mxu1 %v5963_v17  ;;  %v6026_v17 = vld [vmem:[#allocation10 + $0x344] ss:$16 sps:$4 sm:$0xff]  }
 0x291   : > { %1915 = vmatpush1.bf16.msra.mxu0 %v5958_v18  ;;  %v6029_v18 = vld [vmem:[#allocation10 + $0x34c] ss:$16 sps:$4 sm:$0xff]  }
 0x292   : > { %2001 = vmatpush1.bf16.msra.mxu1 %v5961_v19  ;;  %1927 = vmatprep.subr.bf16.mxu0 %v5966_v20  ;;  %v6024_v19 = vld [vmem:[#allocation10 + $0x340] ss:$16 sps:$4 sm:$0xff]   ;;  %v6027_v20 = vld [vmem:[#allocation10 + $0x348] ss:$16 sps:$4 sm:$0xff]  }
 0x293   : > { %2013 = vmatprep.subr.bf16.mxu1 %v5969_v21  ;;  %v6032_v21 = vld [vmem:[#allocation10 + $0x364] ss:$16 sps:$4 sm:$0xff]  }
 0x327   : > { %v1060_v22 = vpop.f32.mrb[4].mxu0 }
 0x328   : > { %v1062_v23 = vpop.f32.mrb[5].mxu0  ;;  %v1103_v37 = vpop.f32.mrb[4].mxu1 }
 0x329   : > { %v1064_v24 = vpop.f32.mrb[6].mxu0  ;;  %v1105_v41 = vpop.f32.mrb[5].mxu1 }
 0x32a   : > { %v1112_v25 = vpack.c.bf16 %v1064_v24, %v1060_v22  ;;  %v1066_v26 = vpop.f32.mrb[7].mxu0  ;;  %v1107_v44 = vpop.f32.mrb[6].mxu1  ;;  %v6035_v22 = vld [vmem:[#allocation10 + $0x36c] ss:$16 sps:$4 sm:$0xff]   ;;  %v6033_v24 = vld [vmem:[#allocation10 + $0x368] ss:$16 sps:$4 sm:$0xff]  }
 0x32b   : > { %v1113_v27 = vpack.c.bf16 %v1066_v26, %v1062_v23  ;;  %v7377_v45 = vpack.c.bf16 %v1107_v44, %v1103_v37  ;;  %v1109_v46 = vpop.f32.mrb[7].mxu1  ;;  %v6030_v23 = vld [vmem:[#allocation10 + $0x360] ss:$16 sps:$4 sm:$0xff]   ;;  %v6041_v26 = vld [vmem:[#allocation10 + $0x38c] ss:$16 sps:$4 sm:$0xff]  }
 0x32c   : > { %v1115_v47 = vpack.c.bf16 %v1109_v46, %v1105_v41  ;;  %v6051_v37 = vld [vmem:[#allocation10 + $0x3c8] ss:$16 sps:$4 sm:$0xff]   ;;  %v6054_v41 = vld [vmem:[#allocation10 + $0x3e0] ss:$16 sps:$4 sm:$0xff]   ;;  %v6065_v44 = vld [vmem:[#allocation10 + $0x40c] ss:$16 sps:$4 sm:$0xff]  }
 0x32d   : > { %1916 = vmatprep.mubr.bf16.mxu0 %v1113_v27  ;;  %2002 = vmatprep.mubr.bf16.mxu1 %v1113_v27  ;;  %v6036_v27 = vld [vmem:[#allocation10 + $0x380] ss:$16 sps:$4 sm:$0xff]  }
 0x32e   : > { %1917 = vmatmul.mubr.bf16.vlgmr.msra.gmra.mrb[8].mxu0 %v1112_v25  ;;  %2003 = vmatmul.mubr.bf16.vlgmr.msra.gmra.mrb[8].mxu1 %v1112_v25  ;;  %v6038_v25 = vld [vmem:[#allocation10 + $0x384] ss:$16 sps:$4 sm:$0xff]   ;;  %v6060_v46 = vld [vmem:[#allocation10 + $0x400] ss:$16 sps:$4 sm:$0xff]  }
 0x32f   : > { %1928 = vmatpush1.bf16.msra.mxu0 %v5964_v28  ;;  %2014 = vmatpush1.bf16.msra.mxu1 %v5967_v29  ;;  %v6039_v28 = vld [vmem:[#allocation10 + $0x388] ss:$16 sps:$4 sm:$0xff]   ;;  %v6044_v29 = vld [vmem:[#allocation10 + $0x3a4] ss:$16 sps:$4 sm:$0xff]  }
 0x330   : > { %1929 = vmatprep.subr.bf16.mxu0 %v5972_v30  ;;  %2015 = vmatprep.subr.bf16.mxu1 %v5975_v31  ;;  %v6047_v30 = vld [vmem:[#allocation10 + $0x3ac] ss:$16 sps:$4 sm:$0xff]   ;;  %v6042_v31 = vld [vmem:[#allocation10 + $0x3a0] ss:$16 sps:$4 sm:$0xff]  }
 0x331   : > { %1959 = vmatprep.mubr.bf16.mxu0 %v1115_v47  ;;  %2045 = vmatprep.mubr.bf16.mxu1 %v1115_v47  ;;  %v6063_v47 = vld [vmem:[#allocation10 + $0x408] ss:$16 sps:$4 sm:$0xff]  }
 0x333   : > { %1930 = vmatpush1.bf16.msra.mxu0 %v5970_v32  ;;  %2016 = vmatpush1.bf16.msra.mxu1 %v5973_v33  ;;  %v6045_v32 = vld [vmem:[#allocation10 + $0x3a8] ss:$16 sps:$4 sm:$0xff]   ;;  %v6050_v33 = vld [vmem:[#allocation10 + $0x3c4] ss:$16 sps:$4 sm:$0xff]  }
 0x334   : > { %1931 = vmatprep.subr.bf16.mxu0 %v5978_v34  ;;  %2017 = vmatprep.subr.bf16.mxu1 %v5981_v35  ;;  %v6053_v34 = vld [vmem:[#allocation10 + $0x3cc] ss:$16 sps:$4 sm:$0xff]   ;;  %v6048_v35 = vld [vmem:[#allocation10 + $0x3c0] ss:$16 sps:$4 sm:$0xff]  }
 0x337   : > { %1932 = vmatpush1.bf16.msra.mxu0 %v5976_v39  ;;  %2018 = vmatpush1.bf16.msra.mxu1 %v5979_v40  ;;  %v6056_v39 = vld [vmem:[#allocation10 + $0x3e4] ss:$16 sps:$4 sm:$0xff]   ;;  %v6059_v40 = vld [vmem:[#allocation10 + $0x3ec] ss:$16 sps:$4 sm:$0xff]  }
 0x338   : > { %1933 = vmatprep.subr.bf16.mxu0 %v5984_v42  ;;  %2019 = vmatprep.subr.bf16.mxu1 %v5987_v43  ;;  %v6057_v42 = vld [vmem:[#allocation10 + $0x3e8] ss:$16 sps:$4 sm:$0xff]   ;;  %v6062_v43 = vld [vmem:[#allocation10 + $0x404] ss:$16 sps:$4 sm:$0xff]  }
 0x33b   : > { %1934 = vmatpush1.bf16.msra.mxu0 %v5982_v48  ;;  %2020 = vmatpush1.bf16.msra.mxu1 %v5985_v50  ;;  %v6068_v48 = vld [vmem:[#allocation10 + $0x424] ss:$16 sps:$4 sm:$0xff]   ;;  %v6071_v50 = vld [vmem:[#allocation10 + $0x42c] ss:$16 sps:$4 sm:$0xff]  }
 0x33c   : > { %1935 = vmatprep.subr.bf16.mxu0 %v5990_v51  ;;  %2021 = vmatprep.subr.bf16.mxu1 %v5993_v53  ;;  %v6066_v51 = vld [vmem:[#allocation10 + $0x420] ss:$16 sps:$4 sm:$0xff]   ;;  %v6069_v53 = vld [vmem:[#allocation10 + $0x428] ss:$16 sps:$4 sm:$0xff]  }
 0x33f   : > { %1936 = vmatpush1.bf16.msra.mxu0 %v5988_v54  ;;  %2022 = vmatpush1.bf16.msra.mxu1 %v5991_v57  ;;  %v6074_v54 = vld [vmem:[#allocation10 + $0x444] ss:$16 sps:$4 sm:$0xff]   ;;  %v6077_v57 = vld [vmem:[#allocation10 + $0x44c] ss:$16 sps:$4 sm:$0xff]  }
 0x340   : > { %1937 = vmatprep.subr.bf16.mxu0 %v5996_v58  ;;  %2023 = vmatprep.subr.bf16.mxu1 %v5999_v59  ;;  %v6072_v58 = vld [vmem:[#allocation10 + $0x440] ss:$16 sps:$4 sm:$0xff]   ;;  %v6075_v59 = vld [vmem:[#allocation10 + $0x448] ss:$16 sps:$4 sm:$0xff]  }
 0x343   : > { %1938 = vmatpush1.bf16.msra.mxu0 %v5994_v60  ;;  %2024 = vmatpush1.bf16.msra.mxu1 %v5997_v61  ;;  %v6080_v60 = vld [vmem:[#allocation10 + $0x464] ss:$16 sps:$4 sm:$0xff]   ;;  %v6078_v61 = vld [vmem:[#allocation10 + $0x460] ss:$16 sps:$4 sm:$0xff]  }
 0x344   : > { %1939 = vmatprep.subr.bf16.mxu0 %v6002_v62  ;;  %2025 = vmatprep.subr.bf16.mxu1 %v6005_v63  ;;  %v6081_v62 = vld [vmem:[#allocation10 + $0x468] ss:$16 sps:$4 sm:$0xff]   ;;  %v6086_v63 = vld [vmem:[#allocation10 + $0x484] ss:$16 sps:$4 sm:$0xff]  }
 0x347   : > { %1940 = vmatpush1.bf16.msra.mxu0 %v6000_v1  ;;  %2026 = vmatpush1.bf16.msra.mxu1 %v6003_v2  ;;  %v6089_v1 = vld [vmem:[#allocation10 + $0x48c] ss:$16 sps:$4 sm:$0xff]   ;;  %v6084_v2 = vld [vmem:[#allocation10 + $0x480] ss:$16 sps:$4 sm:$0xff]  }
 0x348   : > { %1941 = vmatprep.subr.bf16.mxu0 %v6008_v3  ;;  %2027 = vmatprep.subr.bf16.mxu1 %v6011_v4  ;;  %v6087_v3 = vld [vmem:[#allocation10 + $0x488] ss:$16 sps:$4 sm:$0xff]   ;;  %v6092_v4 = vld [vmem:[#allocation10 + $0x4a4] ss:$16 sps:$4 sm:$0xff]  }
 0x34b   : > { %1942 = vmatpush1.bf16.msra.mxu0 %v6006_v5  ;;  %2028 = vmatpush1.bf16.msra.mxu1 %v6009_v6  ;;  %v6095_v5 = vld [vmem:[#allocation10 + $0x4ac] ss:$16 sps:$4 sm:$0xff]   ;;  %v6090_v6 = vld [vmem:[#allocation10 + $0x4a0] ss:$16 sps:$4 sm:$0xff]  }
 0x34c   : > { %1943 = vmatprep.subr.bf16.mxu0 %v6014_v7  ;;  %2029 = vmatprep.subr.bf16.mxu1 %v6017_v8  ;;  %v6093_v7 = vld [vmem:[#allocation10 + $0x4a8] ss:$16 sps:$4 sm:$0xff]   ;;  %v6098_v8 = vld [vmem:[#allocation10 + $0x4c4] ss:$16 sps:$4 sm:$0xff]  }
 0x34f   : > { %1944 = vmatpush1.bf16.msra.mxu0 %v6012_v9  ;;  %2030 = vmatpush1.bf16.msra.mxu1 %v6015_v10  ;;  %v6101_v9 = vld [vmem:[#allocation10 + $0x4cc] ss:$16 sps:$4 sm:$0xff]   ;;  %v6096_v10 = vld [vmem:[#allocation10 + $0x4c0] ss:$16 sps:$4 sm:$0xff]  }
 0x350   : > { %1945 = vmatprep.subr.bf16.mxu0 %v6020_v11  ;;  %2031 = vmatprep.subr.bf16.mxu1 %v6023_v12  ;;  %v6099_v11 = vld [vmem:[#allocation10 + $0x4c8] ss:$16 sps:$4 sm:$0xff]   ;;  %v6104_v12 = vld [vmem:[#allocation10 + $0x4e4] ss:$16 sps:$4 sm:$0xff]  }
 0x353   : > { %1946 = vmatpush1.bf16.msra.mxu0 %v6018_v13  ;;  %2032 = vmatpush1.bf16.msra.mxu1 %v6021_v16  ;;  %v6107_v13 = vld [vmem:[#allocation10 + $0x4ec] ss:$16 sps:$4 sm:$0xff]   ;;  %v6102_v16 = vld [vmem:[#allocation10 + $0x4e0] ss:$16 sps:$4 sm:$0xff]  }
 0x354   : > { %1947 = vmatprep.subr.bf16.mxu0 %v6026_v17  ;;  %2033 = vmatprep.subr.bf16.mxu1 %v6029_v18  ;;  %v6105_v17 = vld [vmem:[#allocation10 + $0x4e8] ss:$16 sps:$4 sm:$0xff]   ;;  %v6110_v18 = vld [vmem:[#allocation10 + $0x504] ss:$16 sps:$4 sm:$0xff]  }
 0x357   : > { %1948 = vmatpush1.bf16.msra.mxu0 %v6024_v19  ;;  %2034 = vmatpush1.bf16.msra.mxu1 %v6027_v20  ;;  %v6113_v19 = vld [vmem:[#allocation10 + $0x50c] ss:$16 sps:$4 sm:$0xff]   ;;  %v6108_v20 = vld [vmem:[#allocation10 + $0x500] ss:$16 sps:$4 sm:$0xff]  }
 0x358   : > { %1949 = vmatprep.subr.bf16.mxu0 %v6032_v21  ;;  %2035 = vmatprep.subr.bf16.mxu1 %v6035_v22  ;;  %v6111_v21 = vld [vmem:[#allocation10 + $0x508] ss:$16 sps:$4 sm:$0xff]   ;;  %v6116_v22 = vld [vmem:[#allocation10 + $0x524] ss:$16 sps:$4 sm:$0xff]  }
 0x35b   : > { %1950 = vmatpush1.bf16.msra.mxu0 %v6030_v23  ;;  %2036 = vmatpush1.bf16.msra.mxu1 %v6033_v24  ;;  %v6119_v23 = vld [vmem:[#allocation10 + $0x52c] ss:$16 sps:$4 sm:$0xff]   ;;  %v6114_v24 = vld [vmem:[#allocation10 + $0x520] ss:$16 sps:$4 sm:$0xff]  }
 0x35c   : > { %1951 = vmatprep.subr.bf16.mxu0 %v6038_v25  ;;  %2037 = vmatprep.subr.bf16.mxu1 %v6041_v26  ;;  %v6117_v25 = vld [vmem:[#allocation10 + $0x528] ss:$16 sps:$4 sm:$0xff]   ;;  %v6122_v26 = vld [vmem:[#allocation10 + $0x544] ss:$16 sps:$4 sm:$0xff]  }
 0x35f   : > { %1952 = vmatpush1.bf16.msra.mxu0 %v6036_v27  ;;  %2038 = vmatpush1.bf16.msra.mxu1 %v6039_v28  ;;  %v6125_v27 = vld [vmem:[#allocation10 + $0x54c] ss:$16 sps:$4 sm:$0xff]   ;;  %v6120_v28 = vld [vmem:[#allocation10 + $0x540] ss:$16 sps:$4 sm:$0xff]  }
 0x360   : > { %1953 = vmatprep.subr.bf16.mxu0 %v6044_v29  ;;  %2039 = vmatprep.subr.bf16.mxu1 %v6047_v30  ;;  %v6123_v29 = vld [vmem:[#allocation10 + $0x548] ss:$16 sps:$4 sm:$0xff]   ;;  %v6128_v30 = vld [vmem:[#allocation10 + $0x564] ss:$16 sps:$4 sm:$0xff]  }
 0x363   : > { %1954 = vmatpush1.bf16.msra.mxu0 %v6042_v31  ;;  %2040 = vmatpush1.bf16.msra.mxu1 %v6045_v32  ;;  %v6131_v31 = vld [vmem:[#allocation10 + $0x56c] ss:$16 sps:$4 sm:$0xff]   ;;  %v6126_v32 = vld [vmem:[#allocation10 + $0x560] ss:$16 sps:$4 sm:$0xff]  }
 0x364   : > { %1955 = vmatprep.subr.bf16.mxu0 %v6050_v33  ;;  %2041 = vmatprep.subr.bf16.mxu1 %v6053_v34  ;;  %v6129_v33 = vld [vmem:[#allocation10 + $0x568] ss:$16 sps:$4 sm:$0xff]   ;;  %v6134_v34 = vld [vmem:[#allocation10 + $0x584] ss:$16 sps:$4 sm:$0xff]  }
 0x367   : > { %1956 = vmatpush1.bf16.msra.mxu0 %v6048_v35  ;;  %2042 = vmatpush1.bf16.msra.mxu1 %v6051_v37  ;;  %v6137_v35 = vld [vmem:[#allocation10 + $0x58c] ss:$16 sps:$4 sm:$0xff]   ;;  %v6132_v37 = vld [vmem:[#allocation10 + $0x580] ss:$16 sps:$4 sm:$0xff]  }
 0x368   : > { %1957 = vmatprep.subr.bf16.mxu0 %v6056_v39  ;;  %2043 = vmatprep.subr.bf16.mxu1 %v6059_v40  ;;  %v6135_v39 = vld [vmem:[#allocation10 + $0x588] ss:$16 sps:$4 sm:$0xff]   ;;  %v6140_v40 = vld [vmem:[#allocation10 + $0x5a4] ss:$16 sps:$4 sm:$0xff]  }
 0x36b   : > { %1958 = vmatpush1.bf16.msra.mxu0 %v6054_v41  ;;  %2044 = vmatpush1.bf16.msra.mxu1 %v6057_v42  ;;  %v6143_v41 = vld [vmem:[#allocation10 + $0x5ac] ss:$16 sps:$4 sm:$0xff]   ;;  %v6138_v42 = vld [vmem:[#allocation10 + $0x5a0] ss:$16 sps:$4 sm:$0xff]  }
 0x36c   : > { %2696 = vmatprep.subr.bf16.mxu0 %v6062_v43  ;;  %2782 = vmatprep.subr.bf16.mxu1 %v6065_v44  ;;  %v6141_v43 = vld [vmem:[#allocation10 + $0x5a8] ss:$16 sps:$4 sm:$0xff]   ;;  %v6146_v44 = vld [vmem:[#allocation10 + $0x5c4] ss:$16 sps:$4 sm:$0xff]  }
 0x36e   : > { %1960 = vmatmul.mubr.bf16.vlgmr.msra.gmra.mrb[8].mxu0 %v7377_v45  ;;  %2046 = vmatmul.mubr.bf16.vlgmr.msra.gmra.mrb[8].mxu1 %v7377_v45  ;;  %v6083_v45 = vld [vmem:[#allocation10 + $0x46c] ss:$16 sps:$4 sm:$0xff]  }
 0x36f   : > { %2697 = vmatpush1.bf16.msra.mxu0 %v6060_v46  ;;  %2728 = vmatprep.mubr.bf16.mxu0 %v7363_v56  ;;  %v6149_v46 = vld [vmem:[#allocation10 + $0x5cc] ss:$16 sps:$4 sm:$0xff]  }
 0x370   : > { %2783 = vmatpush1.bf16.msra.mxu1 %v6063_v47  ;;  %2814 = vmatprep.mubr.bf16.mxu1 %v7363_v56  ;;  %v6144_v47 = vld [vmem:[#allocation10 + $0x5c0] ss:$16 sps:$4 sm:$0xff]  }
 0x371   : > { %2698 = vmatprep.subr.bf16.mxu0 %v6068_v48  ;;  %2784 = vmatprep.subr.bf16.mxu1 %v6071_v50  ;;  %v6147_v48 = vld [vmem:[#allocation10 + $0x5c8] ss:$16 sps:$4 sm:$0xff]   ;;  %v6152_v50 = vld [vmem:[#allocation10 + $0x5e4] ss:$16 sps:$4 sm:$0xff]  }
 0x373   : > { %2699 = vmatpush1.bf16.msra.mxu0 %v6066_v51  ;;  %v6155_v51 = vld [vmem:[#allocation10 + $0x5ec] ss:$16 sps:$4 sm:$0xff]  }
 0x374   : > { %2785 = vmatpush1.bf16.msra.mxu1 %v6069_v53  ;;  %2700 = vmatprep.subr.bf16.mxu0 %v6074_v54  ;;  %v6150_v53 = vld [vmem:[#allocation10 + $0x5e0] ss:$16 sps:$4 sm:$0xff]   ;;  %v6153_v54 = vld [vmem:[#allocation10 + $0x5e8] ss:$16 sps:$4 sm:$0xff]  }
 0x375   : > { %2786 = vmatprep.subr.bf16.mxu1 %v6077_v57  ;;  %v6158_v57 = vld [vmem:[#allocation10 + $0x604] ss:$16 sps:$4 sm:$0xff]  }
 0x377   : > { %2701 = vmatpush1.bf16.msra.mxu0 %v6072_v58  ;;  %v6161_v58 = vld [vmem:[#allocation10 + $0x60c] ss:$16 sps:$4 sm:$0xff]  }
 0x378   : > { %2787 = vmatpush1.bf16.msra.mxu1 %v6075_v59  ;;  %2702 = vmatprep.subr.bf16.mxu0 %v6080_v60  ;;  %v6156_v59 = vld [vmem:[#allocation10 + $0x600] ss:$16 sps:$4 sm:$0xff]   ;;  %v6159_v60 = vld [vmem:[#allocation10 + $0x608] ss:$16 sps:$4 sm:$0xff]  }
 0x379   : > { %2788 = vmatprep.subr.bf16.mxu1 %v6083_v45  ;;  %v6164_v45 = vld [vmem:[#allocation10 + $0x624] ss:$16 sps:$4 sm:$0xff]  }
 0x37b   : > { %2703 = vmatpush1.bf16.msra.mxu0 %v6078_v61  ;;  %v6167_v61 = vld [vmem:[#allocation10 + $0x62c] ss:$16 sps:$4 sm:$0xff]  }
 0x37c   : > { %2789 = vmatpush1.bf16.msra.mxu1 %v6081_v62  ;;  %2704 = vmatprep.subr.bf16.mxu0 %v6086_v63  ;;  %v6162_v62 = vld [vmem:[#allocation10 + $0x620] ss:$16 sps:$4 sm:$0xff]   ;;  %v6165_v63 = vld [vmem:[#allocation10 + $0x628] ss:$16 sps:$4 sm:$0xff]  }
 0x37d   : > { %2790 = vmatprep.subr.bf16.mxu1 %v6089_v1  ;;  %v6170_v1 = vld [vmem:[#allocation10 + $0x644] ss:$16 sps:$4 sm:$0xff]  }
 0x37f   : > { %2705 = vmatpush1.bf16.msra.mxu0 %v6084_v2  ;;  %v6173_v2 = vld [vmem:[#allocation10 + $0x64c] ss:$16 sps:$4 sm:$0xff]  }
 0x380   : > { %2791 = vmatpush1.bf16.msra.mxu1 %v6087_v3  ;;  %2706 = vmatprep.subr.bf16.mxu0 %v6092_v4  ;;  %v6168_v3 = vld [vmem:[#allocation10 + $0x640] ss:$16 sps:$4 sm:$0xff]   ;;  %v6171_v4 = vld [vmem:[#allocation10 + $0x648] ss:$16 sps:$4 sm:$0xff]  }
 0x381   : > { %2792 = vmatprep.subr.bf16.mxu1 %v6095_v5  ;;  %v6176_v5 = vld [vmem:[#allocation10 + $0x664] ss:$16 sps:$4 sm:$0xff]  }
 0x383   : > { %2707 = vmatpush1.bf16.msra.mxu0 %v6090_v6  ;;  %v6179_v6 = vld [vmem:[#allocation10 + $0x66c] ss:$16 sps:$4 sm:$0xff]  }
 0x384   : > { %2793 = vmatpush1.bf16.msra.mxu1 %v6093_v7  ;;  %2708 = vmatprep.subr.bf16.mxu0 %v6098_v8  ;;  %v6174_v7 = vld [vmem:[#allocation10 + $0x660] ss:$16 sps:$4 sm:$0xff]   ;;  %v6177_v8 = vld [vmem:[#allocation10 + $0x668] ss:$16 sps:$4 sm:$0xff]  }
 0x385   : > { %2794 = vmatprep.subr.bf16.mxu1 %v6101_v9  ;;  %v6182_v9 = vld [vmem:[#allocation10 + $0x684] ss:$16 sps:$4 sm:$0xff]  }
 0x387   : > { %2709 = vmatpush1.bf16.msra.mxu0 %v6096_v10  ;;  %v6185_v10 = vld [vmem:[#allocation10 + $0x68c] ss:$16 sps:$4 sm:$0xff]  }
 0x388   : > { %2795 = vmatpush1.bf16.msra.mxu1 %v6099_v11  ;;  %2710 = vmatprep.subr.bf16.mxu0 %v6104_v12  ;;  %v6180_v11 = vld [vmem:[#allocation10 + $0x680] ss:$16 sps:$4 sm:$0xff]   ;;  %v6183_v12 = vld [vmem:[#allocation10 + $0x688] ss:$16 sps:$4 sm:$0xff]  }
 0x389   : > { %2796 = vmatprep.subr.bf16.mxu1 %v6107_v13  ;;  %v6188_v13 = vld [vmem:[#allocation10 + $0x6a4] ss:$16 sps:$4 sm:$0xff]  }
 0x38b   : > { %2711 = vmatpush1.bf16.msra.mxu0 %v6102_v16  ;;  %v6191_v16 = vld [vmem:[#allocation10 + $0x6ac] ss:$16 sps:$4 sm:$0xff]  }
 0x38c   : > { %2797 = vmatpush1.bf16.msra.mxu1 %v6105_v17  ;;  %2712 = vmatprep.subr.bf16.mxu0 %v6110_v18  ;;  %v6186_v17 = vld [vmem:[#allocation10 + $0x6a0] ss:$16 sps:$4 sm:$0xff]   ;;  %v6189_v18 = vld [vmem:[#allocation10 + $0x6a8] ss:$16 sps:$4 sm:$0xff]  }
 0x38d   : > { %2798 = vmatprep.subr.bf16.mxu1 %v6113_v19  ;;  %v6194_v19 = vld [vmem:[#allocation10 + $0x6c4] ss:$16 sps:$4 sm:$0xff]  }
 0x38f   : > { %2713 = vmatpush1.bf16.msra.mxu0 %v6108_v20  ;;  %v6197_v20 = vld [vmem:[#allocation10 + $0x6cc] ss:$16 sps:$4 sm:$0xff]  }
 0x390   : > { %2799 = vmatpush1.bf16.msra.mxu1 %v6111_v21  ;;  %2714 = vmatprep.subr.bf16.mxu0 %v6116_v22  ;;  %v6192_v21 = vld [vmem:[#allocation10 + $0x6c0] ss:$16 sps:$4 sm:$0xff]   ;;  %v6195_v22 = vld [vmem:[#allocation10 + $0x6c8] ss:$16 sps:$4 sm:$0xff]  }
 0x391   : > { %2800 = vmatprep.subr.bf16.mxu1 %v6119_v23  ;;  %v6200_v23 = vld [vmem:[#allocation10 + $0x6e4] ss:$16 sps:$4 sm:$0xff]  }
 0x393   : > { %2715 = vmatpush1.bf16.msra.mxu0 %v6114_v24  ;;  %v6203_v24 = vld [vmem:[#allocation10 + $0x6ec] ss:$16 sps:$4 sm:$0xff]  }
 0x394   : > { %2801 = vmatpush1.bf16.msra.mxu1 %v6117_v25  ;;  %2716 = vmatprep.subr.bf16.mxu0 %v6122_v26  ;;  %v6198_v25 = vld [vmem:[#allocation10 + $0x6e0] ss:$16 sps:$4 sm:$0xff]   ;;  %v6201_v26 = vld [vmem:[#allocation10 + $0x6e8] ss:$16 sps:$4 sm:$0xff]  }
 0x395   : > { %2802 = vmatprep.subr.bf16.mxu1 %v6125_v27  ;;  %v6206_v27 = vld [vmem:[#allocation10 + $0x704] ss:$16 sps:$4 sm:$0xff]  }
 0x397   : > { %2717 = vmatpush1.bf16.msra.mxu0 %v6120_v28  ;;  %v6209_v28 = vld [vmem:[#allocation10 + $0x70c] ss:$16 sps:$4 sm:$0xff]  }
 0x398   : > { %2803 = vmatpush1.bf16.msra.mxu1 %v6123_v29  ;;  %2718 = vmatprep.subr.bf16.mxu0 %v6128_v30  ;;  %v6204_v29 = vld [vmem:[#allocation10 + $0x700] ss:$16 sps:$4 sm:$0xff]   ;;  %v6207_v30 = vld [vmem:[#allocation10 + $0x708] ss:$16 sps:$4 sm:$0xff]  }
 0x399   : > { %2804 = vmatprep.subr.bf16.mxu1 %v6131_v31  ;;  %v6212_v31 = vld [vmem:[#allocation10 + $0x724] ss:$16 sps:$4 sm:$0xff]  }
 0x39b   : > { %2719 = vmatpush1.bf16.msra.mxu0 %v6126_v32  ;;  %v6215_v32 = vld [vmem:[#allocation10 + $0x72c] ss:$16 sps:$4 sm:$0xff]  }
 0x39c   : > { %2805 = vmatpush1.bf16.msra.mxu1 %v6129_v33  ;;  %2720 = vmatprep.subr.bf16.mxu0 %v6134_v34  ;;  %v6210_v33 = vld [vmem:[#allocation10 + $0x720] ss:$16 sps:$4 sm:$0xff]   ;;  %v6213_v34 = vld [vmem:[#allocation10 + $0x728] ss:$16 sps:$4 sm:$0xff]  }
 0x39d   : > { %2806 = vmatprep.subr.bf16.mxu1 %v6137_v35  ;;  %v6218_v35 = vld [vmem:[#allocation10 + $0x744] ss:$16 sps:$4 sm:$0xff]  }
 0x39f   : > { %2721 = vmatpush1.bf16.msra.mxu0 %v6132_v37  ;;  %v6221_v37 = vld [vmem:[#allocation10 + $0x74c] ss:$16 sps:$4 sm:$0xff]  }
 0x3a0   : > { %2807 = vmatpush1.bf16.msra.mxu1 %v6135_v39  ;;  %2722 = vmatprep.subr.bf16.mxu0 %v6140_v40  ;;  %v6216_v39 = vld [vmem:[#allocation10 + $0x740] ss:$16 sps:$4 sm:$0xff]   ;;  %v6219_v40 = vld [vmem:[#allocation10 + $0x748] ss:$16 sps:$4 sm:$0xff]  }
 0x3a1   : > { %2808 = vmatprep.subr.bf16.mxu1 %v6143_v41  ;;  %v6224_v41 = vld [vmem:[#allocation10 + $0x764] ss:$16 sps:$4 sm:$0xff]  }
 0x3a3   : > { %2723 = vmatpush1.bf16.msra.mxu0 %v6138_v42  ;;  %v6227_v42 = vld [vmem:[#allocation10 + $0x76c] ss:$16 sps:$4 sm:$0xff]  }
 0x3a4   : > { %2809 = vmatpush1.bf16.msra.mxu1 %v6141_v43  ;;  %2724 = vmatprep.subr.bf16.mxu0 %v6146_v44  ;;  %v6222_v43 = vld [vmem:[#allocation10 + $0x760] ss:$16 sps:$4 sm:$0xff]   ;;  %v6225_v44 = vld [vmem:[#allocation10 + $0x768] ss:$16 sps:$4 sm:$0xff]  }
 0x3a5   : > { %2810 = vmatprep.subr.bf16.mxu1 %v6149_v46  ;;  %v6230_v46 = vld [vmem:[#allocation10 + $0x784] ss:$16 sps:$4 sm:$0xff]  }
 0x3a7   : > { %2725 = vmatpush1.bf16.msra.mxu0 %v6144_v47  ;;  %v6233_v47 = vld [vmem:[#allocation10 + $0x78c] ss:$16 sps:$4 sm:$0xff]  }
 0x3a8   : > { %2811 = vmatpush1.bf16.msra.mxu1 %v6147_v48  ;;  %2726 = vmatprep.subr.bf16.mxu0 %v6152_v50  ;;  %v6228_v48 = vld [vmem:[#allocation10 + $0x780] ss:$16 sps:$4 sm:$0xff]   ;;  %v6231_v50 = vld [vmem:[#allocation10 + $0x788] ss:$16 sps:$4 sm:$0xff]  }
 0x3a9   : > { %2812 = vmatprep.subr.bf16.mxu1 %v6155_v51  ;;  %v6236_v51 = vld [vmem:[#allocation10 + $0x7a4] ss:$16 sps:$4 sm:$0xff]  }
 0x3ab   : > { %2727 = vmatpush1.bf16.msra.mxu0 %v6150_v53  ;;  %v6239_v53 = vld [vmem:[#allocation10 + $0x7ac] ss:$16 sps:$4 sm:$0xff]  }
 0x3ac   : > { %2813 = vmatpush1.bf16.msra.mxu1 %v6153_v54  ;;  %2739 = vmatprep.subr.bf16.mxu0 %v6158_v57  ;;  %v6234_v54 = vld [vmem:[#allocation10 + $0x7a0] ss:$16 sps:$4 sm:$0xff]   ;;  %v6237_v57 = vld [vmem:[#allocation10 + $0x7a8] ss:$16 sps:$4 sm:$0xff]  }
 0x3ad   : > { %2825 = vmatprep.subr.bf16.mxu1 %v6161_v58  ;;  %v6242_v58 = vld [vmem:[#allocation10 + $0x7c4] ss:$16 sps:$4 sm:$0xff]  }
 0x3ae   : > { %2729 = vmatmul.mubr.bf16.vlgmr.msra.gmra.mrb[8].mxu0 %v7361_v55 }
 0x3af   : > { %2815 = vmatmul.mubr.bf16.vlgmr.msra.gmra.mrb[8].mxu1 %v7361_v55  ;;  %2740 = vmatpush1.bf16.msra.mxu0 %v6156_v59  ;;  %v6245_v59 = vld [vmem:[#allocation10 + $0x7cc] ss:$16 sps:$4 sm:$0xff]  }
 0x3b0   : > { %2771 = vmatprep.mubr.bf16.mxu0 %v7372_v15  ;;  %2826 = vmatpush1.bf16.msra.mxu1 %v6159_v60  ;;  %v6240_v60 = vld [vmem:[#allocation10 + $0x7c0] ss:$16 sps:$4 sm:$0xff]  }
 0x3b1   : > { %2857 = vmatprep.mubr.bf16.mxu1 %v7372_v15  ;;  %2741 = vmatprep.subr.bf16.mxu0 %v6164_v45  ;;  %v6243_v45 = vld [vmem:[#allocation10 + $0x7c8] ss:$16 sps:$4 sm:$0xff]  }
 0x3b2   : > { %2827 = vmatprep.subr.bf16.mxu1 %v6167_v61  ;;  %v6248_v61 = vld [vmem:[#allocation10 + $0x7e4] ss:$16 sps:$4 sm:$0xff]  }
 0x3b3   : > { %2742 = vmatpush1.bf16.msra.mxu0 %v6162_v62  ;;  %v6251_v62 = vld [vmem:[#allocation10 + $0x7ec] ss:$16 sps:$4 sm:$0xff]  }
 0x3b4   : > { %2828 = vmatpush1.bf16.msra.mxu1 %v6165_v63  ;;  %2743 = vmatprep.subr.bf16.mxu0 %v6170_v1  ;;  %v6246_v63 = vld [vmem:[#allocation10 + $0x7e0] ss:$16 sps:$4 sm:$0xff]   ;;  %v6249_v1 = vld [vmem:[#allocation10 + $0x7e8] ss:$16 sps:$4 sm:$0xff]  }
 0x3b5   : > { %2829 = vmatprep.subr.bf16.mxu1 %v6173_v2  ;;  %v6255_v2 = vld [vmem:[#allocation10 + $0x804] ss:$16 sps:$4 sm:$0xff]  }
 0x3b7   : > { %2744 = vmatpush1.bf16.msra.mxu0 %v6168_v3  ;;  %v6258_v3 = vld [vmem:[#allocation10 + $0x80c] ss:$16 sps:$4 sm:$0xff]  }
 0x3b8   : > { %2830 = vmatpush1.bf16.msra.mxu1 %v6171_v4  ;;  %2745 = vmatprep.subr.bf16.mxu0 %v6176_v5  ;;  %v6252_v4 = vld [vmem:[#allocation8 + $0x8] sm:$0xff]  }
 0x3b9   : > { %2831 = vmatprep.subr.bf16.mxu1 %v6179_v6  ;;  %v6256_v5 = vld [vmem:[#allocation10 + $0x808] ss:$16 sps:$4 sm:$0xff]   ;;  %v6264_v6 = vld [vmem:[#allocation10 + $0x82c] ss:$16 sps:$4 sm:$0xff]  }
 0x3bb   : > { %2746 = vmatpush1.bf16.msra.mxu0 %v6174_v7  ;;  %v6259_v7 = vld [vmem:[#allocation10 + $0x820] ss:$16 sps:$4 sm:$0xff]  }
 0x3bc   : > { %2832 = vmatpush1.bf16.msra.mxu1 %v6177_v8  ;;  %2747 = vmatprep.subr.bf16.mxu0 %v6182_v9  ;;  %v6270_v8 = vld [vmem:[#allocation10 + $0x84c] ss:$16 sps:$4 sm:$0xff]   ;;  %v6268_v9 = vld [vmem:[#allocation10 + $0x848] ss:$16 sps:$4 sm:$0xff]  }
 0x3bd   : > { %2833 = vmatprep.subr.bf16.mxu1 %v6185_v10  ;;  %v6273_v10 = vld [vmem:[#allocation10 + $0x864] ss:$16 sps:$4 sm:$0xff]  }
 0x3bf   : > { %2748 = vmatpush1.bf16.msra.mxu0 %v6180_v11  ;;  %v6276_v11 = vld [vmem:[#allocation10 + $0x86c] ss:$16 sps:$4 sm:$0xff]  }
 0x3c0   : > { %2834 = vmatpush1.bf16.msra.mxu1 %v6183_v12  ;;  %2749 = vmatprep.subr.bf16.mxu0 %v6188_v13  ;;  %v6271_v12 = vld [vmem:[#allocation10 + $0x860] ss:$16 sps:$4 sm:$0xff]   ;;  %v6274_v13 = vld [vmem:[#allocation10 + $0x868] ss:$16 sps:$4 sm:$0xff]  }
 0x3c1   : > { %2835 = vmatprep.subr.bf16.mxu1 %v6191_v16  ;;  %v6279_v16 = vld [vmem:[#allocation10 + $0x884] ss:$16 sps:$4 sm:$0xff]  }
 0x3c3   : > { %2750 = vmatpush1.bf16.msra.mxu0 %v6186_v17  ;;  %v6282_v17 = vld [vmem:[#allocation10 + $0x88c] ss:$16 sps:$4 sm:$0xff]  }
 0x3c4   : > { %2836 = vmatpush1.bf16.msra.mxu1 %v6189_v18  ;;  %2751 = vmatprep.subr.bf16.mxu0 %v6194_v19  ;;  %v6277_v18 = vld [vmem:[#allocation10 + $0x880] ss:$16 sps:$4 sm:$0xff]   ;;  %v6280_v19 = vld [vmem:[#allocation10 + $0x888] ss:$16 sps:$4 sm:$0xff]  }
 0x3c5   : > { %2837 = vmatprep.subr.bf16.mxu1 %v6197_v20  ;;  %v6285_v20 = vld [vmem:[#allocation10 + $0x8a4] ss:$16 sps:$4 sm:$0xff]  }
 0x3c7   : > { %2752 = vmatpush1.bf16.msra.mxu0 %v6192_v21  ;;  %v6288_v21 = vld [vmem:[#allocation10 + $0x8ac] ss:$16 sps:$4 sm:$0xff]  }
 0x3c8   : > { %2838 = vmatpush1.bf16.msra.mxu1 %v6195_v22  ;;  %2753 = vmatprep.subr.bf16.mxu0 %v6200_v23  ;;  %v6283_v22 = vld [vmem:[#allocation10 + $0x8a0] ss:$16 sps:$4 sm:$0xff]   ;;  %v6286_v23 = vld [vmem:[#allocation10 + $0x8a8] ss:$16 sps:$4 sm:$0xff]  }
 0x3c9   : > { %2839 = vmatprep.subr.bf16.mxu1 %v6203_v24  ;;  %v6291_v24 = vld [vmem:[#allocation10 + $0x8c4] ss:$16 sps:$4 sm:$0xff]  }
 0x3cb   : > { %2754 = vmatpush1.bf16.msra.mxu0 %v6198_v25  ;;  %v6294_v25 = vld [vmem:[#allocation10 + $0x8cc] ss:$16 sps:$4 sm:$0xff]  }
 0x3cc   : > { %2840 = vmatpush1.bf16.msra.mxu1 %v6201_v26  ;;  %2755 = vmatprep.subr.bf16.mxu0 %v6206_v27  ;;  %v6289_v26 = vld [vmem:[#allocation10 + $0x8c0] ss:$16 sps:$4 sm:$0xff]   ;;  %v6292_v27 = vld [vmem:[#allocation10 + $0x8c8] ss:$16 sps:$4 sm:$0xff]  }
 0x3cd   : > { %2841 = vmatprep.subr.bf16.mxu1 %v6209_v28  ;;  %v6297_v28 = vld [vmem:[#allocation10 + $0x8e4] ss:$16 sps:$4 sm:$0xff]  }
 0x3cf   : > { %2756 = vmatpush1.bf16.msra.mxu0 %v6204_v29  ;;  %v6300_v29 = vld [vmem:[#allocation10 + $0x8ec] ss:$16 sps:$4 sm:$0xff]  }
 0x3d0   : > { %2842 = vmatpush1.bf16.msra.mxu1 %v6207_v30  ;;  %2757 = vmatprep.subr.bf16.mxu0 %v6212_v31  ;;  %v6295_v30 = vld [vmem:[#allocation10 + $0x8e0] ss:$16 sps:$4 sm:$0xff]   ;;  %v6298_v31 = vld [vmem:[#allocation10 + $0x8e8] ss:$16 sps:$4 sm:$0xff]  }
 0x3d1   : > { %2843 = vmatprep.subr.bf16.mxu1 %v6215_v32  ;;  %v6303_v32 = vld [vmem:[#allocation10 + $0x904] ss:$16 sps:$4 sm:$0xff]  }
 0x3d3   : > { %2758 = vmatpush1.bf16.msra.mxu0 %v6210_v33  ;;  %v6306_v33 = vld [vmem:[#allocation10 + $0x90c] ss:$16 sps:$4 sm:$0xff]  }
 0x3d4   : > { %2844 = vmatpush1.bf16.msra.mxu1 %v6213_v34  ;;  %2759 = vmatprep.subr.bf16.mxu0 %v6218_v35  ;;  %v6301_v34 = vld [vmem:[#allocation10 + $0x900] ss:$16 sps:$4 sm:$0xff]   ;;  %v6304_v35 = vld [vmem:[#allocation10 + $0x908] ss:$16 sps:$4 sm:$0xff]  }
 0x3d5   : > { %2845 = vmatprep.subr.bf16.mxu1 %v6221_v37  ;;  %v6309_v37 = vld [vmem:[#allocation10 + $0x924] ss:$16 sps:$4 sm:$0xff]  }
 0x3d7   : > { %2760 = vmatpush1.bf16.msra.mxu0 %v6216_v39  ;;  %v6312_v39 = vld [vmem:[#allocation10 + $0x92c] ss:$16 sps:$4 sm:$0xff]  }
 0x3d8   : > { %2846 = vmatpush1.bf16.msra.mxu1 %v6219_v40  ;;  %2761 = vmatprep.subr.bf16.mxu0 %v6224_v41  ;;  %v6307_v40 = vld [vmem:[#allocation10 + $0x920] ss:$16 sps:$4 sm:$0xff]   ;;  %v6310_v41 = vld [vmem:[#allocation10 + $0x928] ss:$16 sps:$4 sm:$0xff]  }
 0x3d9   : > { %2847 = vmatprep.subr.bf16.mxu1 %v6227_v42  ;;  %v6315_v42 = vld [vmem:[#allocation10 + $0x944] ss:$16 sps:$4 sm:$0xff]  }
 0x3db   : > { %2762 = vmatpush1.bf16.msra.mxu0 %v6222_v43  ;;  %v6318_v43 = vld [vmem:[#allocation10 + $0x94c] ss:$16 sps:$4 sm:$0xff]  }
 0x3dc   : > { %2848 = vmatpush1.bf16.msra.mxu1 %v6225_v44  ;;  %2763 = vmatprep.subr.bf16.mxu0 %v6230_v46  ;;  %v6313_v44 = vld [vmem:[#allocation10 + $0x940] ss:$16 sps:$4 sm:$0xff]   ;;  %v6316_v46 = vld [vmem:[#allocation10 + $0x948] ss:$16 sps:$4 sm:$0xff]  }
 0x3dd   : > { %2849 = vmatprep.subr.bf16.mxu1 %v6233_v47  ;;  %v6321_v47 = vld [vmem:[#allocation10 + $0x964] ss:$16 sps:$4 sm:$0xff]  }
 0x3df   : > { %2764 = vmatpush1.bf16.msra.mxu0 %v6228_v48  ;;  %v6324_v48 = vld [vmem:[#allocation10 + $0x96c] ss:$16 sps:$4 sm:$0xff]  }
 0x3e0   : > { %2850 = vmatpush1.bf16.msra.mxu1 %v6231_v50  ;;  %2765 = vmatprep.subr.bf16.mxu0 %v6236_v51  ;;  %v6319_v50 = vld [vmem:[#allocation10 + $0x960] ss:$16 sps:$4 sm:$0xff]   ;;  %v6322_v51 = vld [vmem:[#allocation10 + $0x968] ss:$16 sps:$4 sm:$0xff]  }
 0x3e1   : > { %2851 = vmatprep.subr.bf16.mxu1 %v6239_v53  ;;  %v6327_v53 = vld [vmem:[#allocation10 + $0x984] ss:$16 sps:$4 sm:$0xff]  }
 0x3e3   : > { %2766 = vmatpush1.bf16.msra.mxu0 %v6234_v54  ;;  %v6330_v54 = vld [vmem:[#allocation10 + $0x98c] ss:$16 sps:$4 sm:$0xff]  }
 0x3e4   : > { %2852 = vmatpush1.bf16.msra.mxu1 %v6237_v57  ;;  %2767 = vmatprep.subr.bf16.mxu0 %v6242_v58  ;;  %v6325_v57 = vld [vmem:[#allocation10 + $0x980] ss:$16 sps:$4 sm:$0xff]   ;;  %v6328_v58 = vld [vmem:[#allocation10 + $0x988] ss:$16 sps:$4 sm:$0xff]  }
 0x3e5   : > { %2853 = vmatprep.subr.bf16.mxu1 %v6245_v59  ;;  %v6333_v59 = vld [vmem:[#allocation10 + $0x9a4] ss:$16 sps:$4 sm:$0xff]  }
 0x3e7   : > { %2768 = vmatpush1.bf16.msra.mxu0 %v6240_v60  ;;  %v6336_v60 = vld [vmem:[#allocation10 + $0x9ac] ss:$16 sps:$4 sm:$0xff]  }
 0x3e8   : > { %2854 = vmatpush1.bf16.msra.mxu1 %v6243_v45  ;;  %2769 = vmatprep.subr.bf16.mxu0 %v6248_v61  ;;  %v6331_v45 = vld [vmem:[#allocation10 + $0x9a0] ss:$16 sps:$4 sm:$0xff]   ;;  %v6334_v61 = vld [vmem:[#allocation10 + $0x9a8] ss:$16 sps:$4 sm:$0xff]  }
 0x3e9   : > { %2855 = vmatprep.subr.bf16.mxu1 %v6251_v62  ;;  %v6339_v62 = vld [vmem:[#allocation10 + $0x9c4] ss:$16 sps:$4 sm:$0xff]  }
 0x3eb   : > { %2770 = vmatpush1.bf16.msra.mxu0 %v6246_v63  ;;  %v6342_v63 = vld [vmem:[#allocation10 + $0x9cc] ss:$16 sps:$4 sm:$0xff]  }
 0x3ec   : > { %2856 = vmatpush1.bf16.msra.mxu1 %v6249_v1  ;;  %2879 = vmatprep.subr.bf16.mxu0 %v7363_v56  ;;  %v6253_v56 = vld [vmem:[#allocation10 + $0x800] ss:$16 sps:$4 sm:$0xff]  }
 0x3ed   : > { %2922 = vmatprep.subr.bf16.mxu1 %v7372_v15  ;;  %v6261_v15 = vld [vmem:[#allocation10 + $0x824] ss:$16 sps:$4 sm:$0xff]   ;;  %v6337_v1 = vld [vmem:[#allocation10 + $0x9c0] ss:$16 sps:$4 sm:$0xff]  }
 0x3ee   : > { %2772 = vmatmul.mubr.bf16.vlgmr.msra.gmra.mrb[8].mxu0 %v7370_v14 }
 0x3ef   : > { %2858 = vmatmul.mubr.bf16.vlgmr.msra.gmra.mrb[8].mxu1 %v7370_v14  ;;  %2880 = vmatpush1.bf16.msra.mxu0 %v7361_v55  ;;  %v6262_v55 = vld [vmem:[#allocation10 + $0x828] ss:$16 sps:$4 sm:$0xff]  }
 0x3f0   : > { %2923 = vmatpush1.bf16.msra.mxu1 %v7370_v14  ;;  %2911 = vmatprep.mubr.bf16.mxu0 %v6908_v0  ;;  %v6267_v14 = vld [vmem:[#allocation10 + $0x844] ss:$16 sps:$4 sm:$0xff]  }
 0x3f1   : > { %2954 = vmatprep.mubr.bf16.mxu1 %v6908_v0  ;;  %3738 = vmatprep.subr.bf16.mxu0 %v6255_v2  ;;  %v6265_v0 = vld [vmem:[#allocation10 + $0x840] ss:$16 sps:$4 sm:$0xff]   ;;  %v6340_v2 = vld [vmem:[#allocation10 + $0x9c8] ss:$16 sps:$4 sm:$0xff]  }
 0x3f2   : > { %3824 = vmatprep.subr.bf16.mxu1 %v6258_v3  ;;  %v6345_v3 = vld [vmem:[#allocation10 + $0x9e4] ss:$16 sps:$4 sm:$0xff]  }
 0x3f6   : > { %5269 = vmatmul.mubr.msk.bf16.vlgmr.msra.gmra.mrb[12].mxu0 %vm1022_vm0, %v6252_v4 }
 0x3f7   : > { %5270 = vmatmul.mubr.msk.bf16.vlgmr.msra.gmra.mrb[12].mxu1 %vm1022_vm0, %v6252_v4  ;;  %3739 = vmatpush1.bf16.msra.mxu0 %v6253_v56  ;;  %v6348_v4 = vld [vmem:[#allocation10 + $0x9ec] ss:$16 sps:$4 sm:$0xff]   ;;  %v6343_v56 = vld [vmem:[#allocation10 + $0x9e0] ss:$16 sps:$4 sm:$0xff]  }
 0x3f8   : > { %3825 = vmatpush1.bf16.msra.mxu1 %v6256_v5  ;;  %3740 = vmatprep.subr.bf16.mxu0 %v6261_v15  ;;  %v6346_v5 = vld [vmem:[#allocation10 + $0x9e8] ss:$16 sps:$4 sm:$0xff]   ;;  %v6351_v15 = vld [vmem:[#allocation10 + $0xa04] ss:$16 sps:$4 sm:$0xff]  }
 0x3f9   : > { %3826 = vmatprep.subr.bf16.mxu1 %v6264_v6  ;;  %v6354_v6 = vld [vmem:[#allocation10 + $0xa0c] ss:$16 sps:$4 sm:$0xff]  }
 0x3fb   : > { %3741 = vmatpush1.bf16.msra.mxu0 %v6259_v7 }
 0x3fc   : > { %3827 = vmatpush1.bf16.msra.mxu1 %v6262_v55  ;;  %3742 = vmatprep.subr.bf16.mxu0 %v6267_v14 }
 0x3fd   : > { %3828 = vmatprep.subr.bf16.mxu1 %v6270_v8 }
 0x3ff   : > { %3743 = vmatpush1.bf16.msra.mxu0 %v6265_v0 }
 0x400   : > { %3829 = vmatpush1.bf16.msra.mxu1 %v6268_v9  ;;  %3744 = vmatprep.subr.bf16.mxu0 %v6273_v10 }
 0x401   : > { %3830 = vmatprep.subr.bf16.mxu1 %v6276_v11 }
 0x403   : > { %3745 = vmatpush1.bf16.msra.mxu0 %v6271_v12 }
 0x404   : > { %3831 = vmatpush1.bf16.msra.mxu1 %v6274_v13  ;;  %3746 = vmatprep.subr.bf16.mxu0 %v6279_v16  ;;  %v6349_v13 = vld [vmem:[#allocation10 + $0xa00] ss:$16 sps:$4 sm:$0xff]   ;;  %v6352_v16 = vld [vmem:[#allocation10 + $0xa08] ss:$16 sps:$4 sm:$0xff]  }
 0x405   : > { %3832 = vmatprep.subr.bf16.mxu1 %v6282_v17 }
 0x407   : > { %3747 = vmatpush1.bf16.msra.mxu0 %v6277_v18 }
 0x408   : > { %3833 = vmatpush1.bf16.msra.mxu1 %v6280_v19  ;;  %3748 = vmatprep.subr.bf16.mxu0 %v6285_v20  ;;  %v6357_v19 = vld [vmem:[#allocation10 + $0xa24] ss:$16 sps:$4 sm:$0xff]   ;;  %v6360_v20 = vld [vmem:[#allocation10 + $0xa2c] ss:$16 sps:$4 sm:$0xff]  }
 0x409   : > { %3834 = vmatprep.subr.bf16.mxu1 %v6288_v21 }
 0x40b   : > { %3749 = vmatpush1.bf16.msra.mxu0 %v6283_v22  ;;  %v6355_v22 = vld [vmem:[#allocation10 + $0xa20] ss:$16 sps:$4 sm:$0xff]  }
 0x40c   : > { %3835 = vmatpush1.bf16.msra.mxu1 %v6286_v23  ;;  %3750 = vmatprep.subr.bf16.mxu0 %v6291_v24  ;;  %v6358_v23 = vld [vmem:[#allocation10 + $0xa28] ss:$16 sps:$4 sm:$0xff]   ;;  %v6363_v24 = vld [vmem:[#allocation10 + $0xa44] ss:$16 sps:$4 sm:$0xff]  }
 0x40d   : > { %3836 = vmatprep.subr.bf16.mxu1 %v6294_v25  ;;  %v6366_v25 = vld [vmem:[#allocation10 + $0xa4c] ss:$16 sps:$4 sm:$0xff]  }
 0x40f   : > { %3751 = vmatpush1.bf16.msra.mxu0 %v6289_v26  ;;  %v6361_v26 = vld [vmem:[#allocation10 + $0xa40] ss:$16 sps:$4 sm:$0xff]  }
 0x410   : > { %3837 = vmatpush1.bf16.msra.mxu1 %v6292_v27  ;;  %3752 = vmatprep.subr.bf16.mxu0 %v6297_v28  ;;  %v6364_v27 = vld [vmem:[#allocation10 + $0xa48] ss:$16 sps:$4 sm:$0xff]   ;;  %v6369_v28 = vld [vmem:[#allocation10 + $0xa64] ss:$16 sps:$4 sm:$0xff]  }
 0x411   : > { %3838 = vmatprep.subr.bf16.mxu1 %v6300_v29  ;;  %v6372_v29 = vld [vmem:[#allocation10 + $0xa6c] ss:$16 sps:$4 sm:$0xff]  }
 0x413   : > { %3753 = vmatpush1.bf16.msra.mxu0 %v6295_v30  ;;  %v6367_v30 = vld [vmem:[#allocation10 + $0xa60] ss:$16 sps:$4 sm:$0xff]  }
 0x414   : > { %3839 = vmatpush1.bf16.msra.mxu1 %v6298_v31  ;;  %3754 = vmatprep.subr.bf16.mxu0 %v6303_v32  ;;  %v6370_v31 = vld [vmem:[#allocation10 + $0xa68] ss:$16 sps:$4 sm:$0xff]   ;;  %v6375_v32 = vld [vmem:[#allocation10 + $0xa84] ss:$16 sps:$4 sm:$0xff]  }
 0x415   : > { %3840 = vmatprep.subr.bf16.mxu1 %v6306_v33  ;;  %v6378_v33 = vld [vmem:[#allocation10 + $0xa8c] ss:$16 sps:$4 sm:$0xff]  }
 0x417   : > { %3755 = vmatpush1.bf16.msra.mxu0 %v6301_v34  ;;  %v6373_v34 = vld [vmem:[#allocation10 + $0xa80] ss:$16 sps:$4 sm:$0xff]  }
 0x418   : > { %3841 = vmatpush1.bf16.msra.mxu1 %v6304_v35  ;;  %3756 = vmatprep.subr.bf16.mxu0 %v6309_v37  ;;  %v6376_v35 = vld [vmem:[#allocation10 + $0xa88] ss:$16 sps:$4 sm:$0xff]   ;;  %v6381_v37 = vld [vmem:[#allocation10 + $0xaa4] ss:$16 sps:$4 sm:$0xff]  }
 0x419   : > { %3842 = vmatprep.subr.bf16.mxu1 %v6312_v39  ;;  %v6384_v39 = vld [vmem:[#allocation10 + $0xaac] ss:$16 sps:$4 sm:$0xff]  }
 0x41b   : > { %3757 = vmatpush1.bf16.msra.mxu0 %v6307_v40  ;;  %v6379_v40 = vld [vmem:[#allocation10 + $0xaa0] ss:$16 sps:$4 sm:$0xff]  }
 0x41c   : > { %3843 = vmatpush1.bf16.msra.mxu1 %v6310_v41  ;;  %3758 = vmatprep.subr.bf16.mxu0 %v6315_v42  ;;  %v6382_v41 = vld [vmem:[#allocation10 + $0xaa8] ss:$16 sps:$4 sm:$0xff]   ;;  %v6387_v42 = vld [vmem:[#allocation10 + $0xac4] ss:$16 sps:$4 sm:$0xff]  }
 0x41d   : > { %3844 = vmatprep.subr.bf16.mxu1 %v6318_v43  ;;  %v6390_v43 = vld [vmem:[#allocation10 + $0xacc] ss:$16 sps:$4 sm:$0xff]  }
 0x41f   : > { %3759 = vmatpush1.bf16.msra.mxu0 %v6313_v44  ;;  %v6385_v44 = vld [vmem:[#allocation10 + $0xac0] ss:$16 sps:$4 sm:$0xff]  }
 0x420   : > { %3845 = vmatpush1.bf16.msra.mxu1 %v6316_v46  ;;  %3760 = vmatprep.subr.bf16.mxu0 %v6321_v47  ;;  %v6388_v46 = vld [vmem:[#allocation10 + $0xac8] ss:$16 sps:$4 sm:$0xff]   ;;  %v6393_v47 = vld [vmem:[#allocation10 + $0xae4] ss:$16 sps:$4 sm:$0xff]  }
 0x421   : > { %3846 = vmatprep.subr.bf16.mxu1 %v6324_v48  ;;  %v6396_v48 = vld [vmem:[#allocation10 + $0xaec] ss:$16 sps:$4 sm:$0xff]  }
 0x423   : > { %3761 = vmatpush1.bf16.msra.mxu0 %v6319_v50  ;;  %v6391_v50 = vld [vmem:[#allocation10 + $0xae0] ss:$16 sps:$4 sm:$0xff]  }
 0x424   : > { %3847 = vmatpush1.bf16.msra.mxu1 %v6322_v51  ;;  %3762 = vmatprep.subr.bf16.mxu0 %v6327_v53  ;;  %v6394_v51 = vld [vmem:[#allocation10 + $0xae8] ss:$16 sps:$4 sm:$0xff]   ;;  %v6399_v53 = vld [vmem:[#allocation10 + $0xb04] ss:$16 sps:$4 sm:$0xff]  }
 0x425   : > { %3848 = vmatprep.subr.bf16.mxu1 %v6330_v54  ;;  %v6402_v54 = vld [vmem:[#allocation10 + $0xb0c] ss:$16 sps:$4 sm:$0xff]  }
 0x427   : > { %3763 = vmatpush1.bf16.msra.mxu0 %v6325_v57  ;;  %v6397_v57 = vld [vmem:[#allocation10 + $0xb00] ss:$16 sps:$4 sm:$0xff]  }
 0x428   : > { %3849 = vmatpush1.bf16.msra.mxu1 %v6328_v58  ;;  %3764 = vmatprep.subr.bf16.mxu0 %v6333_v59  ;;  %v6400_v58 = vld [vmem:[#allocation10 + $0xb08] ss:$16 sps:$4 sm:$0xff]   ;;  %v6405_v59 = vld [vmem:[#allocation10 + $0xb24] ss:$16 sps:$4 sm:$0xff]  }
 0x429   : > { %3850 = vmatprep.subr.bf16.mxu1 %v6336_v60  ;;  %v6408_v60 = vld [vmem:[#allocation10 + $0xb2c] ss:$16 sps:$4 sm:$0xff]  }
 0x42b   : > { %3765 = vmatpush1.bf16.msra.mxu0 %v6331_v45  ;;  %v6403_v45 = vld [vmem:[#allocation10 + $0xb20] ss:$16 sps:$4 sm:$0xff]  }
 0x42c   : > { %3851 = vmatpush1.bf16.msra.mxu1 %v6334_v61  ;;  %3766 = vmatprep.subr.bf16.mxu0 %v6339_v62  ;;  %v6406_v61 = vld [vmem:[#allocation10 + $0xb28] ss:$16 sps:$4 sm:$0xff]   ;;  %v6411_v62 = vld [vmem:[#allocation10 + $0xb44] ss:$16 sps:$4 sm:$0xff]  }
 0x42d   : > { %3852 = vmatprep.subr.bf16.mxu1 %v6342_v63  ;;  %v6414_v63 = vld [vmem:[#allocation10 + $0xb4c] ss:$16 sps:$4 sm:$0xff]  }
 0x42f   : > { %3767 = vmatpush1.bf16.msra.mxu0 %v6337_v1  ;;  %v6409_v1 = vld [vmem:[#allocation10 + $0xb40] ss:$16 sps:$4 sm:$0xff]  }
 0x430   : > { %3853 = vmatpush1.bf16.msra.mxu1 %v6340_v2  ;;  %3768 = vmatprep.subr.bf16.mxu0 %v6345_v3  ;;  %v6412_v2 = vld [vmem:[#allocation10 + $0xb48] ss:$16 sps:$4 sm:$0xff]   ;;  %v6417_v3 = vld [vmem:[#allocation10 + $0xb64] ss:$16 sps:$4 sm:$0xff]  }
 0x431   : > { %3854 = vmatprep.subr.bf16.mxu1 %v6348_v4  ;;  %v6420_v4 = vld [vmem:[#allocation10 + $0xb6c] ss:$16 sps:$4 sm:$0xff]  }
 0x433   : > { %3769 = vmatpush1.bf16.msra.mxu0 %v6343_v56  ;;  %v6415_v56 = vld [vmem:[#allocation10 + $0xb60] ss:$16 sps:$4 sm:$0xff]  }
 0x434   : > { %3855 = vmatpush1.bf16.msra.mxu1 %v6346_v5  ;;  %3781 = vmatprep.subr.bf16.mxu0 %v6351_v15  ;;  %v6418_v5 = vld [vmem:[#allocation10 + $0xb68] ss:$16 sps:$4 sm:$0xff]   ;;  %v6423_v15 = vld [vmem:[#allocation10 + $0xb84] ss:$16 sps:$4 sm:$0xff]  }
 0x435   : > { %3867 = vmatprep.subr.bf16.mxu1 %v6354_v6  ;;  %v6426_v6 = vld [vmem:[#allocation10 + $0xb8c] ss:$16 sps:$4 sm:$0xff]  }
 0x4c9   : > { %v2913_v7 = vpop.f32.mrb[12].mxu0 }
 0x4ca   : > { %v2915_v55 = vpop.f32.mrb[13].mxu0  ;;  %v2956_v14 = vpop.f32.mrb[12].mxu1 }
 0x4cb   : > { %v2917_v8 = vpop.f32.mrb[14].mxu0  ;;  %v2958_v0 = vpop.f32.mrb[13].mxu1 }
 0x4cc   : > { %v2965_v9 = vpack.c.bf16 %v2917_v8, %v2913_v7  ;;  %v2919_v10 = vpop.f32.mrb[15].mxu0  ;;  %v2960_v11 = vpop.f32.mrb[14].mxu1  ;;  %v6421_v7 = vld [vmem:[#allocation10 + $0xb80] ss:$16 sps:$4 sm:$0xff]   ;;  %v6432_v8 = vld [vmem:[#allocation10 + $0xbac] ss:$16 sps:$4 sm:$0xff]  }
 0x4cd   : > { %v2966_v12 = vpack.c.bf16 %v2919_v10, %v2915_v55  ;;  %v7397_v17 = vpack.c.bf16 %v2960_v11, %v2956_v14  ;;  %v2962_v18 = vpop.f32.mrb[15].mxu1  ;;  %v6424_v55 = vld [vmem:[#allocation10 + $0xb88] ss:$16 sps:$4 sm:$0xff]   ;;  %v6429_v14 = vld [vmem:[#allocation10 + $0xba4] ss:$16 sps:$4 sm:$0xff]  }
 0x4ce   : > { %v2968_v21 = vpack.c.bf16 %v2962_v18, %v2958_v0  ;;  %v6427_v0 = vld [vmem:[#allocation10 + $0xba0] ss:$16 sps:$4 sm:$0xff]   ;;  %v6435_v10 = vld [vmem:[#allocation10 + $0xbc4] ss:$16 sps:$4 sm:$0xff]   ;;  %v6438_v11 = vld [vmem:[#allocation10 + $0xbcc] ss:$16 sps:$4 sm:$0xff]  }
 0x4cf   : > { %3770 = vmatprep.mubr.bf16.mxu0 %v2966_v12  ;;  %3856 = vmatprep.mubr.bf16.mxu1 %v2966_v12  ;;  %v6433_v12 = vld [vmem:[#allocation10 + $0xbc0] ss:$16 sps:$4 sm:$0xff]   ;;  %v6444_v18 = vld [vmem:[#allocation10 + $0xbec] ss:$16 sps:$4 sm:$0xff]  }
 0x4d0   : > { %3771 = vmatmul.mubr.bf16.vlgmr.msra.gmra.mrb[8].mxu0 %v2965_v9  ;;  %3857 = vmatmul.mubr.bf16.vlgmr.msra.gmra.mrb[8].mxu1 %v2965_v9  ;;  %v6430_v9 = vld [vmem:[#allocation10 + $0xba8] ss:$16 sps:$4 sm:$0xff]  }
 0x4d1   : > { %3782 = vmatpush1.bf16.msra.mxu0 %v6349_v13  ;;  %3868 = vmatpush1.bf16.msra.mxu1 %v6352_v16  ;;  %v6436_v13 = vld [vmem:[#allocation10 + $0xbc8] ss:$16 sps:$4 sm:$0xff]   ;;  %v6441_v16 = vld [vmem:[#allocation10 + $0xbe4] ss:$16 sps:$4 sm:$0xff]  }
 0x4d2   : > { %3783 = vmatprep.subr.bf16.mxu0 %v6357_v19  ;;  %3869 = vmatprep.subr.bf16.mxu1 %v6360_v20  ;;  %v4000_v19 = vld [vmem:[%s7776_s30 + $0x80] sm:$0xff]  ;;  %v4001_v20 = vld [vmem:[%s7776_s30 + $0x88] sm:$0xff] }
 0x4d3   : > { %3813 = vmatprep.mubr.bf16.mxu0 %v2968_v21  ;;  %3899 = vmatprep.mubr.bf16.mxu1 %v2968_v21  ;;  %v4032_v21 = vld [vmem:[%s7776_s30 + $0x180] sm:$0xff] }
 0x4d5   : > { %3784 = vmatpush1.bf16.msra.mxu0 %v6355_v22  ;;  %3870 = vmatpush1.bf16.msra.mxu1 %v6358_v23  ;;  %v4033_v22 = vld [vmem:[%s7776_s30 + $0x188] sm:$0xff]  ;;  %v6439_v23 = vld [vmem:[#allocation10 + $0xbe0] ss:$16 sps:$4 sm:$0xff]  }
 0x4d6   : > { %3785 = vmatprep.subr.bf16.mxu0 %v6363_v24  ;;  %3871 = vmatprep.subr.bf16.mxu1 %v6366_v25  ;;  %v6442_v24 = vld [vmem:[#allocation10 + $0xbe8] ss:$16 sps:$4 sm:$0xff]   ;;  %v3984_v25 = vld [vmem:[%s7776_s30] sm:$0xff] }
 0x4d9   : > { %3786 = vmatpush1.bf16.msra.mxu0 %v6361_v26  ;;  %3872 = vmatpush1.bf16.msra.mxu1 %v6364_v27  ;;  %v3985_v26 = vld [vmem:[%s7776_s30 + $0x8] sm:$0xff]  ;;  %v5559_v27 = vpack.c.bf16 %v4001_v20, %v4000_v19 }
 0x4da   : > { %3787 = vmatprep.subr.bf16.mxu0 %v6369_v28  ;;  %3873 = vmatprep.subr.bf16.mxu1 %v6372_v29  ;;  %v5591_v28 = vpack.c.bf16 %v4033_v22, %v4032_v21  ;;  %v4016_v29 = vld [vmem:[%s7776_s30 + $0x100] sm:$0xff]  ;;  %v4025_v19 = vld [vmem:[%s7776_s30 + $0x148] sm:$0xff]  ;;  %v4010_v21 = vld [vmem:[%s7776_s30 + $0xd0] sm:$0xff] }
 0x4db   : > { %v4011_v22 = vld [vmem:[%s7776_s30 + $0xd8] sm:$0xff] }
 0x4dd   : > { %3788 = vmatpush1.bf16.msra.mxu0 %v6367_v30  ;;  %3874 = vmatpush1.bf16.msra.mxu1 %v6370_v31  ;;  %v4017_v30 = vld [vmem:[%s7776_s30 + $0x108] sm:$0xff]  ;;  %v4002_v31 = vld [vmem:[%s7776_s30 + $0x90] sm:$0xff] }
 0x4de   : > { %3789 = vmatprep.subr.bf16.mxu0 %v6375_v32  ;;  %3875 = vmatprep.subr.bf16.mxu1 %v6378_v33  ;;  %v4003_v32 = vld [vmem:[%s7776_s30 + $0x98] sm:$0xff]  ;;  %v4034_v33 = vld [vmem:[%s7776_s30 + $0x190] sm:$0xff] }
 0x4e1   : > { %3790 = vmatpush1.bf16.msra.mxu0 %v6373_v34  ;;  %3876 = vmatpush1.bf16.msra.mxu1 %v6376_v35  ;;  %v4035_v34 = vld [vmem:[%s7776_s30 + $0x198] sm:$0xff]  ;;  %v5561_v35 = vpack.c.bf16 %v3985_v26, %v3984_v25  ;;  %v3994_v26 = vld [vmem:[%s7776_s30 + $0x50] sm:$0xff] }
 0x4e2   : > { %3791 = vmatprep.subr.bf16.mxu0 %v6381_v37  ;;  %3877 = vmatprep.subr.bf16.mxu1 %v6384_v39  ;;  %v5593_v37 = vpack.c.bf16 %v4017_v30, %v4016_v29  ;;  %v3986_v39 = vld [vmem:[%s7776_s30 + $0x10] sm:$0xff]  ;;  %v4043_v25 = vld [vmem:[%s7776_s30 + $0x1d8] sm:$0xff] }
 0x4e3   : > { %v4026_v30 = vld [vmem:[%s7776_s30 + $0x150] sm:$0xff] }
 0x4e5   : > { %3792 = vmatpush1.bf16.msra.mxu0 %v6379_v40  ;;  %3878 = vmatpush1.bf16.msra.mxu1 %v6382_v41  ;;  %v3987_v40 = vld [vmem:[%s7776_s30 + $0x18] sm:$0xff]  ;;  %v5563_v41 = vpack.c.bf16 %v4003_v32, %v4002_v31 }
 0x4e6   : > { %3793 = vmatprep.subr.bf16.mxu0 %v6387_v42  ;;  %3879 = vmatprep.subr.bf16.mxu1 %v6390_v43  ;;  %v5595_v42 = vpack.c.bf16 %v4035_v34, %v4034_v33  ;;  %v4018_v43 = vld [vmem:[%s7776_s30 + $0x110] sm:$0xff]  ;;  %v4027_v31 = vld [vmem:[%s7776_s30 + $0x158] sm:$0xff]  ;;  %v4012_v33 = vld [vmem:[%s7776_s30 + $0xe0] sm:$0xff] }
 0x4e7   : > { %v5613_v32 = vpack.c.bf16 %v4027_v31, %v4026_v30  ;;  %v4013_v34 = vld [vmem:[%s7776_s30 + $0xe8] sm:$0xff] }
 0x4e9   : > { %3794 = vmatpush1.bf16.msra.mxu0 %v6385_v44  ;;  %3880 = vmatpush1.bf16.msra.mxu1 %v6388_v46  ;;  %v4019_v44 = vld [vmem:[%s7776_s30 + $0x118] sm:$0xff]  ;;  %v4004_v46 = vld [vmem:[%s7776_s30 + $0xa0] sm:$0xff] }
 0x4ea   : > { %3795 = vmatprep.subr.bf16.mxu0 %v6393_v47  ;;  %3881 = vmatprep.subr.bf16.mxu1 %v6396_v48  ;;  %v4005_v47 = vld [vmem:[%s7776_s30 + $0xa8] sm:$0xff]  ;;  %v4036_v48 = vld [vmem:[%s7776_s30 + $0x1a0] sm:$0xff] }
 0x4ed   : > { %3796 = vmatpush1.bf16.msra.mxu0 %v6391_v50  ;;  %3882 = vmatpush1.bf16.msra.mxu1 %v6394_v51  ;;  %v4037_v50 = vld [vmem:[%s7776_s30 + $0x1a8] sm:$0xff]  ;;  %v5565_v51 = vpack.c.bf16 %v3987_v40, %v3986_v39  ;;  %v3996_v40 = vld [vmem:[%s7776_s30 + $0x60] sm:$0xff] }
 0x4ee   : > { %3797 = vmatprep.subr.bf16.mxu0 %v6399_v53  ;;  %3883 = vmatprep.subr.bf16.mxu1 %v6402_v54  ;;  %v5597_v53 = vpack.c.bf16 %v4019_v44, %v4018_v43  ;;  %v5567_v54 = vpack.c.bf16 %v4005_v47, %v4004_v46  ;;  %v4045_v39 = vld [vmem:[%s7776_s30 + $0x1e8] sm:$0xff]  ;;  %v4028_v44 = vld [vmem:[%s7776_s30 + $0x160] sm:$0xff] }
 0x4ef   : > { %v4029_v46 = vld [vmem:[%s7776_s30 + $0x168] sm:$0xff] }
 0x4f0   : > { %v5617_v47 = vpack.c.bf16 %v4029_v46, %v4028_v44 }
 0x4f1   : > { %3798 = vmatpush1.bf16.msra.mxu0 %v6397_v57  ;;  %3884 = vmatpush1.bf16.msra.mxu1 %v6400_v58  ;;  %v5599_v57 = vpack.c.bf16 %v4037_v50, %v4036_v48  ;;  %v3988_v58 = vld [vmem:[%s7776_s30 + $0x20] sm:$0xff]  ;;  %v4014_v48 = vld [vmem:[%s7776_s30 + $0xf0] sm:$0xff]  ;;  %v4015_v50 = vld [vmem:[%s7776_s30 + $0xf8] sm:$0xff] }
 0x4f2   : > { %3799 = vmatprep.subr.bf16.mxu0 %v6405_v59  ;;  %3885 = vmatprep.subr.bf16.mxu1 %v6408_v60  ;;  %v4020_v59 = vld [vmem:[%s7776_s30 + $0x120] sm:$0xff] }
 0x4f5   : > { %3800 = vmatpush1.bf16.msra.mxu0 %v6403_v45  ;;  %3886 = vmatpush1.bf16.msra.mxu1 %v6406_v61  ;;  %v4021_v45 = vld [vmem:[%s7776_s30 + $0x128] sm:$0xff] }
 0x4f6   : > { %3801 = vmatprep.subr.bf16.mxu0 %v6411_v62  ;;  %3887 = vmatprep.subr.bf16.mxu1 %v6414_v63  ;;  %v5601_v61 = vpack.c.bf16 %v4021_v45, %v4020_v59  ;;  %v4006_v62 = vld [vmem:[%s7776_s30 + $0xb0] sm:$0xff]  ;;  %v4007_v63 = vld [vmem:[%s7776_s30 + $0xb8] sm:$0xff] }
 0x4f7   : > { %v4031_v45 = vld [vmem:[%s7776_s30 + $0x178] sm:$0xff] }
 0x4f9   : > { %3802 = vmatpush1.bf16.msra.mxu0 %v6409_v1  ;;  %3888 = vmatpush1.bf16.msra.mxu1 %v6412_v2  ;;  %v4038_v1 = vld [vmem:[%s7776_s30 + $0x1b0] sm:$0xff]  ;;  %v5571_v2 = vpack.c.bf16 %v4007_v63, %v4006_v62  ;;  %v3918_v62 = vld [vmem:[#allocation11] sm:$0xf] }
 0x4fa   : > { %3803 = vmatprep.subr.bf16.mxu0 %v6417_v3  ;;  %3889 = vmatprep.subr.bf16.mxu1 %v6420_v4  ;;  %v4039_v3 = vld [vmem:[%s7776_s30 + $0x1b8] sm:$0xff]  ;;  %v3990_v4 = vld [vmem:[%s7776_s30 + $0x30] sm:$0xff]  ;;  %v3923_v63 = vrot.slane %v3918_v62, %v7351_v36 }
 0x4fd   : > { %3804 = vmatpush1.bf16.msra.mxu0 %v6415_v56  ;;  %3890 = vmatpush1.bf16.msra.mxu1 %v6418_v5  ;;  %v3991_v56 = vld [vmem:[%s7776_s30 + $0x38] sm:$0xff]  ;;  %v5603_v5 = vpack.c.bf16 %v4039_v3, %v4038_v1  ;;  %v3931_v1 = vrot.slane %v3918_v62, %v7357_v49  ;;  %v3935_v3 = vrot.slane %v3918_v62, %v7359_v52 }
 0x4fe   : > { %3805 = vmatprep.subr.bf16.mxu0 %v6423_v15  ;;  %3891 = vmatprep.subr.bf16.mxu1 %v6426_v6  ;;  %v5573_v15 = vpack.c.bf16 %v3991_v56, %v3990_v4  ;;  %v4022_v6 = vld [vmem:[%s7776_s30 + $0x130] sm:$0xff] }
 0x501   : > { %3806 = vmatpush1.bf16.msra.mxu0 %v6421_v7  ;;  %3892 = vmatpush1.bf16.msra.mxu1 %v6424_v55  ;;  %v4023_v7 = vld [vmem:[%s7776_s30 + $0x138] sm:$0xff] }
 0x502   : > { %3807 = vmatprep.subr.bf16.mxu0 %v6429_v14  ;;  %3893 = vmatprep.subr.bf16.mxu1 %v6432_v8  ;;  %v5605_v55 = vpack.c.bf16 %v4023_v7, %v4022_v6  ;;  %v4008_v14 = vld [vmem:[%s7776_s30 + $0xc0] sm:$0xff]  ;;  %v4009_v8 = vld [vmem:[%s7776_s30 + $0xc8] sm:$0xff] }
 0x505   : > { %3808 = vmatpush1.bf16.msra.mxu0 %v6427_v0  ;;  %3894 = vmatpush1.bf16.msra.mxu1 %v6430_v9  ;;  %v4040_v0 = vld [vmem:[%s7776_s30 + $0x1c0] sm:$0xff]  ;;  %v5575_v9 = vpack.c.bf16 %v4009_v8, %v4008_v14 }
 0x506   : > { %3809 = vmatprep.subr.bf16.mxu0 %v6435_v10  ;;  %3895 = vmatprep.subr.bf16.mxu1 %v6438_v11  ;;  %v4041_v10 = vld [vmem:[%s7776_s30 + $0x1c8] sm:$0xff]  ;;  %v3992_v11 = vld [vmem:[%s7776_s30 + $0x40] sm:$0xff] }
 0x509   : > { %3810 = vmatpush1.bf16.msra.mxu0 %v6433_v12  ;;  %3896 = vmatpush1.bf16.msra.mxu1 %v6436_v13  ;;  %v3993_v12 = vld [vmem:[%s7776_s30 + $0x48] sm:$0xff]  ;;  %v5607_v13 = vpack.c.bf16 %v4041_v10, %v4040_v0 }
 0x50a   : > { %3811 = vmatprep.subr.bf16.mxu0 %v6441_v16  ;;  %3897 = vmatprep.subr.bf16.mxu1 %v6444_v18  ;;  %v5577_v16 = vpack.c.bf16 %v3993_v12, %v3992_v11  ;;  %v4024_v18 = vld [vmem:[%s7776_s30 + $0x140] sm:$0xff] }
 0x50b   : > { %v5609_v20 = vpack.c.bf16 %v4025_v19, %v4024_v18 }
 0x50d   : > { %3812 = vmatpush1.bf16.msra.mxu0 %v6439_v23  ;;  %3898 = vmatpush1.bf16.msra.mxu1 %v6442_v24  ;;  %v4042_v23 = vld [vmem:[%s7776_s30 + $0x1d0] sm:$0xff]  ;;  %v5579_v24 = vpack.c.bf16 %v4011_v22, %v4010_v21 }
 0x50e   : > { %5560 = vmatprep.subr.bf16.mxu0 %v5559_v27  ;;  %5592 = vmatprep.subr.bf16.mxu1 %v5591_v28  ;;  %v3995_v27 = vld [vmem:[%s7776_s30 + $0x58] sm:$0xff]  ;;  %v5611_v28 = vpack.c.bf16 %v4043_v25, %v4042_v23 }
 0x50f   : > { %v5581_v29 = vpack.c.bf16 %v3995_v27, %v3994_v26 }
 0x510   : > { %3814 = vmatmul.mubr.bf16.vlgmr.msra.gmra.mrb[8].mxu0 %v7397_v17  ;;  %3900 = vmatmul.mubr.bf16.vlgmr.msra.gmra.mrb[8].mxu1 %v7397_v17  ;;  %v3989_v17 = vld [vmem:[%s7776_s30 + $0x28] sm:$0xff] }
 0x511   : > { %5562 = vmatpush3.bf16.msra.mxu0 %v5561_v35  ;;  %5594 = vmatpush3.bf16.msra.mxu1 %v5593_v37  ;;  %v5569_v60 = vpack.c.bf16 %v3989_v17, %v3988_v58  ;;  %v4044_v35 = vld [vmem:[%s7776_s30 + $0x1e0] sm:$0xff]  ;;  %v5583_v37 = vpack.c.bf16 %v4013_v34, %v4012_v33  ;;  %v3999_v58 = vld [vmem:[%s7776_s30 + $0x78] sm:$0xff] }
 0x512   : > { %5564 = vmatprep.subr.bf16.mxu0 %v5563_v41  ;;  %5596 = vmatprep.subr.bf16.mxu1 %v5595_v42  ;;  %v3997_v41 = vld [vmem:[%s7776_s30 + $0x68] sm:$0xff]  ;;  %v5615_v42 = vpack.c.bf16 %v4045_v39, %v4044_v35 }
 0x513   : > { %v5585_v43 = vpack.c.bf16 %v3997_v41, %v3996_v40 }
 0x515   : > { %5566 = vmatpush3.bf16.msra.mxu0 %v5565_v51  ;;  %5598 = vmatpush3.bf16.msra.mxu1 %v5597_v53  ;;  %v4046_v51 = vld [vmem:[%s7776_s30 + $0x1f0] sm:$0xff]  ;;  %v5587_v53 = vpack.c.bf16 %v4015_v50, %v4014_v48 }
 0x516   : > { %5568 = vmatprep.subr.bf16.mxu0 %v5567_v54  ;;  %5600 = vmatprep.subr.bf16.mxu1 %v5599_v57  ;;  %v4047_v54 = vld [vmem:[%s7776_s30 + $0x1f8] sm:$0xff]  ;;  %v3998_v57 = vld [vmem:[%s7776_s30 + $0x70] sm:$0xff] }
 0x517   : > { %v5619_v17 = vpack.c.bf16 %v4047_v54, %v4046_v51  ;;  %v5589_v59 = vpack.c.bf16 %v3999_v58, %v3998_v57 }
 0x519   : > { %5570 = vmatpush3.bf16.msra.mxu0 %v5569_v60  ;;  %5602 = vmatpush3.bf16.msra.mxu1 %v5601_v61  ;;  %v4030_v60 = vld [vmem:[%s7776_s30 + $0x170] sm:$0xff] }
 0x51a   : > { %5572 = vmatprep.subr.bf16.mxu0 %v5571_v2  ;;  %5604 = vmatprep.subr.bf16.mxu1 %v5603_v5  ;;  %v5621_v61 = vpack.c.bf16 %v4031_v45, %v4030_v60  ;;  %v3927_v2 = vrot.slane %v3918_v62, %v7353_v38  ;;  %v4191_v60 = vld [vmem:[#allocation14 + $0x8] sm:$0xff]  ;;  %v4193_v45 = vld [vmem:[#allocation14 + $0x18] sm:$0xff]  ;;  %v4192_v62 = vld [vmem:[#allocation14 + $0x10] sm:$0xff] }
 0x51d   : > { %5574 = vmatpush3.bf16.msra.mxu0 %v5573_v15  ;;  %5606 = vmatpush3.bf16.msra.mxu1 %v5605_v55 }
 0x51e   : > { %5576 = vmatprep.subr.bf16.mxu0 %v5575_v9  ;;  %5608 = vmatprep.subr.bf16.mxu1 %v5607_v13 }
 0x521   : > { %5578 = vmatpush3.bf16.msra.mxu0 %v5577_v16  ;;  %5610 = vmatpush3.bf16.msra.mxu1 %v5609_v20 }
 0x522   : > { %5580 = vmatprep.subr.bf16.mxu0 %v5579_v24  ;;  %5612 = vmatprep.subr.bf16.mxu1 %v5611_v28 }
 0x525   : > { %5582 = vmatpush3.bf16.msra.mxu0 %v5581_v29  ;;  %5614 = vmatpush3.bf16.msra.mxu1 %v5613_v32 }
 0x526   : > { %5584 = vmatprep.subr.bf16.mxu0 %v5583_v37  ;;  %5616 = vmatprep.subr.bf16.mxu1 %v5615_v42 }
 0x529   : > { %5586 = vmatpush3.bf16.msra.mxu0 %v5585_v43  ;;  %5618 = vmatpush3.bf16.msra.mxu1 %v5617_v47 }
 0x52a   : > { %5588 = vmatprep.subr.bf16.mxu0 %v5587_v53  ;;  %5620 = vmatprep.subr.bf16.mxu1 %v5619_v17 }
 0x52d   : > { %5590 = vmatpush3.bf16.msra.mxu0 %v5589_v59  ;;  %5622 = vmatpush3.bf16.msra.mxu1 %v5621_v61  ;;  %v4190_v61 = vld [vmem:[#allocation14] sm:$0xff] }
 0x52e   : > { %4220 = vmatprep.subr.mxu0 %v4191_v60  ;;  %4291 = vmatprep.subr.mxu1 %v4193_v45  ;;  %v6474_v60 = vld [vmem:[#allocation17 + $0xf8] sm:$0xff]  }
 0x52f   : > { %v6475_v45 = vld [vmem:[#allocation17 + $0x38] sm:$0xff]  }
 0x5e3   : > { %v3815_v4 = vpop.f32.mrb[8].mxu0  ;;  %v3901_v56 = vpop.f32.mrb[8].mxu1 }
 0x5e4   : > { %v7597_v5 = vadd.f32 %v3923_v63, %v3815_v4  ;;  %v7599_v15 = vadd.f32 %v3931_v1, %v3901_v56  ;;  %v3817_v6 = vpop.f32.mrb[9].mxu0  ;;  %v3903_v7 = vpop.f32.mrb[9].mxu1 }
 0x5e5   : > { %v7601_v55 = vadd.f32 %v3927_v2, %v3817_v6  ;;  %v7603_v14 = vadd.f32 %v3935_v3, %v3903_v7  ;;  %v3819_v8 = vpop.f32.mrb[10].mxu0  ;;  %v3905_v0 = vpop.f32.mrb[10].mxu1 }
 0x5e6   : > { %v7605_v9 = vadd.f32 %v3923_v63, %v3819_v8  ;;  %v7607_v10 = vadd.f32 %v3931_v1, %v3905_v0  ;;  %v3821_v11 = vpop.f32.mrb[11].mxu0  ;;  %v3907_v12 = vpop.f32.mrb[11].mxu1  ;;  %v3948_v18 = vmax.f32 %v7597_v5, 0.0  ;;  %v3950_v19 = vmax.f32 %v7599_v15, 0.0 }
 0x5e7   : > { %v7609_v13 = vadd.f32 %v3927_v2, %v3821_v11  ;;  %v7611_v16 = vadd.f32 %v3935_v3, %v3907_v12  ;;  %v3949_v22 = vmax.f32 %v7601_v55, 0.0  ;;  %v3951_v23 = vmax.f32 %v7603_v14, 0.0  ;;  %v4048_v3 = vld [vmem:[#allocation13] sm:$0x1]  ;;  %v6445_v12 = vld [vmem:[#allocation17 + $0x40] sm:$0xff]  }
 0x5e8   : > { %v3952_v20 = vmax.f32 %v7605_v9, 0.0  ;;  %v3954_v21 = vmax.f32 %v7607_v10, 0.0  ;;  %v6909_v63 = vmov 0.0   ;;  %v5405_v10 = vld [vmem:[#allocation19] ss:$0 sm:$0xff] }
 0x5e9   : > { %v3953_v24 = vmax.f32 %v7609_v13, 0.0  ;;  %v3955_v25 = vmax.f32 %v7611_v16, 0.0 }
 0x5ea   : > { %v3956_v26 = vadd.f32 %v3952_v20, %v3948_v18  ;;  %v3970_v27 = vadd.f32 %v3954_v21, %v3950_v19 }
 0x5eb   : > { %v3963_v28 = vadd.f32 %v3953_v24, %v3949_v22  ;;  %v3977_v29 = vadd.f32 %v3955_v25, %v3951_v23 }
 0x5ec   : > { %v3957_v30 = vrot.slane %v3956_v26, 4  ;;  %v3971_v31 = vrot.slane %v3970_v27, 4 }
 0x5ed   : > { %v3964_v32 = vrot.slane %v3963_v28, 4  ;;  %v3978_v33 = vrot.slane %v3977_v29, 4 }
 0x5ee   : > { %v3958_v34 = vadd.f32 %v3957_v30, %v3956_v26  ;;  %v3972_v35 = vadd.f32 %v3971_v31, %v3970_v27  ;;  %v6446_v26 = vld [vmem:[#allocation17 + $0xc0] sm:$0xff]   ;;  %v6450_v30 = vld [vmem:[#allocation17 + $0xc8] sm:$0xff]  }
 0x5ef   : > { %v3965_v37 = vadd.f32 %v3964_v32, %v3963_v28  ;;  %v3979_v39 = vadd.f32 %v3978_v33, %v3977_v29  ;;  %v6447_v27 = vld [vmem:[#allocation17] sm:$0xff]   ;;  %v6449_v29 = vld [vmem:[#allocation17 + $0x48] sm:$0xff]   ;;  %v6453_v33 = vld [vmem:[#allocation17 + $0x50] sm:$0xff]  }
 0x5f0   : > { %v3959_v40 = vrot.slane %v3958_v34, 2  ;;  %v3973_v41 = vrot.slane %v3972_v35, 2  ;;  %v6448_v28 = vld [vmem:[#allocation17 + $0x80] sm:$0xff]   ;;  %v6451_v31 = vld [vmem:[#allocation17 + $0x8] sm:$0xff]  }
 0x5f1   : > { %v3966_v42 = vrot.slane %v3965_v37, 2  ;;  %v3980_v43 = vrot.slane %v3979_v39, 2  ;;  %v6452_v32 = vld [vmem:[#allocation17 + $0x88] sm:$0xff]  }
 0x5f2   : > { %v3960_v44 = vadd.f32 %v3959_v40, %v3958_v34  ;;  %v3974_v46 = vadd.f32 %v3973_v41, %v3972_v35  ;;  %v6454_v34 = vld [vmem:[#allocation17 + $0xd0] sm:$0xff]   ;;  %v6458_v40 = vld [vmem:[#allocation17 + $0xd8] sm:$0xff]  }
 0x5f3   : > { %v3967_v47 = vadd.f32 %v3966_v42, %v3965_v37  ;;  %v3981_v48 = vadd.f32 %v3980_v43, %v3979_v39  ;;  %v6455_v35 = vld [vmem:[#allocation17 + $0x10] sm:$0xff]   ;;  %v6457_v39 = vld [vmem:[#allocation17 + $0x58] sm:$0xff]   ;;  %v6461_v43 = vld [vmem:[#allocation17 + $0x60] sm:$0xff]  }
 0x5f4   : > { %v3961_v50 = vrot.slane %v3960_v44, 1  ;;  %v3975_v51 = vrot.slane %v3974_v46, 1  ;;  %v6456_v37 = vld [vmem:[#allocation17 + $0x90] sm:$0xff]   ;;  %v6459_v41 = vld [vmem:[#allocation17 + $0x18] sm:$0xff]  }
 0x5f5   : > { %v3968_v53 = vrot.slane %v3967_v47, 1  ;;  %v3982_v54 = vrot.slane %v3981_v48, 1  ;;  %v6460_v42 = vld [vmem:[#allocation17 + $0x98] sm:$0xff]  }
 0x5f6   : > { %v3962_v17 = vadd.f32 %v3961_v50, %v3960_v44  ;;  %v3976_v59 = vadd.f32 %v3975_v51, %v3974_v46  ;;  %v6462_v44 = vld [vmem:[#allocation17 + $0xe0] sm:$0xff]   ;;  %v6466_v50 = vld [vmem:[#allocation17 + $0xe8] sm:$0xff]  }
 0x5f7   : > { %v3969_v57 = vadd.f32 %v3968_v53, %v3967_v47  ;;  %v3983_v58 = vadd.f32 %v3982_v54, %v3981_v48  ;;  %v6463_v46 = vld [vmem:[#allocation17 + $0x20] sm:$0xff]   ;;  %v6465_v48 = vld [vmem:[#allocation17 + $0x68] sm:$0xff]   ;;  %v6469_v54 = vld [vmem:[#allocation17 + $0x70] sm:$0xff]  }
 0x5f8   : > { %v6464_v47 = vld [vmem:[#allocation17 + $0xa0] sm:$0xff]   ;;  %v6467_v51 = vld [vmem:[#allocation17 + $0x28] sm:$0xff]  }
 0x5f9   : > { %4113 = vmatprep.mubr.f32.mxu0 %v3969_v57  ;;  %4183 = vmatprep.mubr.f32.mxu1 %v3983_v58  ;;  %v6468_v53 = vld [vmem:[#allocation17 + $0xa8] sm:$0xff]   ;;  %v6470_v57 = vld [vmem:[#allocation17 + $0xf0] sm:$0xff]  }
 0x5fa   : > { %4114 = vmatmul.mubr.f32.vlgmr.msra.gmra.mrb[16].mxu0 %v3962_v17  ;;  %4184 = vmatmul.mubr.f32.vlgmr.msra.gmra.mrb[16].mxu1 %v3976_v59  ;;  %v6471_v58 = vld [vmem:[#allocation17 + $0x30] sm:$0xff]   ;;  %v6473_v59 = vld [vmem:[#allocation17 + $0x78] sm:$0xff]  }
 0x5fb   : > { %4221 = vmatpush1.msra.mxu0 %v4190_v61  ;;  %4284 = vmatprep.mubr.f32.mxu0 %v6909_v63  ;;  %v6472_v17 = vld [vmem:[#allocation17 + $0xb0] sm:$0xff]   ;;  %v6476_v61 = vld [vmem:[#allocation17 + $0xb8] sm:$0xff]  }
 0x5fc   : > { %4292 = vmatpush1.msra.mxu1 %v4192_v62  ;;  %4355 = vmatprep.mubr.f32.mxu1 %v6909_v63  ;;  %v4194_v62 = vld [vmem:[#allocation16] sm:$0xf] }
 0x5fd   : > { %5515 = vmatprep.subr.bf16.mxu0 %v6445_v12  ;;  %5537 = vmatprep.subr.bf16.mxu1 %v6446_v26  ;;  %v4199_v63 = vrot.slane %v4194_v62, %v7351_v36 }
 0x6cd   : > { %v5477_v1 = vpop.f32.mrb[16].mxu0  ;;  %v5512_v2 = vpop.f32.mrb[16].mxu1 }
 0x6ce   : > { %v5478_v4 = vpop.f32.mrb[17].mxu0  ;;  %v5513_v56 = vpop.f32.mrb[17].mxu1 }
 0x6cf   : > { %v5479_v6 = vadd.f32 %v5478_v4, %v5477_v1  ;;  %v5514_v7 = vadd.f32 %v5513_v56, %v5512_v2  ;;  %v4207_v1 = vrot.slane %v4194_v62, %v7357_v49  ;;  %v4203_v2 = vrot.slane %v4194_v62, %v7353_v38 }
 0x6d1   : > { %v4116_v8 = vadd.f32 %v5479_v6, %v4048_v3  ;;  %v4211_v3 = vrot.slane %v4194_v62, %v7359_v52 }
 0x6d3   : > { %v4186_v0 = vadd.f32 %v5514_v7, %v4116_v8 }
 0x6d5   : > { %v4189_v11 = vmax.f32 %v4186_v0, 0.0 }
 0x6d7   : > { %5399 = vmatmul.mubr.msk.f32.vlgmr.msra.gmra.mrb[18].mxu0 %vm4216_vm1, %v4189_v11  ;;  %5400 = vmatmul.mubr.msk.f32.vlgmr.msra.gmra.mrb[18].mxu1 %vm4216_vm1, %v4189_v11 }
 0x6d8   : > { %5516 = vmatpush3.bf16.msra.mxu0 %v6447_v27  ;;  %5538 = vmatpush3.bf16.msra.mxu1 %v6448_v28 }
 0x6d9   : > { %5517 = vmatprep.subr.bf16.mxu0 %v6449_v29  ;;  %5539 = vmatprep.subr.bf16.mxu1 %v6450_v30 }
 0x6dc   : > { %5518 = vmatpush3.bf16.msra.mxu0 %v6451_v31  ;;  %5540 = vmatpush3.bf16.msra.mxu1 %v6452_v32 }
 0x6dd   : > { %5519 = vmatprep.subr.bf16.mxu0 %v6453_v33  ;;  %5541 = vmatprep.subr.bf16.mxu1 %v6454_v34 }
 0x6e0   : > { %5520 = vmatpush3.bf16.msra.mxu0 %v6455_v35  ;;  %5542 = vmatpush3.bf16.msra.mxu1 %v6456_v37 }
 0x6e1   : > { %5521 = vmatprep.subr.bf16.mxu0 %v6457_v39  ;;  %5543 = vmatprep.subr.bf16.mxu1 %v6458_v40 }
 0x6e4   : > { %5522 = vmatpush3.bf16.msra.mxu0 %v6459_v41  ;;  %5544 = vmatpush3.bf16.msra.mxu1 %v6460_v42 }
 0x6e5   : > { %5523 = vmatprep.subr.bf16.mxu0 %v6461_v43  ;;  %5545 = vmatprep.subr.bf16.mxu1 %v6462_v44 }
 0x6e8   : > { %5524 = vmatpush3.bf16.msra.mxu0 %v6463_v46  ;;  %5546 = vmatpush3.bf16.msra.mxu1 %v6464_v47 }
 0x6e9   : > { %5525 = vmatprep.subr.bf16.mxu0 %v6465_v48  ;;  %5547 = vmatprep.subr.bf16.mxu1 %v6466_v50 }
 0x6ec   : > { %5526 = vmatpush3.bf16.msra.mxu0 %v6467_v51  ;;  %5548 = vmatpush3.bf16.msra.mxu1 %v6468_v53 }
 0x6ed   : > { %5527 = vmatprep.subr.bf16.mxu0 %v6469_v54  ;;  %5549 = vmatprep.subr.bf16.mxu1 %v6470_v57 }
 0x6f0   : > { %5528 = vmatpush3.bf16.msra.mxu0 %v6471_v58  ;;  %5550 = vmatpush3.bf16.msra.mxu1 %v6472_v17 }
 0x6f1   : > { %5529 = vmatprep.subr.bf16.mxu0 %v6473_v59  ;;  %5551 = vmatprep.subr.bf16.mxu1 %v6474_v60 }
 0x6f4   : > { %5530 = vmatpush3.bf16.msra.mxu0 %v6475_v45  ;;  %5552 = vmatpush3.bf16.msra.mxu1 %v6476_v61 }
 0x7aa   : > { %v4286_v4 = vpop.f32.mrb[18].mxu0  ;;  %v4357_v56 = vpop.f32.mrb[18].mxu1 }
 0x7ab   : > { %v4287_v6 = vadd.f32 %v4286_v4, %v4199_v63  ;;  %v4358_v7 = vadd.f32 %v4357_v56, %v4207_v1  ;;  %v4288_v8 = vpop.f32.mrb[19].mxu0  ;;  %v4359_v0 = vpop.f32.mrb[19].mxu1 }
 0x7ac   : > { %v4289_v11 = vadd.f32 %v4288_v8, %v4203_v2  ;;  %v4360_v12 = vadd.f32 %v4359_v0, %v4211_v3 }
 0x7ad   : > { %v5401_v26 = vmul.f32 -1.442695, %v4287_v6  ;;  %v5403_v27 = vmul.f32 -1.442695, %v4358_v7 }
 0x7ae   : > { %v5402_v28 = vmul.f32 -1.442695, %v4289_v11  ;;  %v5404_v29 = vmul.f32 -1.442695, %v4360_v12 }
 0x7af   : > { %6478 = vpow2.f32 %v5401_v26 }
 0x7b0   : > { %6480 = vpow2.f32 %v5403_v27 }
 0x7b1   : > { %6482 = vpow2.f32 %v5402_v28 }
 0x7b2   : > { %6484 = vpow2.f32 %v5404_v29 }
 0x7b9   : > { %v6479_v49 = vpop.eup %6478 }
 0x7ba   : > { %v6481_v38 = vpop.eup %6480  ;;  %v4374_v30 = vadd.f32 1.0, %v6479_v49 }
 0x7bb   : > { %v6483_v52 = vpop.eup %6482  ;;  %v4376_v31 = vadd.f32 1.0, %v6481_v38 }
 0x7bc   : > { %v6485_v32 = vpop.eup %6484  ;;  %6486 = vrcp.f32 %v4374_v30  ;;  %v4375_v33 = vadd.f32 1.0, %v6483_v52 }
 0x7bd   : > { %6488 = vrcp.f32 %v4376_v31  ;;  %v4377_v34 = vadd.f32 1.0, %v6485_v32 }
 0x7be   : > { %6490 = vrcp.f32 %v4375_v33 }
 0x7bf   : > { %6492 = vrcp.f32 %v4377_v34 }
 0x7c6   : > { %v6487_v35 = vpop.eup %6486 }
 0x7c7   : > { %v6489_v37 = vpop.eup %6488  ;;  %v4389_v39 = vrot.slane %v6487_v35, %v7351_v36 }
 0x7c8   : > { %v6491_v40 = vpop.eup %6490  ;;  %v4397_v41 = vrot.slane %v6489_v37, %v7351_v36 }
 0x7c9   : > { %v6493_v42 = vpop.eup %6492  ;;  %v4393_v43 = vrot.slane %v6491_v40, %v7351_v36  ;;  %v4402_v46 = vmul.f32 %v4389_v39, %v3948_v18  ;;  %v4406_v47 = vmul.f32 %v4389_v39, %v3952_v20 }
 0x7ca   : > { %v4401_v44 = vrot.slane %v6493_v42, %v7351_v36  ;;  %v4404_v51 = vmul.f32 %v4397_v41, %v3950_v19  ;;  %v4408_v53 = vmul.f32 %v4397_v41, %v3954_v21 }
 0x7cb   : > { %v4403_v48 = vmul.f32 %v4393_v43, %v3949_v22  ;;  %v4407_v50 = vmul.f32 %v4393_v43, %v3953_v24  ;;  %v4410_v20 = vpack.c.bf16 %v4406_v47, %v4402_v46 }
 0x7cc   : > { %v4405_v36 = vmul.f32 %v4401_v44, %v3951_v23  ;;  %v4409_v5 = vmul.f32 %v4401_v44, %v3955_v25  ;;  %v4412_v55 = vpack.c.bf16 %v4408_v53, %v4404_v51  ;;  %v6494_v25 = vld [vmem:[%s7320_s14] sm:$0xff]  }
 0x7cd   : > { %v4411_v9 = vpack.c.bf16 %v4407_v50, %v4403_v48  ;;  %v4759_v54 = vunpack.c.l.bf16 %v6494_v25  ;;  %v4760_v60 = vunpack.c.h.bf16 %v6494_v25 }
 0x7ce   : > { %v4413_v18 = vpack.c.bf16 %v4409_v5, %v4405_v36 }
 0x7cf   : > { %4709 = vmatprep.mubr.bf16.mxu0 %v4411_v9 }
 0x7d0   : > { %4750 = vmatprep.mubr.bf16.mxu1 %v4413_v18  ;;  %4710 = vmatmul.mubr.bf16.vlgmr.msra.gmra.mrb[20].mxu0 %v4410_v20 }
 0x7d1   : > { %4751 = vmatmul.mubr.bf16.vlgmr.msra.gmra.mrb[20].mxu1 %v4412_v55 }
 0x8a3   : > { %v5531_v15 = vpop.f32.mrb[20].mxu0 }
 0x8a4   : > { %v5553_v13 = vpop.f32.mrb[20].mxu1  ;;  %v5532_v19 = vpop.f32.mrb[21].mxu0 }
 0x8a5   : > { %v5533_v21 = vadd.f32 %v5532_v19, %v5531_v15  ;;  %v5554_v14 = vpop.f32.mrb[21].mxu1  ;;  %v5534_v22 = vpop.f32.mrb[22].mxu0 }
 0x8a6   : > { %v5555_v16 = vadd.f32 %v5554_v14, %v5553_v13  ;;  %v5556_v23 = vpop.f32.mrb[22].mxu1  ;;  %v5535_v24 = vpop.f32.mrb[23].mxu0 }
 0x8a7   : > { %v4712_v57 = vadd.f32 %v5533_v21, %v5405_v10  ;;  %v5536_v58 = vadd.f32 %v5535_v24, %v5534_v22  ;;  %v5557_v17 = vpop.f32.mrb[23].mxu1 }
 0x8a8   : > { %v5558_v59 = vadd.f32 %v5557_v17, %v5556_v23 }
 0x8a9   : > { %v4753_v45 = vadd.f32 %v5555_v16, %v4712_v57  ;;  %v4715_v61 = vadd.f32 %v5536_v58, %v5405_v10 }
 0x8ab   : > { %v4761_v62 = vadd.f32 %v4759_v54, %v4753_v45  ;;  %v4756_v63 = vadd.f32 %v5558_v59, %v4715_v61 }
 0x8ad   : > { %4763 = vst [vmem:[%s564_s1] sm:$0xff] %v4761_v62  ;;  %v4762_v1 = vadd.f32 %v4760_v60, %v4756_v63 }
 0x8af   : > { %4764 = vst [vmem:[%s564_s1 + $0x8] sm:$0xff] %v4762_v1 }
 0x8b0   : > { %6818 = shalt.err (!%p6815_p3)
}
 0x8b1   : > { %s6819_s4 = scalar_lea.hbm %s7669_s18, 256  ;;  %s6823_s6 = scalar_lea.hbm %s7777_s17, 512 }
 0x8b2   : > { %p6820_p0 = scmp.ne.s32.totalorder %s7669_s18, %s6819_s4  ;;  %p6824_p5 = scmp.lt.u32.totalorder %s7669_s18, %s7777_s17 }
 0x8b3   : > { %p6825_p10 = scmp.lt.u32.totalorder %s6823_s6, %s6819_s4  ;;  %p6827_p11 = scmp.lt.u32.totalorder %s6819_s4, %s7669_s18 }
 0x8b4   : > { %p6821_p2 = pnand %p6820_p0, %p7778_p12 }
 0x8b5   : > { %p6826_p1 = por %p6825_p10, %p6824_p5 }
 0x8b6   : > { %p6822_p6 = pneg %p6821_p2 }
 0x8b7   : > { %p6828_p13 = por %p6827_p11, %p6826_p1 }
 0x8b9   : > { %p6829_p8 = pnand %p6828_p13, %p6822_p6 }
 0x8bb   : > { %6832 = shalt.err (!%p6829_p8)
}
 0x8bc   : > { %s6911_s26 = smov 128   ;;  %s6912_s27 = smov 8  }
 0x8bd   : > { %5705 = dma.vmem_to_hbm [thread:$0]  (%p7778_p12), %s7664_s19, 256, %s7669_s18, %s4766_s16, %s6911_s26, %s6911_s26, %s6912_s27  }
 0x8be PF: > { %s4794_s0 = sand.u32 1, %s6879_s21   ;;  %p7779_p7 = scmp.ne.s32.totalorder %s7760_s28, 0 }
 0x8bf   : > { %p7780_p9 = scmp.ge.s32.totalorder %s6891_s24, 2  ;;  %s4795_s3 = scalar_lea.sflag [#allocation4], %s4794_s0 }
 0x8c1   : > { %p5743_p4 = pnand %p7780_p9, %p7779_p7 }
 0x8c3   : > { %6874 = dma.done.wait (!%p5743_p4), %s4795_s3, 256  }
 0x8c4   : > { %6876 = vsyncadd (!%p5743_p4), %s4795_s3, 4294967040  ;;  %p30_p3 = scmp.ge.s32.totalorder %s7234_s13, 4   ;;  %s7781_s21 = smov %s6883_s22 }
 0x8c5   : > { %s7782_s22 = smov %s6887_s23  ;;  %s7783_s23 = smov %s7245_s20 }
 0x8c6   : > { %s7784_s24 = smov %s7234_s13  ;;  %32 = sbr.rel (!%p30_p3) target bundleno = 18 (0x12), region = 156 }
 0x8cd   :  { %4800 = vsyncpa [#allocation3], 1 }
 0x8ce   :  { %4802 = vsyncpa [#allocation3 + $0x1], 1 }
 0x8cf   :  { %4803 = vsyncpa [#allocation6], 1 }
 0x8d0   :  { %4804 = vsyncpa [#allocation9], 1 }
 0x8d1   :  { %4805 = vsyncpa [#allocation12], 1 }
 0x8d2   :  { %4806 = vsyncpa [#allocation15], 1 }
 0x8d3   :  { %4807 = vsyncpa [#allocation18], 1 }
 0x8d4   :  { %4808 = vsyncpa [#allocation4], 1 }
 0x8d5   :  { %4810 = vsyncpa [#allocation4 + $0x1], 1 }

</bundles_post_ra>
